<compile_context>
chip_gen: v7x
topology: tpu7x:2x2x1
jax: 0.10.0
libtpu: 0.0.40
codegen_flags: <defaults>
</compile_context>

<pallas_src>
import functools

import jax
import jax.numpy as jnp
from jax import lax
from jax.experimental import pallas as pl
from jax.experimental.pallas import tpu as pltpu

LANE = 128          # channels are padded to multiples of the lane width
_BN_EPS = 1e-5


# ----------------------------------------------------------------------------
# Small helpers (host / XLA side)
# ----------------------------------------------------------------------------
def _round_up(x, m):
    return (x + m - 1) // m * m


def _pad_channels(x, c_pad):
    c = x.shape[-1]
    if c == c_pad:
        return x
    return jnp.pad(x, [(0, 0)] * (x.ndim - 1) + [(0, c_pad - c)])


def _fold_bn(bn_stats, eps=_BN_EPS):
    gamma, beta, mean, var = bn_stats
    scale = gamma / jnp.sqrt(var + eps)
    return scale, beta - mean * scale


def _prep_conv_weights(w_oihw, bn_stats, cin_pad, cout_pad):
    """OIHW conv weight + BN -> BN-scale-folded, channel-padded (kh*kw, cin_pad, cout_pad)
    bf16 weight and a (1, cout_pad) f32 bias."""
    scale, bias = _fold_bn(bn_stats)
    w = jnp.transpose(w_oihw, (2, 3, 1, 0)).astype(jnp.float32)      # (kh, kw, cin, cout)
    w = w * scale[None, None, None, :]                               # fold BN scale into weights
    kh, kw, cin, cout = w.shape
    w = jnp.pad(w, ((0, 0), (0, 0), (0, cin_pad - cin), (0, cout_pad - cout)))
    w = w.reshape(kh * kw, cin_pad, cout_pad).astype(jnp.bfloat16)
    b = jnp.pad(bias, (0, cout_pad - cout)).reshape(1, cout_pad).astype(jnp.float32)
    return w, b


def _prep_input(x, stride):
    """Zero-pad spatially by 1, (stride 2) polyphase-decompose, pad the phase width to a
    multiple of 8 and flatten (H, W) -> rows, so that every 3x3 tap becomes an ALIGNED row
    window (a free view) inside the kernel.  Returns ((N, P, rows, C), P, padded width)."""
    n, h, w, c = x.shape
    xp = jnp.pad(x, ((0, 0), (1, 1), (1, 1), (0, 0)))
    if stride == 1:
        hpp, wraw = h + 2, w + 2
        ph = xp[:, None]                                             # (N, 1, Hp, Wp, C)
    else:
        h2, w2 = _round_up(h + 2, stride), _round_up(w + 2, stride)
        xp = jnp.pad(xp, ((0, 0), (0, h2 - (h + 2)), (0, w2 - (w + 2)), (0, 0)))
        ph = jnp.stack([xp[:, a::stride, b::stride, :]
                        for a in range(stride) for b in range(stride)], axis=1)
        hpp, wraw = h2 // stride, w2 // stride
    wpp = _round_up(wraw, 8)
    ph = jnp.pad(ph, ((0, 0), (0, 0), (0, 0), (0, wpp - wraw), (0, 0)))
    p_cnt = ph.shape[1]
    return ph.reshape(n, p_cnt, hpp * wpp, c).astype(jnp.bfloat16), p_cnt, wpp


def _vmem_limit_bytes():
    """Per-chip-generation scoped VMEM limit (~3/4 of physical, capped)."""
    cap = 128 * 1024 * 1024
    try:
        cap = int(pltpu.get_tpu_info().vmem_capacity_bytes)
    except Exception:
        pass
    return max(32 * 1024 * 1024, min(cap * 3 // 4, 100 * 1024 * 1024))


# ----------------------------------------------------------------------------
# Pallas kernel: fused 3x3 conv + folded BN (+ shortcut) (+ ReLU)
# ----------------------------------------------------------------------------
def _shift_rows(v, c):
    """v'[i] = v[i + c] for a small static c (column offset of a tap group).  The wrapped tail
    rows only land in the W-padding region of the output and are cropped by the caller.
    (pltpu.roll(v, -c, 0) would do this purely on the XLU; slice+concat keeps the semantics
    and lowering unambiguous and is only applied to 1-2 partial sums per grid step.)"""
    if c == 0:
        return v
    return jnp.concatenate([v[c:], v[:c]], axis=0)


def _conv_bn_kernel(x_ref, w_ref, b_ref, *rest, groups, nb, m, wpp, apply_relu, shortcut_mode):
    """One grid step = `nb` images x one cout tile.  Per image: 9 aligned-view matmuls on the
    MXU (grouped by in-phase column offset, each group's f32 partial shifted once), folded-BN
    bias, optional fused shortcut (identity add or 1x1-conv+BN projection), optional ReLU, and
    a single lane-dense store."""
    if shortcut_mode == "proj":
        xs_ref, ws_ref, bs_ref, o_ref = rest
    elif shortcut_mode == "identity":
        xs_ref, o_ref = rest
    else:
        (o_ref,) = rest

    bias = b_ref[...]                                                # (1, TCO) f32
    for b in range(nb):
        acc = None
        for c, taps in groups:
            part = None
            for (p, r, t) in taps:
                xv = x_ref[b, p, pl.ds(r * wpp, m), :]               # aligned view, no copy
                d = jnp.dot(xv, w_ref[t], preferred_element_type=jnp.float32)
                part = d if part is None else part + d
            part = _shift_rows(part, c)
            acc = part if acc is None else acc + part
        res = acc + bias                                             # folded-BN bias
        if shortcut_mode == "proj":                                  # fused 1x1 conv + BN
            res = res + jnp.dot(xs_ref[b], ws_ref[...],
                                preferred_element_type=jnp.float32) + bs_ref[...]
        elif shortcut_mode == "identity":
            res = res + xs_ref[b].astype(jnp.float32)
        if apply_relu:
            res = jnp.maximum(res, 0.0)
        o_ref[b] = res.astype(o_ref.dtype)


def conv3x3_bn(x_nhwc, w_oihw, bn_stats, *, stride, apply_relu, shortcut=None,
               out_dtype=jnp.bfloat16):
    """Fused 3x3 conv (pad=1) + BN [+ shortcut] [+ ReLU].

    x_nhwc:   (N, H, W, Cin)  (cast to bf16 and lane-padded here; no-op if already done)
    w_oihw:   (Cout, Cin_w, 3, 3)
    shortcut: None
              | ("identity", xs)             xs: (N, Ho, Wo, C)   added to the output
              | ("proj", xs, ws_oihw, bn_s)  fused 1x1-conv+BN projection of xs
    Returns (N, Ho, Wo, Cout_pad) in out_dtype (channels lane-padded to 128).
    """
    n, h, w, _ = x_nhwc.shape
    cout = w_oihw.shape[0]
    cin_pad = _round_up(x_nhwc.shape[-1], LANE)
    cout_pad = _round_up(cout, LANE)
    ho = (h - 1) // stride + 1
    wo = (w - 1) // stride + 1

    xb = _pad_channels(x_nhwc.astype(jnp.bfloat16), cin_pad)
    phases, p_cnt, wpp = _prep_input(xb, stride)                     # (N, P, rows, Cin_pad)
    hw_rows = phases.shape[2]
    m = ho * wpp                                                     # matmul M per image

    wmat, bvec = _prep_conv_weights(w_oihw, bn_stats, cin_pad, cout_pad)

    # taps grouped by in-phase column offset c; each tap = (phase, row offset, weight index).
    groups = {}
    for dy in range(3):
        for dx in range(3):
            p = (dy % stride) * stride + (dx % stride)
            groups.setdefault(dx // stride, []).append((p, dy // stride, dy * 3 + dx))
    groups = tuple((c, tuple(taps)) for c, taps in sorted(groups.items()))

    # cout tiling: second ("parallel") grid axis for wide layers / v7x megacore.
    tco = cout_pad if cout_pad <= 256 else 256
    nj = cout_pad // tco

    # Fused shortcut operands, laid out row-compatible with the accumulator (W padded to wpp).
    shortcut_mode = "none"
    xs_arr = ws_mat = bs_vec = None
    cs_pad = 0
    if shortcut is not None:
        kind, xs = shortcut[0], shortcut[1]                          # xs: (N, Ho, Wo, Cs)
        assert xs.shape[1] == ho and xs.shape[2] == wo
        cs_pad = _round_up(xs.shape[-1], LANE)
        xs_arr = jnp.pad(_pad_channels(xs.astype(jnp.bfloat16), cs_pad),
                         ((0, 0), (0, 0), (0, wpp - wo), (0, 0))).reshape(n, m, cs_pad)
        if kind == "proj":
            ws_mat, bs_vec = _prep_conv_weights(shortcut[2], shortcut[3], cs_pad, cout_pad)
            ws_mat = ws_mat.reshape(cs_pad, cout_pad)
            shortcut_mode = "proj"
        else:
            assert cs_pad == cout_pad, "identity shortcut requires cin == cout"
            shortcut_mode = "identity"

    # Images folded per grid step: keeps the MXU M dimension large for the small-spatial
    # stages and amortizes weight/bias DMA, bounded by a per-buffer VMEM budget.
    bytes_per_img = (p_cnt * hw_rows * cin_pad * 2
                     + m * tco * jnp.dtype(out_dtype).itemsize
                     + (m * cs_pad * 2 if shortcut is not None else 0))
    nb = 1
    for cand in range(2, min(n, 8) + 1):
        if n % cand == 0 and cand * bytes_per_img <= 6 * 1024 * 1024:
            nb = cand

    in_specs = [
        pl.BlockSpec((nb, p_cnt, hw_rows, cin_pad), lambda i, j: (i, 0, 0, 0)),  # input
        pl.BlockSpec((9, cin_pad, tco), lambda i, j: (0, 0, j)),                 # BN-folded W
        pl.BlockSpec((1, tco), lambda i, j: (0, j)),                             # BN bias
    ]
    args = [phases, wmat, bvec]
    if shortcut_mode == "identity":
        in_specs.append(pl.BlockSpec((nb, m, tco), lambda i, j: (i, 0, j)))
        args.append(xs_arr)
    elif shortcut_mode == "proj":
        in_specs += [pl.BlockSpec((nb, m, cs_pad), lambda i, j: (i, 0, 0)),
                     pl.BlockSpec((cs_pad, tco), lambda i, j: (0, j)),
                     pl.BlockSpec((1, tco), lambda i, j: (0, j))]
        args += [xs_arr, ws_mat, bs_vec]

    kernel = functools.partial(_conv_bn_kernel, groups=groups, nb=nb, m=m, wpp=wpp,
                               apply_relu=apply_relu, shortcut_mode=shortcut_mode)

    out = pl.pallas_call(
        kernel,
        out_shape=jax.ShapeDtypeStruct((n, m, cout_pad), out_dtype),
        grid_spec=pltpu.PrefetchScalarGridSpec(
            num_scalar_prefetch=0,
            grid=(n // nb, nj),                     # batch blocks x cout tiles (both parallel)
            in_specs=in_specs,
            out_specs=pl.BlockSpec((nb, m, tco), lambda i, j: (i, 0, j)),
        ),
        compiler_params=pltpu.CompilerParams(
            dimension_semantics=("parallel", "parallel"),
            vmem_limit_bytes=_vmem_limit_bytes(),
        ),
    )(*args)
    # (N, m, cout_pad) -> (N, Ho, Wpp, cout_pad); crop the internal W padding (fuses with the
    # consumer's pad in XLA).
    return out.reshape(n, ho, wpp, cout_pad)[:, :, :wo, :]


# ----------------------------------------------------------------------------
# BasicBlock forward (Pallas path)
# ----------------------------------------------------------------------------
def basic_block_nhwc(x_nhwc, params, stride, out_dtype=jnp.bfloat16):
    """BasicBlock on NHWC input; returns NHWC with channels lane-padded to 128 (for chaining
    several blocks without extra layout round trips)."""
    n, h, w, cin = x_nhwc.shape
    cout = params["w1"].shape[0]
    cin_pad = _round_up(cin, LANE)
    x = _pad_channels(x_nhwc.astype(jnp.bfloat16), cin_pad)             # single cast + pad

    # conv1 (3x3, stride, pad 1) + BN1 + ReLU -> bf16 lane-padded NHWC, feeds conv2 directly.
    y1 = conv3x3_bn(x, params["w1"], params["bn1"], stride=stride, apply_relu=True,
                    out_dtype=jnp.bfloat16)

    # Shortcut source: the block input (already bf16 / lane-padded) at the output resolution.
    xs = x if stride == 1 else x[:, ::stride, ::stride, :]
    if "ws" in params:
        shortcut = ("proj", xs, params["ws"], params["bns"])
    else:
        assert stride == 1 and cin == cout, "identity shortcut requires stride=1 and cin==cout"
        shortcut = ("identity", xs)

    # conv2 (3x3, stride 1, pad 1) + BN2 + shortcut + final ReLU in ONE fused kernel.
    return conv3x3_bn(y1, params["w2"], params["bn2"], stride=1, apply_relu=True,
                      shortcut=shortcut, out_dtype=out_dtype)


def basic_block_forward(x_nchw, params, stride):
    """NCHW float32 wrapper matching the PyTorch module interface."""
    cout = params["w1"].shape[0]
    x = jnp.transpose(x_nchw.astype(jnp.bfloat16), (0, 2, 3, 1))         # NCHW -> NHWC, bf16
    y = basic_block_nhwc(x, params, stride, out_dtype=jnp.float32)
    return jnp.transpose(y[..., :cout], (0, 3, 1, 2))                    # drop pad, NHWC->NCHW


# ----------------------------------------------------------------------------
# Parameter init + pure-JAX reference (lax convs) for a correctness sanity check
# ----------------------------------------------------------------------------
def init_params(key, cin, cout, stride):
    ks = jax.random.split(key, 6)

    def bn_params(k):
        k1, k2, k3, k4 = jax.random.split(k, 4)
        gamma = 1.0 + 0.1 * jax.random.normal(k1, (cout,), jnp.float32)
        beta = 0.1 * jax.random.normal(k2, (cout,), jnp.float32)
        mean = 0.1 * jax.random.normal(k3, (cout,), jnp.float32)
        var = jax.random.uniform(k4, (cout,), jnp.float32, 0.5, 1.5)
        return (gamma, beta, mean, var)

    p = {
        "w1": 0.1 * jax.random.normal(ks[0], (cout, cin, 3, 3), jnp.float32),   # OIHW
        "bn1": bn_params(ks[1]),
        "w2": 0.1 * jax.random.normal(ks[2], (cout, cout, 3, 3), jnp.float32),
        "bn2": bn_params(ks[3]),
    }
    if stride != 1 or cin != cout:
        p["ws"] = 0.1 * jax.random.normal(ks[4], (cout, cin, 1, 1), jnp.float32)
        p["bns"] = bn_params(ks[5])
    return p


def reference_forward(x, params, stride, eps=_BN_EPS):
    def conv(x, w, s, pad):
        return lax.conv_general_dilated(
            x, w, (s, s), ((pad, pad), (pad, pad)),
            dimension_numbers=("NCHW", "OIHW", "NCHW"),
            precision=lax.Precision.HIGHEST)

    def bn(x, p):
        gamma, beta, mean, var = p
        inv = gamma / jnp.sqrt(var + eps)
        return x * inv[None, :, None, None] + (beta - mean * inv)[None, :, None, None]

    y = jax.nn.relu(bn(conv(x, params["w1"], stride, 1), params["bn1"]))
    y = bn(conv(y, params["w2"], 1, 1), params["bn2"])
    sc = bn(conv(x, params["ws"], stride, 0), params["bns"]) if "ws" in params else x
    return jax.nn.relu(y + sc)


if __name__ == "__main__":
    key = jax.random.PRNGKey(0)
    kx, kp1, kp2 = jax.random.split(key, 3)

    # Case 1: projection shortcut (stride=2, channel change), x: (2, 8, 16, 16) NCHW
    cin, cout, stride = 8, 16, 2
    x = jax.random.normal(kx, (2, cin, 16, 16), jnp.float32)
    params = init_params(kp1, cin, cout, stride)
    out = jax.jit(lambda a, p: basic_block_forward(a, p, stride))(x, params)
    out = jax.block_until_ready(out)
    ref = reference_forward(x, params, stride)
    assert out.shape == ref.shape == (2, cout, 8, 8)
    err1 = float(jnp.max(jnp.abs(out - ref)))
    assert err1 < 1e-1, f"case1 max abs err {err1}"      # bf16-operand tolerance

    # Case 2: identity shortcut (stride=1, same channels)
    cin2 = cout2 = 16
    x2 = jax.random.normal(kx, (2, cin2, 16, 16), jnp.float32)
    params2 = init_params(kp2, cin2, cout2, 1)
    out2 = jax.jit(lambda a, p: basic_block_forward(a, p, 1))(x2, params2)
    out2 = jax.block_until_ready(out2)
    ref2 = reference_forward(x2, params2, 1)
    assert out2.shape == ref2.shape == (2, cout2, 16, 16)
    err2 = float(jnp.max(jnp.abs(out2 - ref2)))
    assert err2 < 1e-1, f"case2 max abs err {err2}"

    print("KERNEL_OK")
</pallas_src>

<mosaic_0001>
module attributes {stable_mosaic.version = 11 : i64} {
  func.func @_conv_bn_kernel(%arg0: i32, %arg1: i32, %arg2: memref<2x4x144x128xbf16, #tpu.memory_space<vmem>>, %arg3: memref<9x128x128xbf16, #tpu.memory_space<vmem>>, %arg4: memref<1x128xf32, #tpu.memory_space<vmem>>, %arg5: memref<2x128x128xbf16, #tpu.memory_space<vmem>>) attributes {dimension_semantics = [#tpu.dimension_semantics<parallel>, #tpu.dimension_semantics<parallel>], iteration_bounds = array<i64: 1, 1>, scalar_prefetch = 0 : i64, scratch_operands = 0 : i64, tpu.core_type = #tpu.core_type<tc>, window_params = [{transform_indices = @transform_0, window_bounds = array<i64: 2, 4, 144, 128>}, {transform_indices = @transform_1, window_bounds = array<i64: 9, 128, 128>}, {transform_indices = @transform_2, window_bounds = array<i64: 1, 128>}, {transform_indices = @transform_3, window_bounds = array<i64: 2, 128, 128>}]} {
    %c0 = arith.constant 0 : index
    %c0_0 = arith.constant 0 : index
    %0 = vector.load %arg4[%c0, %c0_0] : memref<1x128xf32, #tpu.memory_space<vmem>>, vector<1x128xf32>
    %c0_1 = arith.constant 0 : index
    %c0_2 = arith.constant 0 : index
    %c0_3 = arith.constant 0 : index
    %c0_4 = arith.constant 0 : index
    %1 = vector.load %arg2[%c0_1, %c0_2, %c0_3, %c0_4] : memref<2x4x144x128xbf16, #tpu.memory_space<vmem>>, vector<1x1x128x128xbf16>
    %2 = vector.shape_cast %1 : vector<1x1x128x128xbf16> to vector<128x128xbf16>
    %c0_5 = arith.constant 0 : index
    %c0_6 = arith.constant 0 : index
    %c0_7 = arith.constant 0 : index
    %3 = vector.load %arg3[%c0_5, %c0_6, %c0_7] : memref<9x128x128xbf16, #tpu.memory_space<vmem>>, vector<1x128x128xbf16>
    %4 = vector.shape_cast %3 : vector<1x128x128xbf16> to vector<128x128xbf16>
    %cst = arith.constant dense<0.000000e+00> : vector<128x128xf32>
    %5 = tpu.matmul %2, %4, %cst {dimension_numbers = #tpu.dot_dimension_numbers<[1], [0], [0], [1], [0, 0, 1, 1], [], []>} : vector<128x128xbf16>, vector<128x128xbf16>, vector<128x128xf32> -> vector<128x128xf32>
    %c0_8 = arith.constant 0 : index
    %c1 = arith.constant 1 : index
    %c0_9 = arith.constant 0 : index
    %c0_10 = arith.constant 0 : index
    %6 = vector.load %arg2[%c0_8, %c1, %c0_9, %c0_10] : memref<2x4x144x128xbf16, #tpu.memory_space<vmem>>, vector<1x1x128x128xbf16>
    %7 = vector.shape_cast %6 : vector<1x1x128x128xbf16> to vector<128x128xbf16>
    %c1_11 = arith.constant 1 : index
    %c0_12 = arith.constant 0 : index
    %c0_13 = arith.constant 0 : index
    %8 = vector.load %arg3[%c1_11, %c0_12, %c0_13] : memref<9x128x128xbf16, #tpu.memory_space<vmem>>, vector<1x128x128xbf16>
    %9 = vector.shape_cast %8 : vector<1x128x128xbf16> to vector<128x128xbf16>
    %cst_14 = arith.constant dense<0.000000e+00> : vector<128x128xf32>
    %10 = tpu.matmul %7, %9, %cst_14 {dimension_numbers = #tpu.dot_dimension_numbers<[1], [0], [0], [1], [0, 0, 1, 1], [], []>} : vector<128x128xbf16>, vector<128x128xbf16>, vector<128x128xf32> -> vector<128x128xf32>
    %11 = arith.addf %5, %10 : vector<128x128xf32>
    %c0_15 = arith.constant 0 : index
    %c2 = arith.constant 2 : index
    %c0_16 = arith.constant 0 : index
    %c0_17 = arith.constant 0 : index
    %12 = vector.load %arg2[%c0_15, %c2, %c0_16, %c0_17] : memref<2x4x144x128xbf16, #tpu.memory_space<vmem>>, vector<1x1x128x128xbf16>
    %13 = vector.shape_cast %12 : vector<1x1x128x128xbf16> to vector<128x128xbf16>
    %c3 = arith.constant 3 : index
    %c0_18 = arith.constant 0 : index
    %c0_19 = arith.constant 0 : index
    %14 = vector.load %arg3[%c3, %c0_18, %c0_19] : memref<9x128x128xbf16, #tpu.memory_space<vmem>>, vector<1x128x128xbf16>
    %15 = vector.shape_cast %14 : vector<1x128x128xbf16> to vector<128x128xbf16>
    %cst_20 = arith.constant dense<0.000000e+00> : vector<128x128xf32>
    %16 = tpu.matmul %13, %15, %cst_20 {dimension_numbers = #tpu.dot_dimension_numbers<[1], [0], [0], [1], [0, 0, 1, 1], [], []>} : vector<128x128xbf16>, vector<128x128xbf16>, vector<128x128xf32> -> vector<128x128xf32>
    %17 = arith.addf %11, %16 : vector<128x128xf32>
    %c0_21 = arith.constant 0 : index
    %c3_22 = arith.constant 3 : index
    %c0_23 = arith.constant 0 : index
    %c0_24 = arith.constant 0 : index
    %18 = vector.load %arg2[%c0_21, %c3_22, %c0_23, %c0_24] : memref<2x4x144x128xbf16, #tpu.memory_space<vmem>>, vector<1x1x128x128xbf16>
    %19 = vector.shape_cast %18 : vector<1x1x128x128xbf16> to vector<128x128xbf16>
    %c4 = arith.constant 4 : index
    %c0_25 = arith.constant 0 : index
    %c0_26 = arith.constant 0 : index
    %20 = vector.load %arg3[%c4, %c0_25, %c0_26] : memref<9x128x128xbf16, #tpu.memory_space<vmem>>, vector<1x128x128xbf16>
    %21 = vector.shape_cast %20 : vector<1x128x128xbf16> to vector<128x128xbf16>
    %cst_27 = arith.constant dense<0.000000e+00> : vector<128x128xf32>
    %22 = tpu.matmul %19, %21, %cst_27 {dimension_numbers = #tpu.dot_dimension_numbers<[1], [0], [0], [1], [0, 0, 1, 1], [], []>} : vector<128x128xbf16>, vector<128x128xbf16>, vector<128x128xf32> -> vector<128x128xf32>
    %23 = arith.addf %17, %22 : vector<128x128xf32>
    %c0_28 = arith.constant 0 : index
    %c0_29 = arith.constant 0 : index
    %c16 = arith.constant 16 : index
    %c0_30 = arith.constant 0 : index
    %24 = vector.load %arg2[%c0_28, %c0_29, %c16, %c0_30] : memref<2x4x144x128xbf16, #tpu.memory_space<vmem>>, vector<1x1x128x128xbf16>
    %25 = vector.shape_cast %24 : vector<1x1x128x128xbf16> to vector<128x128xbf16>
    %c6 = arith.constant 6 : index
    %c0_31 = arith.constant 0 : index
    %c0_32 = arith.constant 0 : index
    %26 = vector.load %arg3[%c6, %c0_31, %c0_32] : memref<9x128x128xbf16, #tpu.memory_space<vmem>>, vector<1x128x128xbf16>
    %27 = vector.shape_cast %26 : vector<1x128x128xbf16> to vector<128x128xbf16>
    %cst_33 = arith.constant dense<0.000000e+00> : vector<128x128xf32>
    %28 = tpu.matmul %25, %27, %cst_33 {dimension_numbers = #tpu.dot_dimension_numbers<[1], [0], [0], [1], [0, 0, 1, 1], [], []>} : vector<128x128xbf16>, vector<128x128xbf16>, vector<128x128xf32> -> vector<128x128xf32>
    %29 = arith.addf %23, %28 : vector<128x128xf32>
    %c0_34 = arith.constant 0 : index
    %c1_35 = arith.constant 1 : index
    %c16_36 = arith.constant 16 : index
    %c0_37 = arith.constant 0 : index
    %30 = vector.load %arg2[%c0_34, %c1_35, %c16_36, %c0_37] : memref<2x4x144x128xbf16, #tpu.memory_space<vmem>>, vector<1x1x128x128xbf16>
    %31 = vector.shape_cast %30 : vector<1x1x128x128xbf16> to vector<128x128xbf16>
    %c7 = arith.constant 7 : index
    %c0_38 = arith.constant 0 : index
    %c0_39 = arith.constant 0 : index
    %32 = vector.load %arg3[%c7, %c0_38, %c0_39] : memref<9x128x128xbf16, #tpu.memory_space<vmem>>, vector<1x128x128xbf16>
    %33 = vector.shape_cast %32 : vector<1x128x128xbf16> to vector<128x128xbf16>
    %cst_40 = arith.constant dense<0.000000e+00> : vector<128x128xf32>
    %34 = tpu.matmul %31, %33, %cst_40 {dimension_numbers = #tpu.dot_dimension_numbers<[1], [0], [0], [1], [0, 0, 1, 1], [], []>} : vector<128x128xbf16>, vector<128x128xbf16>, vector<128x128xf32> -> vector<128x128xf32>
    %35 = arith.addf %29, %34 : vector<128x128xf32>
    %c0_41 = arith.constant 0 : index
    %c0_42 = arith.constant 0 : index
    %c0_43 = arith.constant 0 : index
    %c0_44 = arith.constant 0 : index
    %36 = vector.load %arg2[%c0_41, %c0_42, %c0_43, %c0_44] : memref<2x4x144x128xbf16, #tpu.memory_space<vmem>>, vector<1x1x128x128xbf16>
    %37 = vector.shape_cast %36 : vector<1x1x128x128xbf16> to vector<128x128xbf16>
    %c2_45 = arith.constant 2 : index
    %c0_46 = arith.constant 0 : index
    %c0_47 = arith.constant 0 : index
    %38 = vector.load %arg3[%c2_45, %c0_46, %c0_47] : memref<9x128x128xbf16, #tpu.memory_space<vmem>>, vector<1x128x128xbf16>
    %39 = vector.shape_cast %38 : vector<1x128x128xbf16> to vector<128x128xbf16>
    %cst_48 = arith.constant dense<0.000000e+00> : vector<128x128xf32>
    %40 = tpu.matmul %37, %39, %cst_48 {dimension_numbers = #tpu.dot_dimension_numbers<[1], [0], [0], [1], [0, 0, 1, 1], [], []>} : vector<128x128xbf16>, vector<128x128xbf16>, vector<128x128xf32> -> vector<128x128xf32>
    %c0_49 = arith.constant 0 : index
    %c2_50 = arith.constant 2 : index
    %c0_51 = arith.constant 0 : index
    %c0_52 = arith.constant 0 : index
    %41 = vector.load %arg2[%c0_49, %c2_50, %c0_51, %c0_52] : memref<2x4x144x128xbf16, #tpu.memory_space<vmem>>, vector<1x1x128x128xbf16>
    %42 = vector.shape_cast %41 : vector<1x1x128x128xbf16> to vector<128x128xbf16>
    %c5 = arith.constant 5 : index
    %c0_53 = arith.constant 0 : index
    %c0_54 = arith.constant 0 : index
    %43 = vector.load %arg3[%c5, %c0_53, %c0_54] : memref<9x128x128xbf16, #tpu.memory_space<vmem>>, vector<1x128x128xbf16>
    %44 = vector.shape_cast %43 : vector<1x128x128xbf16> to vector<128x128xbf16>
    %cst_55 = arith.constant dense<0.000000e+00> : vector<128x128xf32>
    %45 = tpu.matmul %42, %44, %cst_55 {dimension_numbers = #tpu.dot_dimension_numbers<[1], [0], [0], [1], [0, 0, 1, 1], [], []>} : vector<128x128xbf16>, vector<128x128xbf16>, vector<128x128xf32> -> vector<128x128xf32>
    %46 = arith.addf %40, %45 : vector<128x128xf32>
    %c0_56 = arith.constant 0 : index
    %c0_57 = arith.constant 0 : index
    %c16_58 = arith.constant 16 : index
    %c0_59 = arith.constant 0 : index
    %47 = vector.load %arg2[%c0_56, %c0_57, %c16_58, %c0_59] : memref<2x4x144x128xbf16, #tpu.memory_space<vmem>>, vector<1x1x128x128xbf16>
    %48 = vector.shape_cast %47 : vector<1x1x128x128xbf16> to vector<128x128xbf16>
    %c8 = arith.constant 8 : index
    %c0_60 = arith.constant 0 : index
    %c0_61 = arith.constant 0 : index
    %49 = vector.load %arg3[%c8, %c0_60, %c0_61] : memref<9x128x128xbf16, #tpu.memory_space<vmem>>, vector<1x128x128xbf16>
    %50 = vector.shape_cast %49 : vector<1x128x128xbf16> to vector<128x128xbf16>
    %cst_62 = arith.constant dense<0.000000e+00> : vector<128x128xf32>
    %51 = tpu.matmul %48, %50, %cst_62 {dimension_numbers = #tpu.dot_dimension_numbers<[1], [0], [0], [1], [0, 0, 1, 1], [], []>} : vector<128x128xbf16>, vector<128x128xbf16>, vector<128x128xf32> -> vector<128x128xf32>
    %52 = arith.addf %46, %51 : vector<128x128xf32>
    %53 = vector.extract_strided_slice %52 {offsets = [1, 0], sizes = [127, 128], strides = [1, 1]} : vector<128x128xf32> to vector<127x128xf32>
    %54 = vector.extract_strided_slice %52 {offsets = [0, 0], sizes = [1, 128], strides = [1, 1]} : vector<128x128xf32> to vector<1x128xf32>
    %55 = tpu.concatenate %53, %54 in 0 : vector<127x128xf32>, vector<1x128xf32> -> vector<128x128xf32>
    %56 = arith.addf %35, %55 : vector<128x128xf32>
    %57 = vector.broadcast %0 : vector<1x128xf32> to vector<128x128xf32>
    %58 = arith.addf %56, %57 : vector<128x128xf32>
    %cst_63 = arith.constant 0.000000e+00 : f32
    %59 = vector.broadcast %cst_63 : f32 to vector<128x128xf32>
    %60 = arith.maximumf %58, %59 : vector<128x128xf32>
    %61 = arith.truncf %60 : vector<128x128xf32> to vector<128x128xbf16>
    %c0_64 = arith.constant 0 : index
    %c0_65 = arith.constant 0 : index
    %c0_66 = arith.constant 0 : index
    %62 = vector.load %arg5[%c0_64, %c0_65, %c0_66] : memref<2x128x128xbf16, #tpu.memory_space<vmem>>, vector<1x128x128xbf16>
    %63 = vector.shape_cast %62 : vector<1x128x128xbf16> to vector<128x128xbf16>
    %64 = vector.shape_cast %61 : vector<128x128xbf16> to vector<1x128x128xbf16>
    tpu.vector_store %arg5[%c0_64, %c0_65, %c0_66], %64 {strides = array<i32>} : memref<2x128x128xbf16, #tpu.memory_space<vmem>>, vector<1x128x128xbf16>,
    %c1_67 = arith.constant 1 : index
    %c0_68 = arith.constant 0 : index
    %c0_69 = arith.constant 0 : index
    %c0_70 = arith.constant 0 : index
    %65 = vector.load %arg2[%c1_67, %c0_68, %c0_69, %c0_70] : memref<2x4x144x128xbf16, #tpu.memory_space<vmem>>, vector<1x1x128x128xbf16>
    %66 = vector.shape_cast %65 : vector<1x1x128x128xbf16> to vector<128x128xbf16>
    %c0_71 = arith.constant 0 : index
    %c0_72 = arith.constant 0 : index
    %c0_73 = arith.constant 0 : index
    %67 = vector.load %arg3[%c0_71, %c0_72, %c0_73] : memref<9x128x128xbf16, #tpu.memory_space<vmem>>, vector<1x128x128xbf16>
    %68 = vector.shape_cast %67 : vector<1x128x128xbf16> to vector<128x128xbf16>
    %cst_74 = arith.constant dense<0.000000e+00> : vector<128x128xf32>
    %69 = tpu.matmul %66, %68, %cst_74 {dimension_numbers = #tpu.dot_dimension_numbers<[1], [0], [0], [1], [0, 0, 1, 1], [], []>} : vector<128x128xbf16>, vector<128x128xbf16>, vector<128x128xf32> -> vector<128x128xf32>
    %c1_75 = arith.constant 1 : index
    %c1_76 = arith.constant 1 : index
    %c0_77 = arith.constant 0 : index
    %c0_78 = arith.constant 0 : index
    %70 = vector.load %arg2[%c1_75, %c1_76, %c0_77, %c0_78] : memref<2x4x144x128xbf16, #tpu.memory_space<vmem>>, vector<1x1x128x128xbf16>
    %71 = vector.shape_cast %70 : vector<1x1x128x128xbf16> to vector<128x128xbf16>
    %c1_79 = arith.constant 1 : index
    %c0_80 = arith.constant 0 : index
    %c0_81 = arith.constant 0 : index
    %72 = vector.load %arg3[%c1_79, %c0_80, %c0_81] : memref<9x128x128xbf16, #tpu.memory_space<vmem>>, vector<1x128x128xbf16>
    %73 = vector.shape_cast %72 : vector<1x128x128xbf16> to vector<128x128xbf16>
    %cst_82 = arith.constant dense<0.000000e+00> : vector<128x128xf32>
    %74 = tpu.matmul %71, %73, %cst_82 {dimension_numbers = #tpu.dot_dimension_numbers<[1], [0], [0], [1], [0, 0, 1, 1], [], []>} : vector<128x128xbf16>, vector<128x128xbf16>, vector<128x128xf32> -> vector<128x128xf32>
    %75 = arith.addf %69, %74 : vector<128x128xf32>
    %c1_83 = arith.constant 1 : index
    %c2_84 = arith.constant 2 : index
    %c0_85 = arith.constant 0 : index
    %c0_86 = arith.constant 0 : index
    %76 = vector.load %arg2[%c1_83, %c2_84, %c0_85, %c0_86] : memref<2x4x144x128xbf16, #tpu.memory_space<vmem>>, vector<1x1x128x128xbf16>
    %77 = vector.shape_cast %76 : vector<1x1x128x128xbf16> to vector<128x128xbf16>
    %c3_87 = arith.constant 3 : index
    %c0_88 = arith.constant 0 : index
    %c0_89 = arith.constant 0 : index
    %78 = vector.load %arg3[%c3_87, %c0_88, %c0_89] : memref<9x128x128xbf16, #tpu.memory_space<vmem>>, vector<1x128x128xbf16>
    %79 = vector.shape_cast %78 : vector<1x128x128xbf16> to vector<128x128xbf16>
    %cst_90 = arith.constant dense<0.000000e+00> : vector<128x128xf32>
    %80 = tpu.matmul %77, %79, %cst_90 {dimension_numbers = #tpu.dot_dimension_numbers<[1], [0], [0], [1], [0, 0, 1, 1], [], []>} : vector<128x128xbf16>, vector<128x128xbf16>, vector<128x128xf32> -> vector<128x128xf32>
    %81 = arith.addf %75, %80 : vector<128x128xf32>
    %c1_91 = arith.constant 1 : index
    %c3_92 = arith.constant 3 : index
    %c0_93 = arith.constant 0 : index
    %c0_94 = arith.constant 0 : index
    %82 = vector.load %arg2[%c1_91, %c3_92, %c0_93, %c0_94] : memref<2x4x144x128xbf16, #tpu.memory_space<vmem>>, vector<1x1x128x128xbf16>
    %83 = vector.shape_cast %82 : vector<1x1x128x128xbf16> to vector<128x128xbf16>
    %c4_95 = arith.constant 4 : index
    %c0_96 = arith.constant 0 : index
    %c0_97 = arith.constant 0 : index
    %84 = vector.load %arg3[%c4_95, %c0_96, %c0_97] : memref<9x128x128xbf16, #tpu.memory_space<vmem>>, vector<1x128x128xbf16>
    %85 = vector.shape_cast %84 : vector<1x128x128xbf16> to vector<128x128xbf16>
    %cst_98 = arith.constant dense<0.000000e+00> : vector<128x128xf32>
    %86 = tpu.matmul %83, %85, %cst_98 {dimension_numbers = #tpu.dot_dimension_numbers<[1], [0], [0], [1], [0, 0, 1, 1], [], []>} : vector<128x128xbf16>, vector<128x128xbf16>, vector<128x128xf32> -> vector<128x128xf32>
    %87 = arith.addf %81, %86 : vector<128x128xf32>
    %c1_99 = arith.constant 1 : index
    %c0_100 = arith.constant 0 : index
    %c16_101 = arith.constant 16 : index
    %c0_102 = arith.constant 0 : index
    %88 = vector.load %arg2[%c1_99, %c0_100, %c16_101, %c0_102] : memref<2x4x144x128xbf16, #tpu.memory_space<vmem>>, vector<1x1x128x128xbf16>
    %89 = vector.shape_cast %88 : vector<1x1x128x128xbf16> to vector<128x128xbf16>
    %c6_103 = arith.constant 6 : index
    %c0_104 = arith.constant 0 : index
    %c0_105 = arith.constant 0 : index
    %90 = vector.load %arg3[%c6_103, %c0_104, %c0_105] : memref<9x128x128xbf16, #tpu.memory_space<vmem>>, vector<1x128x128xbf16>
    %91 = vector.shape_cast %90 : vector<1x128x128xbf16> to vector<128x128xbf16>
    %cst_106 = arith.constant dense<0.000000e+00> : vector<128x128xf32>
    %92 = tpu.matmul %89, %91, %cst_106 {dimension_numbers = #tpu.dot_dimension_numbers<[1], [0], [0], [1], [0, 0, 1, 1], [], []>} : vector<128x128xbf16>, vector<128x128xbf16>, vector<128x128xf32> -> vector<128x128xf32>
    %93 = arith.addf %87, %92 : vector<128x128xf32>
    %c1_107 = arith.constant 1 : index
    %c1_108 = arith.constant 1 : index
    %c16_109 = arith.constant 16 : index
    %c0_110 = arith.constant 0 : index
    %94 = vector.load %arg2[%c1_107, %c1_108, %c16_109, %c0_110] : memref<2x4x144x128xbf16, #tpu.memory_space<vmem>>, vector<1x1x128x128xbf16>
    %95 = vector.shape_cast %94 : vector<1x1x128x128xbf16> to vector<128x128xbf16>
    %c7_111 = arith.constant 7 : index
    %c0_112 = arith.constant 0 : index
    %c0_113 = arith.constant 0 : index
    %96 = vector.load %arg3[%c7_111, %c0_112, %c0_113] : memref<9x128x128xbf16, #tpu.memory_space<vmem>>, vector<1x128x128xbf16>
    %97 = vector.shape_cast %96 : vector<1x128x128xbf16> to vector<128x128xbf16>
    %cst_114 = arith.constant dense<0.000000e+00> : vector<128x128xf32>
    %98 = tpu.matmul %95, %97, %cst_114 {dimension_numbers = #tpu.dot_dimension_numbers<[1], [0], [0], [1], [0, 0, 1, 1], [], []>} : vector<128x128xbf16>, vector<128x128xbf16>, vector<128x128xf32> -> vector<128x128xf32>
    %99 = arith.addf %93, %98 : vector<128x128xf32>
    %c1_115 = arith.constant 1 : index
    %c0_116 = arith.constant 0 : index
    %c0_117 = arith.constant 0 : index
    %c0_118 = arith.constant 0 : index
    %100 = vector.load %arg2[%c1_115, %c0_116, %c0_117, %c0_118] : memref<2x4x144x128xbf16, #tpu.memory_space<vmem>>, vector<1x1x128x128xbf16>
    %101 = vector.shape_cast %100 : vector<1x1x128x128xbf16> to vector<128x128xbf16>
    %c2_119 = arith.constant 2 : index
    %c0_120 = arith.constant 0 : index
    %c0_121 = arith.constant 0 : index
    %102 = vector.load %arg3[%c2_119, %c0_120, %c0_121] : memref<9x128x128xbf16, #tpu.memory_space<vmem>>, vector<1x128x128xbf16>
    %103 = vector.shape_cast %102 : vector<1x128x128xbf16> to vector<128x128xbf16>
    %cst_122 = arith.constant dense<0.000000e+00> : vector<128x128xf32>
    %104 = tpu.matmul %101, %103, %cst_122 {dimension_numbers = #tpu.dot_dimension_numbers<[1], [0], [0], [1], [0, 0, 1, 1], [], []>} : vector<128x128xbf16>, vector<128x128xbf16>, vector<128x128xf32> -> vector<128x128xf32>
    %c1_123 = arith.constant 1 : index
    %c2_124 = arith.constant 2 : index
    %c0_125 = arith.constant 0 : index
    %c0_126 = arith.constant 0 : index
    %105 = vector.load %arg2[%c1_123, %c2_124, %c0_125, %c0_126] : memref<2x4x144x128xbf16, #tpu.memory_space<vmem>>, vector<1x1x128x128xbf16>
    %106 = vector.shape_cast %105 : vector<1x1x128x128xbf16> to vector<128x128xbf16>
    %c5_127 = arith.constant 5 : index
    %c0_128 = arith.constant 0 : index
    %c0_129 = arith.constant 0 : index
    %107 = vector.load %arg3[%c5_127, %c0_128, %c0_129] : memref<9x128x128xbf16, #tpu.memory_space<vmem>>, vector<1x128x128xbf16>
    %108 = vector.shape_cast %107 : vector<1x128x128xbf16> to vector<128x128xbf16>
    %cst_130 = arith.constant dense<0.000000e+00> : vector<128x128xf32>
    %109 = tpu.matmul %106, %108, %cst_130 {dimension_numbers = #tpu.dot_dimension_numbers<[1], [0], [0], [1], [0, 0, 1, 1], [], []>} : vector<128x128xbf16>, vector<128x128xbf16>, vector<128x128xf32> -> vector<128x128xf32>
    %110 = arith.addf %104, %109 : vector<128x128xf32>
    %c1_131 = arith.constant 1 : index
    %c0_132 = arith.constant 0 : index
    %c16_133 = arith.constant 16 : index
    %c0_134 = arith.constant 0 : index
    %111 = vector.load %arg2[%c1_131, %c0_132, %c16_133, %c0_134] : memref<2x4x144x128xbf16, #tpu.memory_space<vmem>>, vector<1x1x128x128xbf16>
    %112 = vector.shape_cast %111 : vector<1x1x128x128xbf16> to vector<128x128xbf16>
    %c8_135 = arith.constant 8 : index
    %c0_136 = arith.constant 0 : index
    %c0_137 = arith.constant 0 : index
    %113 = vector.load %arg3[%c8_135, %c0_136, %c0_137] : memref<9x128x128xbf16, #tpu.memory_space<vmem>>, vector<1x128x128xbf16>
    %114 = vector.shape_cast %113 : vector<1x128x128xbf16> to vector<128x128xbf16>
    %cst_138 = arith.constant dense<0.000000e+00> : vector<128x128xf32>
    %115 = tpu.matmul %112, %114, %cst_138 {dimension_numbers = #tpu.dot_dimension_numbers<[1], [0], [0], [1], [0, 0, 1, 1], [], []>} : vector<128x128xbf16>, vector<128x128xbf16>, vector<128x128xf32> -> vector<128x128xf32>
    %116 = arith.addf %110, %115 : vector<128x128xf32>
    %117 = vector.extract_strided_slice %116 {offsets = [1, 0], sizes = [127, 128], strides = [1, 1]} : vector<128x128xf32> to vector<127x128xf32>
    %118 = vector.extract_strided_slice %116 {offsets = [0, 0], sizes = [1, 128], strides = [1, 1]} : vector<128x128xf32> to vector<1x128xf32>
    %119 = tpu.concatenate %117, %118 in 0 : vector<127x128xf32>, vector<1x128xf32> -> vector<128x128xf32>
    %120 = arith.addf %99, %119 : vector<128x128xf32>
    %121 = vector.broadcast %0 : vector<1x128xf32> to vector<128x128xf32>
    %122 = arith.addf %120, %121 : vector<128x128xf32>
    %cst_139 = arith.constant 0.000000e+00 : f32
    %123 = vector.broadcast %cst_139 : f32 to vector<128x128xf32>
    %124 = arith.maximumf %122, %123 : vector<128x128xf32>
    %125 = arith.truncf %124 : vector<128x128xf32> to vector<128x128xbf16>
    %c1_140 = arith.constant 1 : index
    %c0_141 = arith.constant 0 : index
    %c0_142 = arith.constant 0 : index
    %126 = vector.load %arg5[%c1_140, %c0_141, %c0_142] : memref<2x128x128xbf16, #tpu.memory_space<vmem>>, vector<1x128x128xbf16>
    %127 = vector.shape_cast %126 : vector<1x128x128xbf16> to vector<128x128xbf16>
    %128 = vector.shape_cast %125 : vector<128x128xbf16> to vector<1x128x128xbf16>
    tpu.vector_store %arg5[%c1_140, %c0_141, %c0_142], %128 {strides = array<i32>} : memref<2x128x128xbf16, #tpu.memory_space<vmem>>, vector<1x128x128xbf16>,
    return
  }
  func.func @transform_0(%arg0: i32, %arg1: i32) -> (i32, i32, i32, i32) {
    %c0_i32 = arith.constant 0 : i32
    %c0_i32_0 = arith.constant 0 : i32
    %c0_i32_1 = arith.constant 0 : i32
    %c0_i32_2 = arith.constant 0 : i32
    return %arg0, %c0_i32, %c0_i32_0, %c0_i32_1 : i32, i32, i32, i32
  }
  func.func @transform_1(%arg0: i32, %arg1: i32) -> (i32, i32, i32) {
    %c0_i32 = arith.constant 0 : i32
    %c0_i32_0 = arith.constant 0 : i32
    %c0_i32_1 = arith.constant 0 : i32
    return %c0_i32, %c0_i32_0, %arg1 : i32, i32, i32
  }
  func.func @transform_2(%arg0: i32, %arg1: i32) -> (i32, i32) {
    %c0_i32 = arith.constant 0 : i32
    %c0_i32_0 = arith.constant 0 : i32
    return %c0_i32, %arg1 : i32, i32
  }
  func.func @transform_3(%arg0: i32, %arg1: i32) -> (i32, i32, i32) {
    %c0_i32 = arith.constant 0 : i32
    %c0_i32_0 = arith.constant 0 : i32
    return %arg0, %c0_i32, %arg1 : i32, i32, i32
  }
}

module attributes {stable_mosaic.version = 11 : i64} {
  func.func @_conv_bn_kernel(%arg0: i32, %arg1: i32, %arg2: memref<2x1x160x128xbf16, #tpu.memory_space<vmem>>, %arg3: memref<9x128x128xbf16, #tpu.memory_space<vmem>>, %arg4: memref<1x128xf32, #tpu.memory_space<vmem>>, %arg5: memref<2x128x128xbf16, #tpu.memory_space<vmem>>, %arg6: memref<128x128xbf16, #tpu.memory_space<vmem>>, %arg7: memref<1x128xf32, #tpu.memory_space<vmem>>, %arg8: memref<2x128x128xf32, #tpu.memory_space<vmem>>) attributes {dimension_semantics = [#tpu.dimension_semantics<parallel>, #tpu.dimension_semantics<parallel>], iteration_bounds = array<i64: 1, 1>, scalar_prefetch = 0 : i64, scratch_operands = 0 : i64, tpu.core_type = #tpu.core_type<tc>, window_params = [{transform_indices = @transform_0, window_bounds = array<i64: 2, 1, 160, 128>}, {transform_indices = @transform_1, window_bounds = array<i64: 9, 128, 128>}, {transform_indices = @transform_2, window_bounds = array<i64: 1, 128>}, {transform_indices = @transform_3, window_bounds = array<i64: 2, 128, 128>}, {transform_indices = @transform_4, window_bounds = array<i64: 128, 128>}, {transform_indices = @transform_5, window_bounds = array<i64: 1, 128>}, {transform_indices = @transform_6, window_bounds = array<i64: 2, 128, 128>}]} {
    %c0 = arith.constant 0 : index
    %c0_0 = arith.constant 0 : index
    %0 = vector.load %arg4[%c0, %c0_0] : memref<1x128xf32, #tpu.memory_space<vmem>>, vector<1x128xf32>
    %c0_1 = arith.constant 0 : index
    %c0_2 = arith.constant 0 : index
    %c0_3 = arith.constant 0 : index
    %c0_4 = arith.constant 0 : index
    %1 = vector.load %arg2[%c0_1, %c0_2, %c0_3, %c0_4] : memref<2x1x160x128xbf16, #tpu.memory_space<vmem>>, vector<1x1x128x128xbf16>
    %2 = vector.shape_cast %1 : vector<1x1x128x128xbf16> to vector<128x128xbf16>
    %c0_5 = arith.constant 0 : index
    %c0_6 = arith.constant 0 : index
    %c0_7 = arith.constant 0 : index
    %3 = vector.load %arg3[%c0_5, %c0_6, %c0_7] : memref<9x128x128xbf16, #tpu.memory_space<vmem>>, vector<1x128x128xbf16>
    %4 = vector.shape_cast %3 : vector<1x128x128xbf16> to vector<128x128xbf16>
    %cst = arith.constant dense<0.000000e+00> : vector<128x128xf32>
    %5 = tpu.matmul %2, %4, %cst {dimension_numbers = #tpu.dot_dimension_numbers<[1], [0], [0], [1], [0, 0, 1, 1], [], []>} : vector<128x128xbf16>, vector<128x128xbf16>, vector<128x128xf32> -> vector<128x128xf32>
    %c0_8 = arith.constant 0 : index
    %c0_9 = arith.constant 0 : index
    %c16 = arith.constant 16 : index
    %c0_10 = arith.constant 0 : index
    %6 = vector.load %arg2[%c0_8, %c0_9, %c16, %c0_10] : memref<2x1x160x128xbf16, #tpu.memory_space<vmem>>, vector<1x1x128x128xbf16>
    %7 = vector.shape_cast %6 : vector<1x1x128x128xbf16> to vector<128x128xbf16>
    %c3 = arith.constant 3 : index
    %c0_11 = arith.constant 0 : index
    %c0_12 = arith.constant 0 : index
    %8 = vector.load %arg3[%c3, %c0_11, %c0_12] : memref<9x128x128xbf16, #tpu.memory_space<vmem>>, vector<1x128x128xbf16>
    %9 = vector.shape_cast %8 : vector<1x128x128xbf16> to vector<128x128xbf16>
    %cst_13 = arith.constant dense<0.000000e+00> : vector<128x128xf32>
    %10 = tpu.matmul %7, %9, %cst_13 {dimension_numbers = #tpu.dot_dimension_numbers<[1], [0], [0], [1], [0, 0, 1, 1], [], []>} : vector<128x128xbf16>, vector<128x128xbf16>, vector<128x128xf32> -> vector<128x128xf32>
    %11 = arith.addf %5, %10 : vector<128x128xf32>
    %c0_14 = arith.constant 0 : index
    %c0_15 = arith.constant 0 : index
    %c32 = arith.constant 32 : index
    %c0_16 = arith.constant 0 : index
    %12 = vector.load %arg2[%c0_14, %c0_15, %c32, %c0_16] : memref<2x1x160x128xbf16, #tpu.memory_space<vmem>>, vector<1x1x128x128xbf16>
    %13 = vector.shape_cast %12 : vector<1x1x128x128xbf16> to vector<128x128xbf16>
    %c6 = arith.constant 6 : index
    %c0_17 = arith.constant 0 : index
    %c0_18 = arith.constant 0 : index
    %14 = vector.load %arg3[%c6, %c0_17, %c0_18] : memref<9x128x128xbf16, #tpu.memory_space<vmem>>, vector<1x128x128xbf16>
    %15 = vector.shape_cast %14 : vector<1x128x128xbf16> to vector<128x128xbf16>
    %cst_19 = arith.constant dense<0.000000e+00> : vector<128x128xf32>
    %16 = tpu.matmul %13, %15, %cst_19 {dimension_numbers = #tpu.dot_dimension_numbers<[1], [0], [0], [1], [0, 0, 1, 1], [], []>} : vector<128x128xbf16>, vector<128x128xbf16>, vector<128x128xf32> -> vector<128x128xf32>
    %17 = arith.addf %11, %16 : vector<128x128xf32>
    %c0_20 = arith.constant 0 : index
    %c0_21 = arith.constant 0 : index
    %c0_22 = arith.constant 0 : index
    %c0_23 = arith.constant 0 : index
    %18 = vector.load %arg2[%c0_20, %c0_21, %c0_22, %c0_23] : memref<2x1x160x128xbf16, #tpu.memory_space<vmem>>, vector<1x1x128x128xbf16>
    %19 = vector.shape_cast %18 : vector<1x1x128x128xbf16> to vector<128x128xbf16>
    %c1 = arith.constant 1 : index
    %c0_24 = arith.constant 0 : index
    %c0_25 = arith.constant 0 : index
    %20 = vector.load %arg3[%c1, %c0_24, %c0_25] : memref<9x128x128xbf16, #tpu.memory_space<vmem>>, vector<1x128x128xbf16>
    %21 = vector.shape_cast %20 : vector<1x128x128xbf16> to vector<128x128xbf16>
    %cst_26 = arith.constant dense<0.000000e+00> : vector<128x128xf32>
    %22 = tpu.matmul %19, %21, %cst_26 {dimension_numbers = #tpu.dot_dimension_numbers<[1], [0], [0], [1], [0, 0, 1, 1], [], []>} : vector<128x128xbf16>, vector<128x128xbf16>, vector<128x128xf32> -> vector<128x128xf32>
    %c0_27 = arith.constant 0 : index
    %c0_28 = arith.constant 0 : index
    %c16_29 = arith.constant 16 : index
    %c0_30 = arith.constant 0 : index
    %23 = vector.load %arg2[%c0_27, %c0_28, %c16_29, %c0_30] : memref<2x1x160x128xbf16, #tpu.memory_space<vmem>>, vector<1x1x128x128xbf16>
    %24 = vector.shape_cast %23 : vector<1x1x128x128xbf16> to vector<128x128xbf16>
    %c4 = arith.constant 4 : index
    %c0_31 = arith.constant 0 : index
    %c0_32 = arith.constant 0 : index
    %25 = vector.load %arg3[%c4, %c0_31, %c0_32] : memref<9x128x128xbf16, #tpu.memory_space<vmem>>, vector<1x128x128xbf16>
    %26 = vector.shape_cast %25 : vector<1x128x128xbf16> to vector<128x128xbf16>
    %cst_33 = arith.constant dense<0.000000e+00> : vector<128x128xf32>
    %27 = tpu.matmul %24, %26, %cst_33 {dimension_numbers = #tpu.dot_dimension_numbers<[1], [0], [0], [1], [0, 0, 1, 1], [], []>} : vector<128x128xbf16>, vector<128x128xbf16>, vector<128x128xf32> -> vector<128x128xf32>
    %28 = arith.addf %22, %27 : vector<128x128xf32>
    %c0_34 = arith.constant 0 : index
    %c0_35 = arith.constant 0 : index
    %c32_36 = arith.constant 32 : index
    %c0_37 = arith.constant 0 : index
    %29 = vector.load %arg2[%c0_34, %c0_35, %c32_36, %c0_37] : memref<2x1x160x128xbf16, #tpu.memory_space<vmem>>, vector<1x1x128x128xbf16>
    %30 = vector.shape_cast %29 : vector<1x1x128x128xbf16> to vector<128x128xbf16>
    %c7 = arith.constant 7 : index
    %c0_38 = arith.constant 0 : index
    %c0_39 = arith.constant 0 : index
    %31 = vector.load %arg3[%c7, %c0_38, %c0_39] : memref<9x128x128xbf16, #tpu.memory_space<vmem>>, vector<1x128x128xbf16>
    %32 = vector.shape_cast %31 : vector<1x128x128xbf16> to vector<128x128xbf16>
    %cst_40 = arith.constant dense<0.000000e+00> : vector<128x128xf32>
    %33 = tpu.matmul %30, %32, %cst_40 {dimension_numbers = #tpu.dot_dimension_numbers<[1], [0], [0], [1], [0, 0, 1, 1], [], []>} : vector<128x128xbf16>, vector<128x128xbf16>, vector<128x128xf32> -> vector<128x128xf32>
    %34 = arith.addf %28, %33 : vector<128x128xf32>
    %35 = vector.extract_strided_slice %34 {offsets = [1, 0], sizes = [127, 128], strides = [1, 1]} : vector<128x128xf32> to vector<127x128xf32>
    %36 = vector.extract_strided_slice %34 {offsets = [0, 0], sizes = [1, 128], strides = [1, 1]} : vector<128x128xf32> to vector<1x128xf32>
    %37 = tpu.concatenate %35, %36 in 0 : vector<127x128xf32>, vector<1x128xf32> -> vector<128x128xf32>
    %38 = arith.addf %17, %37 : vector<128x128xf32>
    %c0_41 = arith.constant 0 : index
    %c0_42 = arith.constant 0 : index
    %c0_43 = arith.constant 0 : index
    %c0_44 = arith.constant 0 : index
    %39 = vector.load %arg2[%c0_41, %c0_42, %c0_43, %c0_44] : memref<2x1x160x128xbf16, #tpu.memory_space<vmem>>, vector<1x1x128x128xbf16>
    %40 = vector.shape_cast %39 : vector<1x1x128x128xbf16> to vector<128x128xbf16>
    %c2 = arith.constant 2 : index
    %c0_45 = arith.constant 0 : index
    %c0_46 = arith.constant 0 : index
    %41 = vector.load %arg3[%c2, %c0_45, %c0_46] : memref<9x128x128xbf16, #tpu.memory_space<vmem>>, vector<1x128x128xbf16>
    %42 = vector.shape_cast %41 : vector<1x128x128xbf16> to vector<128x128xbf16>
    %cst_47 = arith.constant dense<0.000000e+00> : vector<128x128xf32>
    %43 = tpu.matmul %40, %42, %cst_47 {dimension_numbers = #tpu.dot_dimension_numbers<[1], [0], [0], [1], [0, 0, 1, 1], [], []>} : vector<128x128xbf16>, vector<128x128xbf16>, vector<128x128xf32> -> vector<128x128xf32>
    %c0_48 = arith.constant 0 : index
    %c0_49 = arith.constant 0 : index
    %c16_50 = arith.constant 16 : index
    %c0_51 = arith.constant 0 : index
    %44 = vector.load %arg2[%c0_48, %c0_49, %c16_50, %c0_51] : memref<2x1x160x128xbf16, #tpu.memory_space<vmem>>, vector<1x1x128x128xbf16>
    %45 = vector.shape_cast %44 : vector<1x1x128x128xbf16> to vector<128x128xbf16>
    %c5 = arith.constant 5 : index
    %c0_52 = arith.constant 0 : index
    %c0_53 = arith.constant 0 : index
    %46 = vector.load %arg3[%c5, %c0_52, %c0_53] : memref<9x128x128xbf16, #tpu.memory_space<vmem>>, vector<1x128x128xbf16>
    %47 = vector.shape_cast %46 : vector<1x128x128xbf16> to vector<128x128xbf16>
    %cst_54 = arith.constant dense<0.000000e+00> : vector<128x128xf32>
    %48 = tpu.matmul %45, %47, %cst_54 {dimension_numbers = #tpu.dot_dimension_numbers<[1], [0], [0], [1], [0, 0, 1, 1], [], []>} : vector<128x128xbf16>, vector<128x128xbf16>, vector<128x128xf32> -> vector<128x128xf32>
    %49 = arith.addf %43, %48 : vector<128x128xf32>
    %c0_55 = arith.constant 0 : index
    %c0_56 = arith.constant 0 : index
    %c32_57 = arith.constant 32 : index
    %c0_58 = arith.constant 0 : index
    %50 = vector.load %arg2[%c0_55, %c0_56, %c32_57, %c0_58] : memref<2x1x160x128xbf16, #tpu.memory_space<vmem>>, vector<1x1x128x128xbf16>
    %51 = vector.shape_cast %50 : vector<1x1x128x128xbf16> to vector<128x128xbf16>
    %c8 = arith.constant 8 : index
    %c0_59 = arith.constant 0 : index
    %c0_60 = arith.constant 0 : index
    %52 = vector.load %arg3[%c8, %c0_59, %c0_60] : memref<9x128x128xbf16, #tpu.memory_space<vmem>>, vector<1x128x128xbf16>
    %53 = vector.shape_cast %52 : vector<1x128x128xbf16> to vector<128x128xbf16>
    %cst_61 = arith.constant dense<0.000000e+00> : vector<128x128xf32>
    %54 = tpu.matmul %51, %53, %cst_61 {dimension_numbers = #tpu.dot_dimension_numbers<[1], [0], [0], [1], [0, 0, 1, 1], [], []>} : vector<128x128xbf16>, vector<128x128xbf16>, vector<128x128xf32> -> vector<128x128xf32>
    %55 = arith.addf %49, %54 : vector<128x128xf32>
    %56 = vector.extract_strided_slice %55 {offsets = [2, 0], sizes = [126, 128], strides = [1, 1]} : vector<128x128xf32> to vector<126x128xf32>
    %57 = vector.extract_strided_slice %55 {offsets = [0, 0], sizes = [2, 128], strides = [1, 1]} : vector<128x128xf32> to vector<2x128xf32>
    %58 = tpu.concatenate %56, %57 in 0 : vector<126x128xf32>, vector<2x128xf32> -> vector<128x128xf32>
    %59 = arith.addf %38, %58 : vector<128x128xf32>
    %60 = vector.broadcast %0 : vector<1x128xf32> to vector<128x128xf32>
    %61 = arith.addf %59, %60 : vector<128x128xf32>
    %c0_62 = arith.constant 0 : index
    %c0_63 = arith.constant 0 : index
    %c0_64 = arith.constant 0 : index
    %62 = vector.load %arg5[%c0_62, %c0_63, %c0_64] : memref<2x128x128xbf16, #tpu.memory_space<vmem>>, vector<1x128x128xbf16>
    %63 = vector.shape_cast %62 : vector<1x128x128xbf16> to vector<128x128xbf16>
    %c0_65 = arith.constant 0 : index
    %c0_66 = arith.constant 0 : index
    %64 = vector.load %arg6[%c0_65, %c0_66] : memref<128x128xbf16, #tpu.memory_space<vmem>>, vector<128x128xbf16>
    %cst_67 = arith.constant dense<0.000000e+00> : vector<128x128xf32>
    %65 = tpu.matmul %63, %64, %cst_67 {dimension_numbers = #tpu.dot_dimension_numbers<[1], [0], [0], [1], [0, 0, 1, 1], [], []>} : vector<128x128xbf16>, vector<128x128xbf16>, vector<128x128xf32> -> vector<128x128xf32>
    %66 = arith.addf %61, %65 : vector<128x128xf32>
    %c0_68 = arith.constant 0 : index
    %c0_69 = arith.constant 0 : index
    %67 = vector.load %arg7[%c0_68, %c0_69] : memref<1x128xf32, #tpu.memory_space<vmem>>, vector<1x128xf32>
    %68 = vector.broadcast %67 : vector<1x128xf32> to vector<128x128xf32>
    %69 = arith.addf %66, %68 : vector<128x128xf32>
    %cst_70 = arith.constant 0.000000e+00 : f32
    %70 = vector.broadcast %cst_70 : f32 to vector<128x128xf32>
    %71 = arith.maximumf %69, %70 : vector<128x128xf32>
    %c0_71 = arith.constant 0 : index
    %c0_72 = arith.constant 0 : index
    %c0_73 = arith.constant 0 : index
    %72 = vector.load %arg8[%c0_71, %c0_72, %c0_73] : memref<2x128x128xf32, #tpu.memory_space<vmem>>, vector<1x128x128xf32>
    %73 = vector.shape_cast %72 : vector<1x128x128xf32> to vector<128x128xf32>
    %74 = vector.shape_cast %71 : vector<128x128xf32> to vector<1x128x128xf32>
    tpu.vector_store %arg8[%c0_71, %c0_72, %c0_73], %74 {strides = array<i32>} : memref<2x128x128xf32, #tpu.memory_space<vmem>>, vector<1x128x128xf32>,
    %c1_74 = arith.constant 1 : index
    %c0_75 = arith.constant 0 : index
    %c0_76 = arith.constant 0 : index
    %c0_77 = arith.constant 0 : index
    %75 = vector.load %arg2[%c1_74, %c0_75, %c0_76, %c0_77] : memref<2x1x160x128xbf16, #tpu.memory_space<vmem>>, vector<1x1x128x128xbf16>
    %76 = vector.shape_cast %75 : vector<1x1x128x128xbf16> to vector<128x128xbf16>
    %c0_78 = arith.constant 0 : index
    %c0_79 = arith.constant 0 : index
    %c0_80 = arith.constant 0 : index
    %77 = vector.load %arg3[%c0_78, %c0_79, %c0_80] : memref<9x128x128xbf16, #tpu.memory_space<vmem>>, vector<1x128x128xbf16>
    %78 = vector.shape_cast %77 : vector<1x128x128xbf16> to vector<128x128xbf16>
    %cst_81 = arith.constant dense<0.000000e+00> : vector<128x128xf32>
    %79 = tpu.matmul %76, %78, %cst_81 {dimension_numbers = #tpu.dot_dimension_numbers<[1], [0], [0], [1], [0, 0, 1, 1], [], []>} : vector<128x128xbf16>, vector<128x128xbf16>, vector<128x128xf32> -> vector<128x128xf32>
    %c1_82 = arith.constant 1 : index
    %c0_83 = arith.constant 0 : index
    %c16_84 = arith.constant 16 : index
    %c0_85 = arith.constant 0 : index
    %80 = vector.load %arg2[%c1_82, %c0_83, %c16_84, %c0_85] : memref<2x1x160x128xbf16, #tpu.memory_space<vmem>>, vector<1x1x128x128xbf16>
    %81 = vector.shape_cast %80 : vector<1x1x128x128xbf16> to vector<128x128xbf16>
    %c3_86 = arith.constant 3 : index
    %c0_87 = arith.constant 0 : index
    %c0_88 = arith.constant 0 : index
    %82 = vector.load %arg3[%c3_86, %c0_87, %c0_88] : memref<9x128x128xbf16, #tpu.memory_space<vmem>>, vector<1x128x128xbf16>
    %83 = vector.shape_cast %82 : vector<1x128x128xbf16> to vector<128x128xbf16>
    %cst_89 = arith.constant dense<0.000000e+00> : vector<128x128xf32>
    %84 = tpu.matmul %81, %83, %cst_89 {dimension_numbers = #tpu.dot_dimension_numbers<[1], [0], [0], [1], [0, 0, 1, 1], [], []>} : vector<128x128xbf16>, vector<128x128xbf16>, vector<128x128xf32> -> vector<128x128xf32>
    %85 = arith.addf %79, %84 : vector<128x128xf32>
    %c1_90 = arith.constant 1 : index
    %c0_91 = arith.constant 0 : index
    %c32_92 = arith.constant 32 : index
    %c0_93 = arith.constant 0 : index
    %86 = vector.load %arg2[%c1_90, %c0_91, %c32_92, %c0_93] : memref<2x1x160x128xbf16, #tpu.memory_space<vmem>>, vector<1x1x128x128xbf16>
    %87 = vector.shape_cast %86 : vector<1x1x128x128xbf16> to vector<128x128xbf16>
    %c6_94 = arith.constant 6 : index
    %c0_95 = arith.constant 0 : index
    %c0_96 = arith.constant 0 : index
    %88 = vector.load %arg3[%c6_94, %c0_95, %c0_96] : memref<9x128x128xbf16, #tpu.memory_space<vmem>>, vector<1x128x128xbf16>
    %89 = vector.shape_cast %88 : vector<1x128x128xbf16> to vector<128x128xbf16>
    %cst_97 = arith.constant dense<0.000000e+00> : vector<128x128xf32>
    %90 = tpu.matmul %87, %89, %cst_97 {dimension_numbers = #tpu.dot_dimension_numbers<[1], [0], [0], [1], [0, 0, 1, 1], [], []>} : vector<128x128xbf16>, vector<128x128xbf16>, vector<128x128xf32> -> vector<128x128xf32>
    %91 = arith.addf %85, %90 : vector<128x128xf32>
    %c1_98 = arith.constant 1 : index
    %c0_99 = arith.constant 0 : index
    %c0_100 = arith.constant 0 : index
    %c0_101 = arith.constant 0 : index
    %92 = vector.load %arg2[%c1_98, %c0_99, %c0_100, %c0_101] : memref<2x1x160x128xbf16, #tpu.memory_space<vmem>>, vector<1x1x128x128xbf16>
    %93 = vector.shape_cast %92 : vector<1x1x128x128xbf16> to vector<128x128xbf16>
    %c1_102 = arith.constant 1 : index
    %c0_103 = arith.constant 0 : index
    %c0_104 = arith.constant 0 : index
    %94 = vector.load %arg3[%c1_102, %c0_103, %c0_104] : memref<9x128x128xbf16, #tpu.memory_space<vmem>>, vector<1x128x128xbf16>
    %95 = vector.shape_cast %94 : vector<1x128x128xbf16> to vector<128x128xbf16>
    %cst_105 = arith.constant dense<0.000000e+00> : vector<128x128xf32>
    %96 = tpu.matmul %93, %95, %cst_105 {dimension_numbers = #tpu.dot_dimension_numbers<[1], [0], [0], [1], [0, 0, 1, 1], [], []>} : vector<128x128xbf16>, vector<128x128xbf16>, vector<128x128xf32> -> vector<128x128xf32>
    %c1_106 = arith.constant 1 : index
    %c0_107 = arith.constant 0 : index
    %c16_108 = arith.constant 16 : index
    %c0_109 = arith.constant 0 : index
    %97 = vector.load %arg2[%c1_106, %c0_107, %c16_108, %c0_109] : memref<2x1x160x128xbf16, #tpu.memory_space<vmem>>, vector<1x1x128x128xbf16>
    %98 = vector.shape_cast %97 : vector<1x1x128x128xbf16> to vector<128x128xbf16>
    %c4_110 = arith.constant 4 : index
    %c0_111 = arith.constant 0 : index
    %c0_112 = arith.constant 0 : index
    %99 = vector.load %arg3[%c4_110, %c0_111, %c0_112] : memref<9x128x128xbf16, #tpu.memory_space<vmem>>, vector<1x128x128xbf16>
    %100 = vector.shape_cast %99 : vector<1x128x128xbf16> to vector<128x128xbf16>
    %cst_113 = arith.constant dense<0.000000e+00> : vector<128x128xf32>
    %101 = tpu.matmul %98, %100, %cst_113 {dimension_numbers = #tpu.dot_dimension_numbers<[1], [0], [0], [1], [0, 0, 1, 1], [], []>} : vector<128x128xbf16>, vector<128x128xbf16>, vector<128x128xf32> -> vector<128x128xf32>
    %102 = arith.addf %96, %101 : vector<128x128xf32>
    %c1_114 = arith.constant 1 : index
    %c0_115 = arith.constant 0 : index
    %c32_116 = arith.constant 32 : index
    %c0_117 = arith.constant 0 : index
    %103 = vector.load %arg2[%c1_114, %c0_115, %c32_116, %c0_117] : memref<2x1x160x128xbf16, #tpu.memory_space<vmem>>, vector<1x1x128x128xbf16>
    %104 = vector.shape_cast %103 : vector<1x1x128x128xbf16> to vector<128x128xbf16>
    %c7_118 = arith.constant 7 : index
    %c0_119 = arith.constant 0 : index
    %c0_120 = arith.constant 0 : index
    %105 = vector.load %arg3[%c7_118, %c0_119, %c0_120] : memref<9x128x128xbf16, #tpu.memory_space<vmem>>, vector<1x128x128xbf16>
    %106 = vector.shape_cast %105 : vector<1x128x128xbf16> to vector<128x128xbf16>
    %cst_121 = arith.constant dense<0.000000e+00> : vector<128x128xf32>
    %107 = tpu.matmul %104, %106, %cst_121 {dimension_numbers = #tpu.dot_dimension_numbers<[1], [0], [0], [1], [0, 0, 1, 1], [], []>} : vector<128x128xbf16>, vector<128x128xbf16>, vector<128x128xf32> -> vector<128x128xf32>
    %108 = arith.addf %102, %107 : vector<128x128xf32>
    %109 = vector.extract_strided_slice %108 {offsets = [1, 0], sizes = [127, 128], strides = [1, 1]} : vector<128x128xf32> to vector<127x128xf32>
    %110 = vector.extract_strided_slice %108 {offsets = [0, 0], sizes = [1, 128], strides = [1, 1]} : vector<128x128xf32> to vector<1x128xf32>
    %111 = tpu.concatenate %109, %110 in 0 : vector<127x128xf32>, vector<1x128xf32> -> vector<128x128xf32>
    %112 = arith.addf %91, %111 : vector<128x128xf32>
    %c1_122 = arith.constant 1 : index
    %c0_123 = arith.constant 0 : index
    %c0_124 = arith.constant 0 : index
    %c0_125 = arith.constant 0 : index
    %113 = vector.load %arg2[%c1_122, %c0_123, %c0_124, %c0_125] : memref<2x1x160x128xbf16, #tpu.memory_space<vmem>>, vector<1x1x128x128xbf16>
    %114 = vector.shape_cast %113 : vector<1x1x128x128xbf16> to vector<128x128xbf16>
    %c2_126 = arith.constant 2 : index
    %c0_127 = arith.constant 0 : index
    %c0_128 = arith.constant 0 : index
    %115 = vector.load %arg3[%c2_126, %c0_127, %c0_128] : memref<9x128x128xbf16, #tpu.memory_space<vmem>>, vector<1x128x128xbf16>
    %116 = vector.shape_cast %115 : vector<1x128x128xbf16> to vector<128x128xbf16>
    %cst_129 = arith.constant dense<0.000000e+00> : vector<128x128xf32>
    %117 = tpu.matmul %114, %116, %cst_129 {dimension_numbers = #tpu.dot_dimension_numbers<[1], [0], [0], [1], [0, 0, 1, 1], [], []>} : vector<128x128xbf16>, vector<128x128xbf16>, vector<128x128xf32> -> vector<128x128xf32>
    %c1_130 = arith.constant 1 : index
    %c0_131 = arith.constant 0 : index
    %c16_132 = arith.constant 16 : index
    %c0_133 = arith.constant 0 : index
    %118 = vector.load %arg2[%c1_130, %c0_131, %c16_132, %c0_133] : memref<2x1x160x128xbf16, #tpu.memory_space<vmem>>, vector<1x1x128x128xbf16>
    %119 = vector.shape_cast %118 : vector<1x1x128x128xbf16> to vector<128x128xbf16>
    %c5_134 = arith.constant 5 : index
    %c0_135 = arith.constant 0 : index
    %c0_136 = arith.constant 0 : index
    %120 = vector.load %arg3[%c5_134, %c0_135, %c0_136] : memref<9x128x128xbf16, #tpu.memory_space<vmem>>, vector<1x128x128xbf16>
    %121 = vector.shape_cast %120 : vector<1x128x128xbf16> to vector<128x128xbf16>
    %cst_137 = arith.constant dense<0.000000e+00> : vector<128x128xf32>
    %122 = tpu.matmul %119, %121, %cst_137 {dimension_numbers = #tpu.dot_dimension_numbers<[1], [0], [0], [1], [0, 0, 1, 1], [], []>} : vector<128x128xbf16>, vector<128x128xbf16>, vector<128x128xf32> -> vector<128x128xf32>
    %123 = arith.addf %117, %122 : vector<128x128xf32>
    %c1_138 = arith.constant 1 : index
    %c0_139 = arith.constant 0 : index
    %c32_140 = arith.constant 32 : index
    %c0_141 = arith.constant 0 : index
    %124 = vector.load %arg2[%c1_138, %c0_139, %c32_140, %c0_141] : memref<2x1x160x128xbf16, #tpu.memory_space<vmem>>, vector<1x1x128x128xbf16>
    %125 = vector.shape_cast %124 : vector<1x1x128x128xbf16> to vector<128x128xbf16>
    %c8_142 = arith.constant 8 : index
    %c0_143 = arith.constant 0 : index
    %c0_144 = arith.constant 0 : index
    %126 = vector.load %arg3[%c8_142, %c0_143, %c0_144] : memref<9x128x128xbf16, #tpu.memory_space<vmem>>, vector<1x128x128xbf16>
    %127 = vector.shape_cast %126 : vector<1x128x128xbf16> to vector<128x128xbf16>
    %cst_145 = arith.constant dense<0.000000e+00> : vector<128x128xf32>
    %128 = tpu.matmul %125, %127, %cst_145 {dimension_numbers = #tpu.dot_dimension_numbers<[1], [0], [0], [1], [0, 0, 1, 1], [], []>} : vector<128x128xbf16>, vector<128x128xbf16>, vector<128x128xf32> -> vector<128x128xf32>
    %129 = arith.addf %123, %128 : vector<128x128xf32>
    %130 = vector.extract_strided_slice %129 {offsets = [2, 0], sizes = [126, 128], strides = [1, 1]} : vector<128x128xf32> to vector<126x128xf32>
    %131 = vector.extract_strided_slice %129 {offsets = [0, 0], sizes = [2, 128], strides = [1, 1]} : vector<128x128xf32> to vector<2x128xf32>
    %132 = tpu.concatenate %130, %131 in 0 : vector<126x128xf32>, vector<2x128xf32> -> vector<128x128xf32>
    %133 = arith.addf %112, %132 : vector<128x128xf32>
    %134 = vector.broadcast %0 : vector<1x128xf32> to vector<128x128xf32>
    %135 = arith.addf %133, %134 : vector<128x128xf32>
    %c1_146 = arith.constant 1 : index
    %c0_147 = arith.constant 0 : index
    %c0_148 = arith.constant 0 : index
    %136 = vector.load %arg5[%c1_146, %c0_147, %c0_148] : memref<2x128x128xbf16, #tpu.memory_space<vmem>>, vector<1x128x128xbf16>
    %137 = vector.shape_cast %136 : vector<1x128x128xbf16> to vector<128x128xbf16>
    %c0_149 = arith.constant 0 : index
    %c0_150 = arith.constant 0 : index
    %138 = vector.load %arg6[%c0_149, %c0_150] : memref<128x128xbf16, #tpu.memory_space<vmem>>, vector<128x128xbf16>
    %cst_151 = arith.constant dense<0.000000e+00> : vector<128x128xf32>
    %139 = tpu.matmul %137, %138, %cst_151 {dimension_numbers = #tpu.dot_dimension_numbers<[1], [0], [0], [1], [0, 0, 1, 1], [], []>} : vector<128x128xbf16>, vector<128x128xbf16>, vector<128x128xf32> -> vector<128x128xf32>
    %140 = arith.addf %135, %139 : vector<128x128xf32>
    %c0_152 = arith.constant 0 : index
    %c0_153 = arith.constant 0 : index
    %141 = vector.load %arg7[%c0_152, %c0_153] : memref<1x128xf32, #tpu.memory_space<vmem>>, vector<1x128xf32>
    %142 = vector.broadcast %141 : vector<1x128xf32> to vector<128x128xf32>
    %143 = arith.addf %140, %142 : vector<128x128xf32>
    %cst_154 = arith.constant 0.000000e+00 : f32
    %144 = vector.broadcast %cst_154 : f32 to vector<128x128xf32>
    %145 = arith.maximumf %143, %144 : vector<128x128xf32>
    %c1_155 = arith.constant 1 : index
    %c0_156 = arith.constant 0 : index
    %c0_157 = arith.constant 0 : index
    %146 = vector.load %arg8[%c1_155, %c0_156, %c0_157] : memref<2x128x128xf32, #tpu.memory_space<vmem>>, vector<1x128x128xf32>
    %147 = vector.shape_cast %146 : vector<1x128x128xf32> to vector<128x128xf32>
    %148 = vector.shape_cast %145 : vector<128x128xf32> to vector<1x128x128xf32>
    tpu.vector_store %arg8[%c1_155, %c0_156, %c0_157], %148 {strides = array<i32>} : memref<2x128x128xf32, #tpu.memory_space<vmem>>, vector<1x128x128xf32>,
    return
  }
  func.func @transform_0(%arg0: i32, %arg1: i32) -> (i32, i32, i32, i32) {
    %c0_i32 = arith.constant 0 : i32
    %c0_i32_0 = arith.constant 0 : i32
    %c0_i32_1 = arith.constant 0 : i32
    %c0_i32_2 = arith.constant 0 : i32
    return %arg0, %c0_i32, %c0_i32_0, %c0_i32_1 : i32, i32, i32, i32
  }
  func.func @transform_1(%arg0: i32, %arg1: i32) -> (i32, i32, i32) {
    %c0_i32 = arith.constant 0 : i32
    %c0_i32_0 = arith.constant 0 : i32
    %c0_i32_1 = arith.constant 0 : i32
    return %c0_i32, %c0_i32_0, %arg1 : i32, i32, i32
  }
  func.func @transform_2(%arg0: i32, %arg1: i32) -> (i32, i32) {
    %c0_i32 = arith.constant 0 : i32
    %c0_i32_0 = arith.constant 0 : i32
    return %c0_i32, %arg1 : i32, i32
  }
  func.func @transform_3(%arg0: i32, %arg1: i32) -> (i32, i32, i32) {
    %c0_i32 = arith.constant 0 : i32
    %c0_i32_0 = arith.constant 0 : i32
    %c0_i32_1 = arith.constant 0 : i32
    return %arg0, %c0_i32, %c0_i32_0 : i32, i32, i32
  }
  func.func @transform_4(%arg0: i32, %arg1: i32) -> (i32, i32) {
    %c0_i32 = arith.constant 0 : i32
    %c0_i32_0 = arith.constant 0 : i32
    return %c0_i32, %arg1 : i32, i32
  }
  func.func @transform_5(%arg0: i32, %arg1: i32) -> (i32, i32) {
    %c0_i32 = arith.constant 0 : i32
    %c0_i32_0 = arith.constant 0 : i32
    return %c0_i32, %arg1 : i32, i32
  }
  func.func @transform_6(%arg0: i32, %arg1: i32) -> (i32, i32, i32) {
    %c0_i32 = arith.constant 0 : i32
    %c0_i32_0 = arith.constant 0 : i32
    return %arg0, %c0_i32, %arg1 : i32, i32, i32
  }
}

</mosaic_0001>

<bundles_post_ra>
// kernel: _lambda_.2
= control target key start
LH: loop header
LB: loop body
LE: loop exit
PB: predicated region body
PF: predicated region fallthrough
CT: control target
= control target key end

     0   :  { %8 = vsyncpa [#allocation3], 0  ;;  %s6454_s0 = inlined_call_operand.hbm [shape: bf16[2,4,144,128], index: 0, kind: input, shape index: {}]   ;;  %s6455_s1 = inlined_call_operand.hbm [shape: bf16[9,128,128], index: 1, kind: input, shape index: {}]   ;;  %s6456_s2 = inlined_call_operand.hbm [shape: f32[1,128], index: 2, kind: input, shape index: {}]   ;;  %s6457_s3 = inlined_call_operand.hbm [shape: bf16[2,128,128], index: 3, kind: output, shape index: {}]  }
   0x1   :  { %9 = vsyncpa [#allocation6], 0 }
   0x2   :  { %10 = vsyncpa [#allocation4], 0  ;;  %s6136_s12 = smov [#allocation5]   ;;  %s6137_s14 = smov [#allocation2]  }
   0x3   :  { %s28_s13 = sshll.u32 %s6136_s12, 4  ;;  %s16_s15 = sshll.u32 %s6137_s14, 4  ;;  %s29_s13 = int_to_ptr.vmem [resolvable:$true] %s28_s13  ;;  %s6162_s15 = int_to_ptr.vmem [resolvable:$true] %s16_s15 }
   0x4   :  { %s6042_s18 = scalar_lea.hbm %s6455_s1, 9216 }
   0x5   :  { %p6043_p0 = scmp.ne.s32.totalorder %s6455_s1, %s6042_s18  ;;  %p6046_p1 = scmp.lt.u32.totalorder %s6042_s18, %s6455_s1 }
   0x7   :  { %p6048_p2 = pnand %p6046_p1, %p6043_p0 }
   0x9   :  { %6051 = shalt.err (!%p6048_p2)
}
   0xa   :  { %s6052_s23 = scalar_lea.vmem %s29_s13, 9216  ;;  %p6057_p4 = scmp.lt.s32.totalorder %s29_s13, %s29_s13 }
   0xb   :  { %p6053_p3 = scmp.ne.s32.totalorder %s29_s13, %s6052_s23  ;;  %p6058_p5 = scmp.lt.s32.totalorder %s6052_s23, %s6052_s23 }
   0xd   :  { %p6059_p6 = por %p6058_p5, %p6057_p4 }
   0xf   :  { %p6060_p7 = pnand %p6059_p6, %p6053_p3 }
  0x11   :  { %6063 = shalt.err (!%p6060_p7)
}
  0x12   :  { %s6138_s24 = smov 64   ;;  %s6139_s25 = smov 4  }
  0x13   :  { %34 = dma.hbm_to_vmem [thread:$0]  %s6455_s1, 9216, %s29_s13, [#allocation6], %s6138_s24, %s6138_s24, %s6139_s25  }
  0x14   :  { %s6064_s30 = scalar_lea.hbm %s6454_s0, 9216 }
  0x15   :  { %p6065_p8 = scmp.ne.s32.totalorder %s6454_s0, %s6064_s30  ;;  %p6068_p9 = scmp.lt.u32.totalorder %s6064_s30, %s6454_s0 }
  0x17   :  { %p6070_p10 = pnand %p6068_p9, %p6065_p8 }
  0x19   :  { %6073 = shalt.err (!%p6070_p10)
}
  0x1a   :  { %s6074_s8 = scalar_lea.vmem %s6162_s15, 9216  ;;  %p6079_p12 = scmp.lt.s32.totalorder %s6162_s15, %s6162_s15 }
  0x1b   :  { %p6075_p11 = scmp.ne.s32.totalorder %s6162_s15, %s6074_s8  ;;  %p6080_p13 = scmp.lt.s32.totalorder %s6074_s8, %s6074_s8 }
  0x1d   :  { %p6081_p0 = por %p6080_p13, %p6079_p12 }
  0x1f   :  { %p6082_p1 = pnand %p6081_p0, %p6075_p11 }
  0x21   :  { %6085 = shalt.err (!%p6082_p1)
}
  0x22   :  { %22 = dma.hbm_to_vmem [thread:$0]  %s6454_s0, 9216, %s6162_s15, [#allocation3], %s6138_s24, %s6138_s24, %s6139_s25  }
  0x23   :  { %s6140_s10 = smov [#allocation7]   ;;  %s6086_s14 = scalar_lea.hbm %s6456_s2, 16 }
  0x24   :  { %s41_s11 = sshll.u32 %s6140_s10, 4  ;;  %p6087_p2 = scmp.ne.s32.totalorder %s6456_s2, %s6086_s14  ;;  %s42_s11 = int_to_ptr.vmem [resolvable:$true] %s41_s11 }
  0x25   :  { %p6090_p3 = scmp.lt.u32.totalorder %s6086_s14, %s6456_s2 }
  0x27   :  { %p6092_p4 = pnand %p6090_p3, %p6087_p2 }
  0x29   :  { %6095 = shalt.err (!%p6092_p4)
}
  0x2a   :  { %s6096_s20 = scalar_lea.vmem %s42_s11, 16  ;;  %s6100_s0 = scalar_lea.vmem %s42_s11, 32 }
  0x2b   :  { %p6097_p5 = scmp.ne.s32.totalorder %s42_s11, %s6096_s20  ;;  %p6101_p6 = scmp.lt.s32.totalorder %s42_s11, %s42_s11 }
  0x2c   :  { %p6102_p7 = scmp.lt.s32.totalorder %s6100_s0, %s6096_s20 }
  0x2e   :  { %p6103_p8 = por %p6102_p7, %p6101_p6 }
  0x30   :  { %p6104_p9 = pnand %p6103_p8, %p6097_p5 }
  0x32   :  { %6107 = shalt.err (!%p6104_p9)
}
  0x33   :  { %44 = dma.hbm_to_vmem [thread:$0]  %s6456_s2, 16, %s42_s11, [#allocation6]  }
  0x34   :  { %6130 = dma.done.wait [#allocation3], 9216  }
  0x35   :  { %6131 = vsyncadd [#allocation3], 4294958080 }
  0x36   :  { %6132 = dma.done.wait [#allocation6], 9232  }
  0x37   :  { %6133 = vsyncadd [#allocation6], 4294958064  ;;  %v5802_v0 = vld [vmem:[#allocation5 + $0x40] sm:$0xff]   ;;  %v5804_v2 = vld [vmem:[#allocation5 + $0x48] sm:$0xff]   ;;  %vm1996_vm0 = vcmask 1046528   ;;  %s6141_s2 = smov [#allocation8]  }
  0x38   :  { %v5803_v1 = vld [vmem:[#allocation5 + $0x140] sm:$0xff]   ;;  %4996 = vmatprep.subr.bf16.mxu0 %v5802_v0  ;;  %v5805_v3 = vld [vmem:[#allocation5 + $0x148] sm:$0xff]   ;;  %v5806_v4 = vld [vmem:[#allocation5 + $0x50] sm:$0xff]   ;;  %s4296_s22 = sshll.u32 %s6141_s2, 4  ;;  %s4297_s22 = int_to_ptr.vmem [resolvable:$true] %s4296_s22 }
  0x39   :  { %5188 = vmatprep.subr.bf16.mxu1 %v5803_v1  ;;  %4997 = vmatpush3.bf16.msra.mxu0 %v5802_v0  ;;  %v5807_v5 = vld [vmem:[#allocation5 + $0x150] sm:$0xff]   ;;  %v5808_v6 = vld [vmem:[#allocation5 + $0x58] sm:$0xff]   ;;  %v5810_v8 = vld [vmem:[#allocation5 + $0x60] sm:$0xff]   ;;  %s6108_s23 = scalar_lea.vmem %s4297_s22, 2048  ;;  %p6113_p11 = scmp.lt.s32.totalorder %s4297_s22, %s4297_s22 }
  0x3a   :  { %5189 = vmatpush3.bf16.msra.mxu1 %v5803_v1  ;;  %4998 = vmatprep.subr.bf16.mxu0 %v5804_v2  ;;  %v5809_v7 = vld [vmem:[#allocation5 + $0x158] sm:$0xff]   ;;  %v5811_v9 = vld [vmem:[#allocation5 + $0x160] sm:$0xff]   ;;  %v5812_v10 = vld [vmem:[#allocation5 + $0x68] sm:$0xff]   ;;  %p6109_p10 = scmp.ne.s32.totalorder %s4297_s22, %s6108_s23  ;;  %p6114_p12 = scmp.lt.s32.totalorder %s6108_s23, %s6108_s23 }
  0x3b   :  { %5190 = vmatprep.subr.bf16.mxu1 %v5805_v3  ;;  %v5813_v11 = vld [vmem:[#allocation5 + $0x168] sm:$0xff]   ;;  %v6211_v13 = vld [vmem:[#allocation2 + $0x90] sm:$0xff]   ;;  %v5816_v16 = vld [vmem:[#allocation5 + $0x78] sm:$0xff]  }
  0x3c   :  { %v5818_v12 = vld [vmem:[#allocation2 + $0x48] sm:$0xff]   ;;  %5204 = vmatprep.mubr.bf16.mxu1 %v6211_v13  ;;  %v5814_v14 = vld [vmem:[#allocation5 + $0x70] sm:$0xff]   ;;  %v5817_v17 = vld [vmem:[#allocation5 + $0x178] sm:$0xff]   ;;  %p6115_p13 = por %p6114_p12, %p6113_p11 }
  0x3d   :  { %4999 = vmatpush3.bf16.msra.mxu0 %v5804_v2  ;;  %5012 = vmatprep.mubr.bf16.mxu0 %v5818_v12  ;;  %v5815_v15 = vld [vmem:[#allocation5 + $0x170] sm:$0xff]   ;;  %v5821_v19 = vld [vmem:[#allocation5] sm:$0xff]   ;;  %v6214_v21 = vld [vmem:[#allocation2 + $0x98] sm:$0xff]  }
  0x3e   :  { %5191 = vmatpush3.bf16.msra.mxu1 %v5805_v3  ;;  %5000 = vmatprep.subr.bf16.mxu0 %v5806_v4  ;;  %v5820_v18 = vld [vmem:[#allocation2 + $0x50] sm:$0xff]   ;;  %v5823_v20 = vld [vmem:[#allocation5 + $0x80] sm:$0xff]   ;;  %v5824_v22 = vld [vmem:[#allocation5 + $0x8] sm:$0xff]   ;;  %p6116_p0 = pnand %p6115_p13, %p6109_p10 }
  0x3f   :  { %5192 = vmatprep.subr.bf16.mxu1 %v5807_v5  ;;  %v5825_v23 = vld [vmem:[#allocation5 + $0x88] sm:$0xff]   ;;  %v5826_v24 = vld [vmem:[#allocation2 + $0x58] sm:$0xff]   ;;  %v6216_v25 = vld [vmem:[#allocation2 + $0xa0] sm:$0xff]  }
  0x40   :  { %v5828_v26 = vld [vmem:[#allocation2 + $0x60] sm:$0xff]   ;;  %v5829_v27 = vld [vmem:[#allocation5 + $0x10] sm:$0xff]   ;;  %v6220_v29 = vld [vmem:[#allocation2 + $0xa8] sm:$0xff]  }
  0x41   :  { %5001 = vmatpush3.bf16.msra.mxu0 %v5806_v4  ;;  %v5831_v28 = vld [vmem:[#allocation5 + $0x90] sm:$0xff]   ;;  %v5832_v30 = vld [vmem:[#allocation5 + $0x18] sm:$0xff]   ;;  %v5834_v32 = vld [vmem:[#allocation2 + $0x68] sm:$0xff]  }
  0x42   :  { %5193 = vmatpush3.bf16.msra.mxu1 %v5807_v5  ;;  %5002 = vmatprep.subr.bf16.mxu0 %v5808_v6  ;;  %v5833_v31 = vld [vmem:[#allocation5 + $0x98] sm:$0xff]   ;;  %v6222_v33 = vld [vmem:[#allocation2 + $0xb0] sm:$0xff]   ;;  %v5837_v35 = vld [vmem:[#allocation5 + $0x20] sm:$0xff]  }
  0x43   :  { %5194 = vmatprep.subr.bf16.mxu1 %v5809_v7  ;;  %v5836_v34 = vld [vmem:[#allocation2 + $0x70] sm:$0xff]   ;;  %v5839_v36 = vld [vmem:[#allocation5 + $0xa0] sm:$0xff]   ;;  %v6226_v37 = vld [vmem:[#allocation2 + $0xb8] sm:$0xff]  }
  0x44   :  { %v5840_v38 = vld [vmem:[#allocation5 + $0x28] sm:$0xff]   ;;  %v5842_v40 = vld [vmem:[#allocation2 + $0x78] sm:$0xff]   ;;  %v6228_v41 = vld [vmem:[#allocation2 + $0xc0] sm:$0xff]  }
  0x45   :  { %5003 = vmatpush3.bf16.msra.mxu0 %v5808_v6  ;;  %v5841_v39 = vld [vmem:[#allocation5 + $0xa8] sm:$0xff]   ;;  %v5844_v42 = vld [vmem:[#allocation2 + $0x80] sm:$0xff]   ;;  %v5845_v43 = vld [vmem:[#allocation5 + $0x30] sm:$0xff]  }
  0x46   :  { %5195 = vmatpush3.bf16.msra.mxu1 %v5809_v7  ;;  %5004 = vmatprep.subr.bf16.mxu0 %v5810_v8  ;;  %v5847_v44 = vld [vmem:[#allocation5 + $0xb0] sm:$0xff]   ;;  %v6232_v45 = vld [vmem:[#allocation2 + $0xc8] sm:$0xff]   ;;  %v5848_v46 = vld [vmem:[#allocation5 + $0x38] sm:$0xff]  }
  0x47   :  { %5196 = vmatprep.subr.bf16.mxu1 %v5811_v9  ;;  %v5849_v47 = vld [vmem:[#allocation5 + $0xb8] sm:$0xff]   ;;  %v5850_v48 = vld [vmem:[#allocation2] sm:$0xff]   ;;  %v5851_v51 = vld [vmem:[#allocation2 + $0x8] sm:$0xff]  }
  0x48   :  { %v5852_v49 = vld [vmem:[#allocation5 + $0xc0] sm:$0xff]   ;;  %v5854_v52 = vld [vmem:[#allocation5 + $0xc8] sm:$0xff]   ;;  %v5856_v54 = vld [vmem:[#allocation2 + $0x10] sm:$0xff]  }
  0x49   :  { %5005 = vmatpush3.bf16.msra.mxu0 %v5810_v8  ;;  %v5853_v50 = vld [vmem:[#allocation5 + $0x200] sm:$0xff]   ;;  %v5855_v53 = vld [vmem:[#allocation5 + $0x208] sm:$0xff]   ;;  %v5858_v55 = vld [vmem:[#allocation5 + $0xd0] sm:$0xff]  }
  0x4a   :  { %5197 = vmatpush3.bf16.msra.mxu1 %v5811_v9  ;;  %5006 = vmatprep.subr.bf16.mxu0 %v5812_v10  ;;  %v5859_v56 = vld [vmem:[#allocation5 + $0x210] sm:$0xff]   ;;  %v5857_v57 = vld [vmem:[#allocation2 + $0x18] sm:$0xff]   ;;  %v5862_v60 = vld [vmem:[#allocation2 + $0x20] sm:$0xff]  }
  0x4b   :  { %5198 = vmatprep.subr.bf16.mxu1 %v5813_v11  ;;  %v5860_v58 = vld [vmem:[#allocation5 + $0xd8] sm:$0xff]   ;;  %v5864_v61 = vld [vmem:[#allocation5 + $0xe0] sm:$0xff]   ;;  %v5863_v63 = vld [vmem:[#allocation2 + $0x28] sm:$0xff]  }
  0x4c   :  { %v5861_v59 = vld [vmem:[#allocation5 + $0x218] sm:$0xff]   ;;  %v5865_v62 = vld [vmem:[#allocation5 + $0x220] sm:$0xff]   ;;  %v5866_v0 = vld [vmem:[#allocation5 + $0xe8] sm:$0xff]  }
  0x4d   :  { %5007 = vmatpush3.bf16.msra.mxu0 %v5812_v10  ;;  %v5867_v1 = vld [vmem:[#allocation5 + $0x228] sm:$0xff]   ;;  %v5868_v2 = vld [vmem:[#allocation2 + $0x30] sm:$0xff]   ;;  %v5869_v5 = vld [vmem:[#allocation2 + $0x38] sm:$0xff]  }
  0x4e   :  { %5199 = vmatpush3.bf16.msra.mxu1 %v5813_v11  ;;  %5008 = vmatprep.subr.bf16.mxu0 %v5814_v14  ;;  %v5870_v3 = vld [vmem:[#allocation5 + $0xf0] sm:$0xff]   ;;  %v5872_v6 = vld [vmem:[#allocation5 + $0xf8] sm:$0xff]   ;;  %v6235_v8 = vld [vmem:[#allocation2 + $0x8] sm:$0xff]  }
  0x4f   :  { %5200 = vmatprep.subr.bf16.mxu1 %v5815_v15  ;;  %v5871_v4 = vld [vmem:[#allocation5 + $0x230] sm:$0xff]   ;;  %v5873_v7 = vld [vmem:[#allocation5 + $0x238] sm:$0xff]   ;;  %v5875_v9 = vld [vmem:[#allocation5 + $0x100] sm:$0xff]  }
  0x50   :  { %v5877_v10 = vld [vmem:[#allocation5 + $0x40] sm:$0xff]   ;;  %v6239_v11 = vld [vmem:[#allocation2 + $0x10] sm:$0xff]   ;;  %v5878_v12 = vld [vmem:[#allocation5 + $0x108] sm:$0xff]  }
  0x51   :  { %5009 = vmatpush3.bf16.msra.mxu0 %v5814_v14  ;;  %v5879_v14 = vld [vmem:[#allocation5 + $0x48] sm:$0xff]  }
  0x52   :  { %5201 = vmatpush3.bf16.msra.mxu1 %v5815_v15  ;;  %5010 = vmatprep.subr.bf16.mxu0 %v5816_v16  ;;  %v6242_v15 = vld [vmem:[#allocation2 + $0x18] sm:$0xff]  }
  0x53   :  { %5202 = vmatprep.subr.bf16.mxu1 %v5817_v17 }
  0x55   :  { %5011 = vmatpush3.bf16.msra.mxu0 %v5816_v16  ;;  %v5883_v16 = vld [vmem:[#allocation5 + $0x50] sm:$0xff]  }
  0x56   :  { %5203 = vmatpush3.bf16.msra.mxu1 %v5817_v17  ;;  %5028 = vmatprep.subr.bf16.mxu0 %v5821_v19  ;;  %v6247_v17 = vld [vmem:[#allocation2 + $0x20] sm:$0xff]  }
  0x57   :  { %5220 = vmatprep.subr.bf16.mxu1 %v5823_v20 }
  0x58   :  { %5013 = vmatmul.mubr.bf16.vlgmr.msra.gmra.mrb[0].mxu0 %v5820_v18  ;;  %v5884_v18 = vld [vmem:[#allocation5 + $0x118] sm:$0xff]  }
  0x59   :  { %5205 = vmatmul.mubr.bf16.vlgmr.msra.gmra.mrb[0].mxu1 %v6214_v21  ;;  %5029 = vmatpush3.bf16.msra.mxu0 %v5821_v19  ;;  %v5885_v19 = vld [vmem:[#allocation5 + $0x58] sm:$0xff]  }
  0x5a   :  { %5221 = vmatpush3.bf16.msra.mxu1 %v5823_v20  ;;  %5030 = vmatprep.subr.bf16.mxu0 %v5824_v22  ;;  %v6250_v20 = vld [vmem:[#allocation2 + $0x28] sm:$0xff]  }
  0x5b   :  { %5222 = vmatprep.subr.bf16.mxu1 %v5825_v23  ;;  %5016 = vmatprep.mubr.bf16.mxu0 %v5826_v24  ;;  %v5890_v24 = vld [vmem:[#allocation5 + $0x128] sm:$0xff]  }
  0x5c   :  { %5208 = vmatprep.mubr.bf16.mxu1 %v6216_v25 }
  0x5d   :  { %5031 = vmatpush3.bf16.msra.mxu0 %v5824_v22  ;;  %v5889_v22 = vld [vmem:[#allocation5 + $0x60] sm:$0xff]  }
  0x5e   :  { %5223 = vmatpush3.bf16.msra.mxu1 %v5825_v23  ;;  %5032 = vmatprep.subr.bf16.mxu0 %v5829_v27  ;;  %v6255_v23 = vld [vmem:[#allocation2 + $0x30] sm:$0xff]  }
  0x5f   :  { %5224 = vmatprep.subr.bf16.mxu1 %v5831_v28 }
  0x60   :  { %5017 = vmatmul.mubr.bf16.gmra.mrb[4].mxu0 %v5828_v26  ;;  %v6258_v26 = vld [vmem:[#allocation2 + $0x38] sm:$0xff]  }
  0x61   :  { %5209 = vmatmul.mubr.bf16.gmra.mrb[4].mxu1 %v6220_v29  ;;  %5033 = vmatpush3.bf16.msra.mxu0 %v5829_v27  ;;  %v5893_v27 = vld [vmem:[#allocation5 + $0x130] sm:$0xff]  }
  0x62   :  { %5225 = vmatpush3.bf16.msra.mxu1 %v5831_v28  ;;  %5034 = vmatprep.subr.bf16.mxu0 %v5832_v30  ;;  %v5895_v28 = vld [vmem:[#allocation5 + $0x70] sm:$0xff]  }
  0x63   :  { %5226 = vmatprep.subr.bf16.mxu1 %v5833_v31  ;;  %5020 = vmatprep.mubr.bf16.mxu0 %v5834_v32  ;;  %v5898_v32 = vld [vmem:[#allocation2 + $0xd8] sm:$0xff]  }
  0x64   :  { %5212 = vmatprep.mubr.bf16.mxu1 %v6222_v33 }
  0x65   :  { %5035 = vmatpush3.bf16.msra.mxu0 %v5832_v30  ;;  %v5896_v30 = vld [vmem:[#allocation5 + $0x138] sm:$0xff]  }
  0x66   :  { %5227 = vmatpush3.bf16.msra.mxu1 %v5833_v31  ;;  %5036 = vmatprep.subr.bf16.mxu0 %v5837_v35  ;;  %v5897_v31 = vld [vmem:[#allocation5 + $0x78] sm:$0xff]  }
  0x67   :  { %5228 = vmatprep.subr.bf16.mxu1 %v5839_v36 }
  0x68   :  { %5021 = vmatmul.mubr.bf16.gmra.mrb[8].mxu0 %v5836_v34  ;;  %v5900_v34 = vld [vmem:[#allocation2 + $0xe0] sm:$0xff]  }
  0x69   :  { %5213 = vmatmul.mubr.bf16.gmra.mrb[8].mxu1 %v6226_v37  ;;  %5037 = vmatpush3.bf16.msra.mxu0 %v5837_v35  ;;  %v5901_v35 = vld [vmem:[#allocation5 + $0x180] sm:$0xff]  }
  0x6a   :  { %5229 = vmatpush3.bf16.msra.mxu1 %v5839_v36  ;;  %5038 = vmatprep.subr.bf16.mxu0 %v5840_v38  ;;  %v5903_v36 = vld [vmem:[#allocation5] sm:$0xff]  }
  0x6b   :  { %5230 = vmatprep.subr.bf16.mxu1 %v5841_v39  ;;  %5024 = vmatprep.mubr.bf16.mxu0 %v5842_v40  ;;  %v5906_v40 = vld [vmem:[#allocation2 + $0xe8] sm:$0xff]  }
  0x6c   :  { %5216 = vmatprep.mubr.bf16.mxu1 %v6228_v41 }
  0x6d   :  { %5039 = vmatpush3.bf16.msra.mxu0 %v5840_v38  ;;  %v5904_v38 = vld [vmem:[#allocation5 + $0x188] sm:$0xff]  }
  0x6e   :  { %5231 = vmatpush3.bf16.msra.mxu1 %v5841_v39  ;;  %5040 = vmatprep.subr.bf16.mxu0 %v5845_v43  ;;  %v5905_v39 = vld [vmem:[#allocation5 + $0x8] sm:$0xff]  }
  0x6f   :  { %5232 = vmatprep.subr.bf16.mxu1 %v5847_v44 }
  0x70   :  { %5025 = vmatmul.mubr.bf16.gmra.mrb[12].mxu0 %v5844_v42  ;;  %v5908_v42 = vld [vmem:[#allocation2 + $0xf0] sm:$0xff]  }
  0x71   :  { %5217 = vmatmul.mubr.bf16.gmra.mrb[12].mxu1 %v6232_v45  ;;  %5041 = vmatpush3.bf16.msra.mxu0 %v5845_v43  ;;  %v5909_v43 = vld [vmem:[#allocation5 + $0x190] sm:$0xff]  }
  0x72   :  { %5233 = vmatpush3.bf16.msra.mxu1 %v5847_v44  ;;  %5042 = vmatprep.subr.bf16.mxu0 %v5848_v46  ;;  %v5911_v44 = vld [vmem:[#allocation5 + $0x10] sm:$0xff]  }
  0x73   :  { %5234 = vmatprep.subr.bf16.mxu1 %v5849_v47  ;;  %5044 = vmatprep.mubr.bf16.mxu0 %v5850_v48 }
  0x74   :  { %5236 = vmatprep.mubr.bf16.mxu1 %v5850_v48  ;;  %v5914_v48 = vld [vmem:[#allocation2 + $0xf8] sm:$0xff]  }
  0x75   :  { %5043 = vmatpush3.bf16.msra.mxu0 %v5848_v46  ;;  %v5912_v46 = vld [vmem:[#allocation5 + $0x198] sm:$0xff]  }
  0x76   :  { %5235 = vmatpush3.bf16.msra.mxu1 %v5849_v47  ;;  %5060 = vmatprep.subr.bf16.mxu0 %v5852_v49  ;;  %v5913_v47 = vld [vmem:[#allocation5 + $0x18] sm:$0xff]  }
  0x77   :  { %5252 = vmatprep.subr.bf16.mxu1 %v5853_v50 }
  0x78   :  { %5045 = vmatmul.mubr.bf16.vlgmr.msra.gmra.mrb[0].mxu0 %v5851_v51 }
  0x79   :  { %5237 = vmatmul.mubr.bf16.vlgmr.msra.gmra.mrb[0].mxu1 %v5851_v51  ;;  %5061 = vmatpush3.bf16.msra.mxu0 %v5852_v49  ;;  %v5915_v49 = vld [vmem:[#allocation2 + $0x188] sm:$0xff]   ;;  %v5917_v51 = vld [vmem:[#allocation5 + $0x1a0] sm:$0xff]  }
  0x7a   :  { %5253 = vmatpush3.bf16.msra.mxu1 %v5853_v50  ;;  %5062 = vmatprep.subr.bf16.mxu0 %v5854_v52  ;;  %v5916_v50 = vld [vmem:[#allocation2 + $0x100] sm:$0xff]  }
  0x7b   :  { %5254 = vmatprep.subr.bf16.mxu1 %v5855_v53  ;;  %5048 = vmatprep.mubr.bf16.mxu0 %v5856_v54 }
  0x7c   :  { %5240 = vmatprep.mubr.bf16.mxu1 %v5856_v54  ;;  %v5920_v54 = vld [vmem:[#allocation5 + $0x1a8] sm:$0xff]  }
  0x7d   :  { %5063 = vmatpush3.bf16.msra.mxu0 %v5854_v52  ;;  %v5919_v52 = vld [vmem:[#allocation5 + $0x20] sm:$0xff]  }
  0x7e   :  { %5255 = vmatpush3.bf16.msra.mxu1 %v5855_v53  ;;  %5064 = vmatprep.subr.bf16.mxu0 %v5858_v55  ;;  %v5918_v53 = vld [vmem:[#allocation2 + $0x190] sm:$0xff]  }
  0x7f   :  { %5256 = vmatprep.subr.bf16.mxu1 %v5859_v56 }
  0x80   :  { %5049 = vmatmul.mubr.bf16.gmra.mrb[4].mxu0 %v5857_v57 }
  0x81   :  { %5241 = vmatmul.mubr.bf16.gmra.mrb[4].mxu1 %v5857_v57  ;;  %5065 = vmatpush3.bf16.msra.mxu0 %v5858_v55  ;;  %v5921_v55 = vld [vmem:[#allocation5 + $0x28] sm:$0xff]   ;;  %v5923_v57 = vld [vmem:[#allocation2 + $0x198] sm:$0xff]  }
  0x82   :  { %5257 = vmatpush3.bf16.msra.mxu1 %v5859_v56  ;;  %5066 = vmatprep.subr.bf16.mxu0 %v5860_v58  ;;  %v5922_v56 = vld [vmem:[#allocation2 + $0x108] sm:$0xff]  }
  0x83   :  { %5258 = vmatprep.subr.bf16.mxu1 %v5861_v59  ;;  %5052 = vmatprep.mubr.bf16.mxu0 %v5862_v60 }
  0x84   :  { %5244 = vmatprep.mubr.bf16.mxu1 %v5862_v60  ;;  %v5924_v60 = vld [vmem:[#allocation2 + $0x110] sm:$0xff]  }
  0x85   :  { %5067 = vmatpush3.bf16.msra.mxu0 %v5860_v58  ;;  %v5925_v58 = vld [vmem:[#allocation5 + $0x1b0] sm:$0xff]  }
  0x86   :  { %5259 = vmatpush3.bf16.msra.mxu1 %v5861_v59  ;;  %5068 = vmatprep.subr.bf16.mxu0 %v5864_v61  ;;  %v5927_v59 = vld [vmem:[#allocation5 + $0x30] sm:$0xff]  }
  0x87   :  { %5260 = vmatprep.subr.bf16.mxu1 %v5865_v62 }
  0x88   :  { %5053 = vmatmul.mubr.bf16.gmra.mrb[8].mxu0 %v5863_v63 }
  0x89   :  { %5245 = vmatmul.mubr.bf16.gmra.mrb[8].mxu1 %v5863_v63  ;;  %5069 = vmatpush3.bf16.msra.mxu0 %v5864_v61  ;;  %v5926_v61 = vld [vmem:[#allocation2 + $0x1a0] sm:$0xff]   ;;  %v5929_v63 = vld [vmem:[#allocation5 + $0x38] sm:$0xff]  }
  0x8a   :  { %5261 = vmatpush3.bf16.msra.mxu1 %v5865_v62  ;;  %5070 = vmatprep.subr.bf16.mxu0 %v5866_v0  ;;  %v5928_v62 = vld [vmem:[#allocation5 + $0x1b8] sm:$0xff]  }
  0x8b   :  { %5262 = vmatprep.subr.bf16.mxu1 %v5867_v1  ;;  %5056 = vmatprep.mubr.bf16.mxu0 %v5868_v2 }
  0x8c   :  { %5248 = vmatprep.mubr.bf16.mxu1 %v5868_v2  ;;  %v5933_v2 = vld [vmem:[#allocation5 + $0xc0] sm:$0xff]  }
  0x8d   :  { %5071 = vmatpush3.bf16.msra.mxu0 %v5866_v0  ;;  %v6267_v0 = vld [vmem:[#allocation2 + $0x120] sm:$0xff]  }
  0x8e   :  { %5263 = vmatpush3.bf16.msra.mxu1 %v5867_v1  ;;  %5072 = vmatprep.subr.bf16.mxu0 %v5870_v3  ;;  %v5931_v1 = vld [vmem:[#allocation5 + $0x1c0] sm:$0xff]  }
  0x8f   :  { %5264 = vmatprep.subr.bf16.mxu1 %v5871_v4 }
  0x90   :  { %5057 = vmatmul.mubr.bf16.gmra.mrb[12].mxu0 %v5869_v5 }
  0x91   :  { %5249 = vmatmul.mubr.bf16.gmra.mrb[12].mxu1 %v5869_v5  ;;  %5073 = vmatpush3.bf16.msra.mxu0 %v5870_v3  ;;  %v6271_v3 = vld [vmem:[#allocation2 + $0x128] sm:$0xff]  }
  0x92   :  { %5265 = vmatpush3.bf16.msra.mxu1 %v5871_v4  ;;  %5074 = vmatprep.subr.bf16.mxu0 %v5872_v6  ;;  %v5934_v4 = vld [vmem:[#allocation5 + $0x1c8] sm:$0xff]  }
  0x93   :  { %5266 = vmatprep.subr.bf16.mxu1 %v5873_v7  ;;  %5076 = vmatprep.mubr.bf16.mxu0 %v6211_v13  ;;  %v5881_v13 = vld [vmem:[#allocation5 + $0x110] sm:$0xff]   ;;  %v5935_v5 = vld [vmem:[#allocation5 + $0xc8] sm:$0xff]  }
  0x94   :  { %5268 = vmatprep.mubr.bf16.mxu1 %v6235_v8 }
  0x95   :  { %5075 = vmatpush3.bf16.msra.mxu0 %v5872_v6  ;;  %v6274_v6 = vld [vmem:[#allocation2 + $0x130] sm:$0xff]  }
  0x96   :  { %5267 = vmatpush3.bf16.msra.mxu1 %v5873_v7  ;;  %5092 = vmatprep.subr.bf16.mxu0 %v5875_v9  ;;  %v5937_v7 = vld [vmem:[#allocation5 + $0x1d0] sm:$0xff]  }
  0x97   :  { %5284 = vmatprep.subr.bf16.mxu1 %v5877_v10 }
  0x98   :  { %5077 = vmatmul.mubr.bf16.vlgmr.msra.gmra.mrb[0].mxu0 %v6214_v21  ;;  %v5887_v21 = vld [vmem:[#allocation5 + $0x120] sm:$0xff]  }
  0x99   :  { %5269 = vmatmul.mubr.bf16.vlgmr.msra.gmra.mrb[0].mxu1 %v6239_v11  ;;  %5093 = vmatpush3.bf16.msra.mxu0 %v5875_v9  ;;  %v6279_v9 = vld [vmem:[#allocation2 + $0x138] sm:$0xff]  }
  0x9a   :  { %5285 = vmatpush3.bf16.msra.mxu1 %v5877_v10  ;;  %5094 = vmatprep.subr.bf16.mxu0 %v5878_v12  ;;  %v5940_v10 = vld [vmem:[#allocation5 + $0x1d8] sm:$0xff]  }
  0x9b   :  { %5286 = vmatprep.subr.bf16.mxu1 %v5879_v14  ;;  %5080 = vmatprep.mubr.bf16.mxu0 %v6216_v25  ;;  %v5891_v25 = vld [vmem:[#allocation5 + $0x68] sm:$0xff]  }
  0x9c   :  { %5272 = vmatprep.mubr.bf16.mxu1 %v6242_v15 }
  0x9d   :  { %5095 = vmatpush3.bf16.msra.mxu0 %v5878_v12  ;;  %v6282_v12 = vld [vmem:[#allocation2 + $0x140] sm:$0xff]  }
  0x9e   :  { %5287 = vmatpush3.bf16.msra.mxu1 %v5879_v14  ;;  %5096 = vmatprep.subr.bf16.mxu0 %v5881_v13  ;;  %v5943_v14 = vld [vmem:[#allocation5 + $0x1e0] sm:$0xff]  }
  0x9f   :  { %5288 = vmatprep.subr.bf16.mxu1 %v5883_v16 }
  0xa0   :  { %5081 = vmatmul.mubr.bf16.gmra.mrb[4].mxu0 %v6220_v29  ;;  %v6263_v29 = vld [vmem:[#allocation2 + $0x40] sm:$0xff]  }
  0xa1   :  { %5273 = vmatmul.mubr.bf16.gmra.mrb[4].mxu1 %v6247_v17  ;;  %5097 = vmatpush3.bf16.msra.mxu0 %v5881_v13  ;;  %v6287_v13 = vld [vmem:[#allocation2 + $0x148] sm:$0xff]  }
  0xa2   :  { %5289 = vmatpush3.bf16.msra.mxu1 %v5883_v16  ;;  %5098 = vmatprep.subr.bf16.mxu0 %v5884_v18  ;;  %v5946_v16 = vld [vmem:[#allocation5 + $0x1e8] sm:$0xff]  }
  0xa3   :  { %5290 = vmatprep.subr.bf16.mxu1 %v5885_v19  ;;  %5084 = vmatprep.mubr.bf16.mxu0 %v6222_v33  ;;  %v5899_v33 = vld [vmem:[#allocation2 + $0x168] sm:$0xff]  }
  0xa4   :  { %5276 = vmatprep.mubr.bf16.mxu1 %v6250_v20 }
  0xa5   :  { %5099 = vmatpush3.bf16.msra.mxu0 %v5884_v18  ;;  %v6290_v18 = vld [vmem:[#allocation2 + $0x150] sm:$0xff]  }
  0xa6   :  { %5291 = vmatpush3.bf16.msra.mxu1 %v5885_v19  ;;  %5100 = vmatprep.subr.bf16.mxu0 %v5887_v21  ;;  %v5949_v19 = vld [vmem:[#allocation5 + $0x1f0] sm:$0xff]  }
  0xa7   :  { %5292 = vmatprep.subr.bf16.mxu1 %v5889_v22 }
  0xa8   :  { %5085 = vmatmul.mubr.bf16.gmra.mrb[8].mxu0 %v6226_v37  ;;  %v5902_v37 = vld [vmem:[#allocation2 + $0x170] sm:$0xff]  }
  0xa9   :  { %5277 = vmatmul.mubr.bf16.gmra.mrb[8].mxu1 %v6255_v23  ;;  %5101 = vmatpush3.bf16.msra.mxu0 %v5887_v21  ;;  %v6295_v21 = vld [vmem:[#allocation2 + $0x158] sm:$0xff]  }
  0xaa   :  { %5293 = vmatpush3.bf16.msra.mxu1 %v5889_v22  ;;  %5102 = vmatprep.subr.bf16.mxu0 %v5890_v24  ;;  %v5952_v22 = vld [vmem:[#allocation5 + $0x1f8] sm:$0xff]  }
  0xab   :  { %5294 = vmatprep.subr.bf16.mxu1 %v5891_v25  ;;  %5088 = vmatprep.mubr.bf16.mxu0 %v6228_v41  ;;  %v5907_v41 = vld [vmem:[#allocation2 + $0x178] sm:$0xff]  }
  0xac   :  { %5280 = vmatprep.mubr.bf16.mxu1 %v6258_v26 }
  0xad   :  { %5103 = vmatpush3.bf16.msra.mxu0 %v5890_v24  ;;  %v5954_v24 = vld [vmem:[#allocation2 + $0x50] sm:$0xff]  }
  0xae   :  { %5295 = vmatpush3.bf16.msra.mxu1 %v5891_v25  ;;  %5104 = vmatprep.subr.bf16.mxu0 %v5893_v27  ;;  %v6298_v25 = vld [vmem:[#allocation2 + $0x1b0] sm:$0xff]  }
  0xaf   :  { %5296 = vmatprep.subr.bf16.mxu1 %v5895_v28 }
  0xb0   :  { %5089 = vmatmul.mubr.bf16.gmra.mrb[12].mxu0 %v6232_v45  ;;  %v5910_v45 = vld [vmem:[#allocation2 + $0x180] sm:$0xff]  }
  0xb1   :  { %5281 = vmatmul.mubr.bf16.gmra.mrb[12].mxu1 %v6263_v29  ;;  %5105 = vmatpush3.bf16.msra.mxu0 %v5893_v27  ;;  %v5959_v27 = vld [vmem:[#allocation5 + $0x140] sm:$0xff]  }
  0xb2   :  { %5297 = vmatpush3.bf16.msra.mxu1 %v5895_v28  ;;  %5106 = vmatprep.subr.bf16.mxu0 %v5896_v30  ;;  %v5958_v28 = vld [vmem:[#allocation5 + $0x100] sm:$0xff]  }
  0xb3   :  { %5298 = vmatprep.subr.bf16.mxu1 %v5897_v31  ;;  %5108 = vmatprep.mubr.bf16.mxu0 %v5898_v32  ;;  %v5962_v32 = vld [vmem:[#allocation2 + $0x60] sm:$0xff]  }
  0xb4   :  { %5300 = vmatprep.mubr.bf16.mxu1 %v5899_v33  ;;  %v6304_v33 = vld [vmem:[#allocation2 + $0x1c0] sm:$0xff]  }
  0xb5   :  { %5107 = vmatpush3.bf16.msra.mxu0 %v5896_v30  ;;  %v6302_v30 = vld [vmem:[#allocation2 + $0x1b8] sm:$0xff]  }
  0xb6   :  { %5299 = vmatpush3.bf16.msra.mxu1 %v5897_v31  ;;  %5124 = vmatprep.subr.bf16.mxu0 %v5901_v35  ;;  %v5960_v31 = vld [vmem:[#allocation5 + $0x108] sm:$0xff]  }
  0xb7   :  { %5316 = vmatprep.subr.bf16.mxu1 %v5903_v36 }
  0xb8   :  { %5109 = vmatmul.mubr.bf16.vlgmr.msra.gmra.mrb[0].mxu0 %v5900_v34  ;;  %v5964_v34 = vld [vmem:[#allocation2 + $0x68] sm:$0xff]  }
  0xb9   :  { %5301 = vmatmul.mubr.bf16.vlgmr.msra.gmra.mrb[16].mxu1 %v5902_v37  ;;  %5125 = vmatpush3.bf16.msra.mxu0 %v5901_v35  ;;  %v5967_v35 = vld [vmem:[#allocation5 + $0x150] sm:$0xff]   ;;  %v6308_v37 = vld [vmem:[#allocation2 + $0x1c8] sm:$0xff]  }
  0xba   :  { %5317 = vmatpush3.bf16.msra.mxu1 %v5903_v36  ;;  %5126 = vmatprep.subr.bf16.mxu0 %v5904_v38  ;;  %v5966_v36 = vld [vmem:[#allocation5 + $0x110] sm:$0xff]  }
  0xbb   :  { %5318 = vmatprep.subr.bf16.mxu1 %v5905_v39  ;;  %5112 = vmatprep.mubr.bf16.mxu0 %v5906_v40  ;;  %v5970_v40 = vld [vmem:[#allocation2 + $0x70] sm:$0xff]  }
  0xbc   :  { %5304 = vmatprep.mubr.bf16.mxu1 %v5907_v41  ;;  %v6310_v41 = vld [vmem:[#allocation2 + $0x1d0] sm:$0xff]  }
  0xbd   :  { %5127 = vmatpush3.bf16.msra.mxu0 %v5904_v38  ;;  %v5968_v38 = vld [vmem:[#allocation5 + $0x118] sm:$0xff]  }
  0xbe   :  { %5319 = vmatpush3.bf16.msra.mxu1 %v5905_v39  ;;  %5128 = vmatprep.subr.bf16.mxu0 %v5909_v43  ;;  %v5969_v39 = vld [vmem:[#allocation5 + $0x158] sm:$0xff]  }
  0xbf   :  { %5320 = vmatprep.subr.bf16.mxu1 %v5911_v44 }
  0xc0   :  { %5113 = vmatmul.mubr.bf16.gmra.mrb[4].mxu0 %v5908_v42  ;;  %v5972_v42 = vld [vmem:[#allocation2 + $0x78] sm:$0xff]  }
  0xc1   :  { %5305 = vmatmul.mubr.bf16.gmra.mrb[20].mxu1 %v5910_v45  ;;  %5129 = vmatpush3.bf16.msra.mxu0 %v5909_v43  ;;  %v5975_v43 = vld [vmem:[#allocation5 + $0x160] sm:$0xff]   ;;  %v6314_v45 = vld [vmem:[#allocation2 + $0x1d8] sm:$0xff]  }
  0xc2   :  { %5321 = vmatpush3.bf16.msra.mxu1 %v5911_v44  ;;  %5130 = vmatprep.subr.bf16.mxu0 %v5912_v46  ;;  %v5974_v44 = vld [vmem:[#allocation5 + $0x120] sm:$0xff]  }
  0xc3   :  { %5322 = vmatprep.subr.bf16.mxu1 %v5913_v47  ;;  %5116 = vmatprep.mubr.bf16.mxu0 %v5914_v48  ;;  %v5978_v48 = vld [vmem:[#allocation2 + $0x80] sm:$0xff]  }
  0xc4   :  { %5308 = vmatprep.mubr.bf16.mxu1 %v5915_v49  ;;  %v6316_v49 = vld [vmem:[#allocation2 + $0x1e0] sm:$0xff]  }
  0xc5   :  { %5131 = vmatpush3.bf16.msra.mxu0 %v5912_v46  ;;  %v5976_v46 = vld [vmem:[#allocation5 + $0x128] sm:$0xff]  }
  0xc6   :  { %5323 = vmatpush3.bf16.msra.mxu1 %v5913_v47  ;;  %5132 = vmatprep.subr.bf16.mxu0 %v5917_v51  ;;  %v5977_v47 = vld [vmem:[#allocation5 + $0x168] sm:$0xff]  }
  0xc7   :  { %5324 = vmatprep.subr.bf16.mxu1 %v5919_v52 }
  0xc8   :  { %5117 = vmatmul.mubr.bf16.gmra.mrb[8].mxu0 %v5916_v50  ;;  %v5980_v50 = vld [vmem:[#allocation2 + $0x88] sm:$0xff]  }
  0xc9   :  { %5309 = vmatmul.mubr.bf16.gmra.mrb[24].mxu1 %v5918_v53  ;;  %5133 = vmatpush3.bf16.msra.mxu0 %v5917_v51  ;;  %v5983_v51 = vld [vmem:[#allocation5 + $0x170] sm:$0xff]   ;;  %v6320_v53 = vld [vmem:[#allocation2 + $0x1e8] sm:$0xff]  }
  0xca   :  { %5325 = vmatpush3.bf16.msra.mxu1 %v5919_v52  ;;  %5134 = vmatprep.subr.bf16.mxu0 %v5920_v54  ;;  %v5982_v52 = vld [vmem:[#allocation5 + $0x130] sm:$0xff]  }
  0xcb   :  { %5326 = vmatprep.subr.bf16.mxu1 %v5921_v55  ;;  %5120 = vmatprep.mubr.bf16.mxu0 %v5922_v56  ;;  %v5986_v56 = vld [vmem:[#allocation2 + $0x1f8] sm:$0xff]  }
  0xcc   :  { %5312 = vmatprep.mubr.bf16.mxu1 %v5923_v57  ;;  %v5989_v57 = vld [vmem:[#allocation5 + $0x80] sm:$0xff]  }
  0xcd   :  { %5135 = vmatpush3.bf16.msra.mxu0 %v5920_v54  ;;  %v5984_v54 = vld [vmem:[#allocation5 + $0x138] sm:$0xff]  }
  0xce   :  { %5327 = vmatpush3.bf16.msra.mxu1 %v5921_v55  ;;  %5136 = vmatprep.subr.bf16.mxu0 %v5925_v58  ;;  %v5985_v55 = vld [vmem:[#allocation5 + $0x178] sm:$0xff]  }
  0xcf   :  { %5328 = vmatprep.subr.bf16.mxu1 %v5927_v59 }
  0xd0   :  { %5121 = vmatmul.mubr.bf16.gmra.mrb[12].mxu0 %v5924_v60  ;;  %v5990_v60 = vld [vmem:[#allocation5 + $0x188] sm:$0xff]  }
  0xd1   :  { %5313 = vmatmul.mubr.bf16.gmra.mrb[28].mxu1 %v5926_v61  ;;  %5137 = vmatpush3.bf16.msra.mxu0 %v5925_v58  ;;  %v5988_v58 = vld [vmem:[#allocation5 + $0x180] sm:$0xff]   ;;  %v5991_v61 = vld [vmem:[#allocation5 + $0x88] sm:$0xff]  }
  0xd2   :  { %5329 = vmatpush3.bf16.msra.mxu1 %v5927_v59  ;;  %5138 = vmatprep.subr.bf16.mxu0 %v5928_v62  ;;  %v5987_v59 = vld [vmem:[#allocation2 + $0x200] sm:$0xff]  }
  0xd3   :  { %5330 = vmatprep.subr.bf16.mxu1 %v5929_v63  ;;  %5140 = vmatprep.mubr.bf16.mxu0 %v6235_v8  ;;  %v5939_v8 = vld [vmem:[#allocation5 + $0xd0] sm:$0xff]  }
  0xd4   :  { %5332 = vmatprep.mubr.bf16.mxu1 %v6267_v0 }
  0xd5   :  { %5139 = vmatpush3.bf16.msra.mxu0 %v5928_v62  ;;  %v5992_v62 = vld [vmem:[#allocation2 + $0x208] sm:$0xff]  }
  0xd6   :  { %5331 = vmatpush3.bf16.msra.mxu1 %v5929_v63  ;;  %5156 = vmatprep.subr.bf16.mxu0 %v5931_v1  ;;  %v5995_v63 = vld [vmem:[#allocation5 + $0x90] sm:$0xff]  }
  0xd7   :  { %5348 = vmatprep.subr.bf16.mxu1 %v5933_v2 }
  0xd8   :  { %5141 = vmatmul.mubr.bf16.vlgmr.msra.gmra.mrb[0].mxu0 %v6239_v11  ;;  %v5941_v11 = vld [vmem:[#allocation5 + $0xd8] sm:$0xff]  }
  0xd9   :  { %5333 = vmatmul.mubr.bf16.vlgmr.msra.gmra.mrb[16].mxu1 %v6271_v3  ;;  %5157 = vmatpush3.bf16.msra.mxu0 %v5931_v1  ;;  %v5994_v1 = vld [vmem:[#allocation5 + $0x190] sm:$0xff]  }
  0xda   :  { %5349 = vmatpush3.bf16.msra.mxu1 %v5933_v2  ;;  %5158 = vmatprep.subr.bf16.mxu0 %v5934_v4  ;;  %v5993_v2 = vld [vmem:[#allocation2 + $0x210] sm:$0xff]  }
  0xdb   :  { %5350 = vmatprep.subr.bf16.mxu1 %v5935_v5  ;;  %5144 = vmatprep.mubr.bf16.mxu0 %v6242_v15  ;;  %v5945_v15 = vld [vmem:[#allocation5 + $0xe0] sm:$0xff]  }
  0xdc   :  { %5336 = vmatprep.mubr.bf16.mxu1 %v6274_v6 }
  0xdd   :  { %5159 = vmatpush3.bf16.msra.mxu0 %v5934_v4  ;;  %v5996_v4 = vld [vmem:[#allocation5 + $0x198] sm:$0xff]  }
  0xde   :  { %5351 = vmatpush3.bf16.msra.mxu1 %v5935_v5  ;;  %5160 = vmatprep.subr.bf16.mxu0 %v5937_v7  ;;  %v5997_v5 = vld [vmem:[#allocation5 + $0x98] sm:$0xff]  }
  0xdf   :  { %5352 = vmatprep.subr.bf16.mxu1 %v5939_v8 }
  0xe0   :  { %5145 = vmatmul.mubr.bf16.gmra.mrb[4].mxu0 %v6247_v17  ;;  %v5947_v17 = vld [vmem:[#allocation5 + $0xe8] sm:$0xff]  }
  0xe1   :  { %5337 = vmatmul.mubr.bf16.gmra.mrb[20].mxu1 %v6279_v9  ;;  %5161 = vmatpush3.bf16.msra.mxu0 %v5937_v7  ;;  %v5998_v7 = vld [vmem:[#allocation2 + $0x218] sm:$0xff]  }
  0xe2   :  { %5353 = vmatpush3.bf16.msra.mxu1 %v5939_v8  ;;  %5162 = vmatprep.subr.bf16.mxu0 %v5940_v10  ;;  %v6001_v8 = vld [vmem:[#allocation5 + $0xa0] sm:$0xff]  }
  0xe3   :  { %5354 = vmatprep.subr.bf16.mxu1 %v5941_v11  ;;  %5148 = vmatprep.mubr.bf16.mxu0 %v6250_v20  ;;  %v5951_v20 = vld [vmem:[#allocation5 + $0xf0] sm:$0xff]  }
  0xe4   :  { %5340 = vmatprep.mubr.bf16.mxu1 %v6282_v12 }
  0xe5   :  { %5163 = vmatpush3.bf16.msra.mxu0 %v5940_v10  ;;  %v6000_v10 = vld [vmem:[#allocation5 + $0x1a0] sm:$0xff]  }
  0xe6   :  { %5355 = vmatpush3.bf16.msra.mxu1 %v5941_v11  ;;  %5164 = vmatprep.subr.bf16.mxu0 %v5943_v14  ;;  %v5999_v11 = vld [vmem:[#allocation2 + $0x220] sm:$0xff]  }
  0xe7   :  { %5356 = vmatprep.subr.bf16.mxu1 %v5945_v15 }
  0xe8   :  { %5149 = vmatmul.mubr.bf16.gmra.mrb[8].mxu0 %v6255_v23  ;;  %v5953_v23 = vld [vmem:[#allocation5 + $0xf8] sm:$0xff]  }
  0xe9   :  { %5341 = vmatmul.mubr.bf16.gmra.mrb[24].mxu1 %v6287_v13  ;;  %5165 = vmatpush3.bf16.msra.mxu0 %v5943_v14  ;;  %v6003_v14 = vld [vmem:[#allocation5 + $0xa8] sm:$0xff]  }
  0xea   :  { %5357 = vmatpush3.bf16.msra.mxu1 %v5945_v15  ;;  %5166 = vmatprep.subr.bf16.mxu0 %v5946_v16  ;;  %v6002_v15 = vld [vmem:[#allocation5 + $0x1a8] sm:$0xff]  }
  0xeb   :  { %5358 = vmatprep.subr.bf16.mxu1 %v5947_v17  ;;  %5152 = vmatprep.mubr.bf16.mxu0 %v6258_v26  ;;  %v5956_v26 = vld [vmem:[#allocation2 + $0x58] sm:$0xff]  }
  0xec   :  { %5344 = vmatprep.mubr.bf16.mxu1 %v6290_v18 }
  0xed   :  { %5167 = vmatpush3.bf16.msra.mxu0 %v5946_v16  ;;  %v6004_v16 = vld [vmem:[#allocation2 + $0x228] sm:$0xff]  }
  0xee   :  { %5359 = vmatpush3.bf16.msra.mxu1 %v5947_v17  ;;  %5168 = vmatprep.subr.bf16.mxu0 %v5949_v19  ;;  %v6007_v17 = vld [vmem:[#allocation5 + $0xb0] sm:$0xff]  }
  0xef   :  { %5360 = vmatprep.subr.bf16.mxu1 %v5951_v20 }
  0xf0   :  { %5153 = vmatmul.mubr.bf16.gmra.mrb[12].mxu0 %v6263_v29  ;;  %v5961_v29 = vld [vmem:[#allocation5 + $0x148] sm:$0xff]  }
  0xf1   :  { %5345 = vmatmul.mubr.bf16.gmra.mrb[28].mxu1 %v6295_v21  ;;  %5169 = vmatpush3.bf16.msra.mxu0 %v5949_v19  ;;  %v6006_v19 = vld [vmem:[#allocation5 + $0x1b0] sm:$0xff]  }
  0xf2   :  { %5361 = vmatpush3.bf16.msra.mxu1 %v5951_v20  ;;  %5170 = vmatprep.subr.bf16.mxu0 %v5952_v22  ;;  %v6005_v20 = vld [vmem:[#allocation2 + $0x230] sm:$0xff]  }
  0xf3   :  { %5362 = vmatprep.subr.bf16.mxu1 %v5953_v23  ;;  %5172 = vmatprep.mubr.bf16.mxu0 %v5954_v24  ;;  %v6330_v24 = vld [vmem:[#allocation2 + $0x128] sm:$0xff]  }
  0xf4   :  { %5364 = vmatprep.mubr.bf16.mxu1 %v6298_v25 }
  0xf5   :  { %5171 = vmatpush3.bf16.msra.mxu0 %v5952_v22  ;;  %v6009_v22 = vld [vmem:[#allocation5 + $0xb8] sm:$0xff]  }
  0xf6   :  { %5363 = vmatpush3.bf16.msra.mxu1 %v5953_v23  ;;  %5476 = vmatprep.subr.bf16.mxu0 %v5959_v27  ;;  %v6008_v23 = vld [vmem:[#allocation5 + $0x1b8] sm:$0xff]  }
  0xf7   :  { %5380 = vmatprep.subr.bf16.mxu1 %v5958_v28 }
  0xf8   :  { %5173 = vmatmul.mubr.bf16.vlgmr.msra.gmra.mrb[0].mxu0 %v5956_v26  ;;  %v6012_v26 = vld [vmem:[#allocation5 + $0x1c0] sm:$0xff]  }
  0xf9   :  { %5365 = vmatmul.mubr.bf16.vlgmr.msra.gmra.mrb[16].mxu1 %v6302_v30  ;;  %5477 = vmatpush3.bf16.msra.mxu0 %v5959_v27  ;;  %v6335_v27 = vld [vmem:[#allocation2 + $0x130] sm:$0xff]  }
  0xfa   :  { %5381 = vmatpush3.bf16.msra.mxu1 %v5958_v28  ;;  %5478 = vmatprep.subr.bf16.mxu0 %v5961_v29  ;;  %v6015_v28 = vld [vmem:[#allocation5 + $0x208] sm:$0xff]  }
  0xfb   :  { %5382 = vmatprep.subr.bf16.mxu1 %v5960_v31  ;;  %5176 = vmatprep.mubr.bf16.mxu0 %v5962_v32  ;;  %v6017_v32 = vld [vmem:[#allocation2 + $0x140] sm:$0xff]  }
  0xfc   :  { %5368 = vmatprep.mubr.bf16.mxu1 %v6304_v33 }
  0xfd   :  { %5479 = vmatpush3.bf16.msra.mxu0 %v5961_v29  ;;  %v6019_v29 = vld [vmem:[#allocation5 + $0x210] sm:$0xff]  }
  0xfe   :  { %5383 = vmatpush3.bf16.msra.mxu1 %v5960_v31  ;;  %5480 = vmatprep.subr.bf16.mxu0 %v5967_v35  ;;  %v6337_v31 = vld [vmem:[#allocation2 + $0x138] sm:$0xff]  }
  0xff   :  { %5384 = vmatprep.subr.bf16.mxu1 %v5966_v36 }
 0x100   :  { %5177 = vmatmul.mubr.bf16.gmra.mrb[4].mxu0 %v5964_v34  ;;  %v6020_v34 = vld [vmem:[#allocation5 + $0x1d8] sm:$0xff]  }
 0x101   :  { %5369 = vmatmul.mubr.bf16.gmra.mrb[20].mxu1 %v6308_v37  ;;  %5481 = vmatpush3.bf16.msra.mxu0 %v5967_v35  ;;  %v6025_v35 = vld [vmem:[#allocation5 + $0x220] sm:$0xff]  }
 0x102   :  { %5385 = vmatpush3.bf16.msra.mxu1 %v5966_v36  ;;  %5482 = vmatprep.subr.bf16.mxu0 %v5969_v39  ;;  %v6024_v36 = vld [vmem:[#allocation5 + $0x1e0] sm:$0xff]  }
 0x103   :  { %5386 = vmatprep.subr.bf16.mxu1 %v5968_v38  ;;  %5180 = vmatprep.mubr.bf16.mxu0 %v5970_v40  ;;  %v6030_v40 = vld [vmem:[#allocation5 + $0x1f0] sm:$0xff]  }
 0x104   :  { %5372 = vmatprep.mubr.bf16.mxu1 %v6310_v41 }
 0x105   :  { %5483 = vmatpush3.bf16.msra.mxu0 %v5969_v39  ;;  %v6028_v39 = vld [vmem:[#allocation2 + $0x158] sm:$0xff]  }
 0x106   :  { %5387 = vmatpush3.bf16.msra.mxu1 %v5968_v38  ;;  %5484 = vmatprep.subr.bf16.mxu0 %v5975_v43  ;;  %v6026_v38 = vld [vmem:[#allocation5 + $0x1e8] sm:$0xff]  }
 0x107   :  { %5388 = vmatprep.subr.bf16.mxu1 %v5974_v44 }
 0x108   :  { %5181 = vmatmul.mubr.bf16.gmra.mrb[8].mxu0 %v5972_v42  ;;  %v6032_v42 = vld [vmem:[#allocation5 + $0x1f8] sm:$0xff]  }
 0x109   :  { %5373 = vmatmul.mubr.bf16.gmra.mrb[24].mxu1 %v6314_v45  ;;  %5485 = vmatpush3.bf16.msra.mxu0 %v5975_v43  ;;  %v6034_v43 = vld [vmem:[#allocation2 + $0x170] sm:$0xff]  }
 0x10a   :  { %5389 = vmatpush3.bf16.msra.mxu1 %v5974_v44  ;;  %5486 = vmatprep.subr.bf16.mxu0 %v5977_v47  ;;  %v6037_v44 = vld [vmem:[#allocation2 + $0x188] sm:$0xff]  }
 0x10b   :  { %5390 = vmatprep.subr.bf16.mxu1 %v5976_v46  ;;  %5184 = vmatprep.mubr.bf16.mxu0 %v5978_v48 }
 0x10c   :  { %5376 = vmatprep.mubr.bf16.mxu1 %v6316_v49 }
 0x10d   :  { %5487 = vmatpush3.bf16.msra.mxu0 %v5977_v47 }
 0x10e   :  { %5391 = vmatpush3.bf16.msra.mxu1 %v5976_v46  ;;  %5488 = vmatprep.subr.bf16.mxu0 %v5983_v51  ;;  %v6040_v46 = vld [vmem:[#allocation2 + $0x1a0] sm:$0xff]  }
 0x10f   :  { %5392 = vmatprep.subr.bf16.mxu1 %v5982_v52 }
 0x110   :  { %5185 = vmatmul.mubr.bf16.gmra.mrb[12].mxu0 %v5980_v50 }
 0x111   :  { %5377 = vmatmul.mubr.bf16.gmra.mrb[28].mxu1 %v6320_v53  ;;  %5489 = vmatpush3.bf16.msra.mxu0 %v5983_v51 }
 0x112   :  { %5393 = vmatpush3.bf16.msra.mxu1 %v5982_v52  ;;  %5490 = vmatprep.subr.bf16.mxu0 %v5985_v55 }
 0x113   :  { %5394 = vmatprep.subr.bf16.mxu1 %v5984_v54  ;;  %5396 = vmatprep.mubr.bf16.mxu1 %v5986_v56 }
 0x114   :  { %5492 = vmatprep.mubr.bf16.mxu0 %v6298_v25  ;;  %v6013_v25 = vld [vmem:[#allocation5 + $0x200] sm:$0xff]  }
 0x115   :  { %5491 = vmatpush3.bf16.msra.mxu0 %v5985_v55 }
 0x116   :  { %5395 = vmatpush3.bf16.msra.mxu1 %v5984_v54  ;;  %5508 = vmatprep.subr.bf16.mxu0 %v5989_v57 }
 0x117   :  { %5412 = vmatprep.subr.bf16.mxu1 %v5988_v58 }
 0x118   :  { %5493 = vmatmul.mubr.bf16.vlgmr.msra.gmra.mrb[16].mxu0 %v6302_v30  ;;  %v6014_v30 = vld [vmem:[#allocation5 + $0x1c8] sm:$0xff]  }
 0x119   :  { %5397 = vmatmul.mubr.bf16.vlgmr.msra.gmra.mrb[16].mxu1 %v5987_v59  ;;  %5509 = vmatpush3.bf16.msra.mxu0 %v5989_v57 }
 0x11a   :  { %5413 = vmatpush3.bf16.msra.mxu1 %v5988_v58  ;;  %5510 = vmatprep.subr.bf16.mxu0 %v5991_v61 }
 0x11b   :  { %5414 = vmatprep.subr.bf16.mxu1 %v5990_v60  ;;  %5400 = vmatprep.mubr.bf16.mxu1 %v5992_v62 }
 0x11c   :  { %5496 = vmatprep.mubr.bf16.mxu0 %v6304_v33  ;;  %v6021_v33 = vld [vmem:[#allocation5 + $0x218] sm:$0xff]  }
 0x11d   :  { %5511 = vmatpush3.bf16.msra.mxu0 %v5991_v61 }
 0x11e   :  { %5415 = vmatpush3.bf16.msra.mxu1 %v5990_v60  ;;  %5512 = vmatprep.subr.bf16.mxu0 %v5995_v63 }
 0x11f   :  { %5416 = vmatprep.subr.bf16.mxu1 %v5994_v1 }
 0x120   :  { %5497 = vmatmul.mubr.bf16.gmra.mrb[20].mxu0 %v6308_v37  ;;  %v6027_v37 = vld [vmem:[#allocation5 + $0x228] sm:$0xff]  }
 0x121   :  { %5401 = vmatmul.mubr.bf16.gmra.mrb[20].mxu1 %v5993_v2  ;;  %5513 = vmatpush3.bf16.msra.mxu0 %v5995_v63 }
 0x122   :  { %5417 = vmatpush3.bf16.msra.mxu1 %v5994_v1  ;;  %5514 = vmatprep.subr.bf16.mxu0 %v5997_v5 }
 0x123   :  { %5418 = vmatprep.subr.bf16.mxu1 %v5996_v4  ;;  %5404 = vmatprep.mubr.bf16.mxu1 %v5998_v7 }
 0x124   :  { %5500 = vmatprep.mubr.bf16.mxu0 %v6310_v41  ;;  %v6033_v41 = vld [vmem:[#allocation5 + $0x238] sm:$0xff]  }
 0x125   :  { %5515 = vmatpush3.bf16.msra.mxu0 %v5997_v5 }
 0x126   :  { %5419 = vmatpush3.bf16.msra.mxu1 %v5996_v4  ;;  %5516 = vmatprep.subr.bf16.mxu0 %v6001_v8 }
 0x127   :  { %5420 = vmatprep.subr.bf16.mxu1 %v6000_v10 }
 0x128   :  { %5501 = vmatmul.mubr.bf16.gmra.mrb[24].mxu0 %v6314_v45  ;;  %v6039_v45 = vld [vmem:[#allocation2 + $0x198] sm:$0xff]  }
 0x129   :  { %5405 = vmatmul.mubr.bf16.gmra.mrb[24].mxu1 %v5999_v11  ;;  %5517 = vmatpush3.bf16.msra.mxu0 %v6001_v8 }
 0x12a   :  { %5421 = vmatpush3.bf16.msra.mxu1 %v6000_v10  ;;  %5518 = vmatprep.subr.bf16.mxu0 %v6003_v14 }
 0x12b   :  { %5422 = vmatprep.subr.bf16.mxu1 %v6002_v15  ;;  %5408 = vmatprep.mubr.bf16.mxu1 %v6004_v16 }
 0x12c   :  { %5504 = vmatprep.mubr.bf16.mxu0 %v6316_v49  ;;  %v6041_v49 = vld [vmem:[#allocation2 + $0x1a8] sm:$0xff]  }
 0x12d   :  { %5519 = vmatpush3.bf16.msra.mxu0 %v6003_v14 }
 0x12e   :  { %5423 = vmatpush3.bf16.msra.mxu1 %v6002_v15  ;;  %5520 = vmatprep.subr.bf16.mxu0 %v6007_v17 }
 0x12f   :  { %5424 = vmatprep.subr.bf16.mxu1 %v6006_v19 }
 0x130   :  { %5505 = vmatmul.mubr.bf16.gmra.mrb[28].mxu0 %v6320_v53 }
 0x131   :  { %5409 = vmatmul.mubr.bf16.gmra.mrb[28].mxu1 %v6005_v20  ;;  %5521 = vmatpush3.bf16.msra.mxu0 %v6007_v17 }
 0x132   :  { %5425 = vmatpush3.bf16.msra.mxu1 %v6006_v19  ;;  %5522 = vmatprep.subr.bf16.mxu0 %v6009_v22 }
 0x133   :  { %5426 = vmatprep.subr.bf16.mxu1 %v6008_v23  ;;  %5428 = vmatprep.mubr.bf16.mxu1 %v6330_v24 }
 0x134   :  { %5524 = vmatprep.mubr.bf16.mxu0 %v6267_v0  ;;  %v6018_v0 = vld [vmem:[#allocation5 + $0x1d0] sm:$0xff]  }
 0x135   :  { %5523 = vmatpush3.bf16.msra.mxu0 %v6009_v22 }
 0x136   :  { %5427 = vmatpush3.bf16.msra.mxu1 %v6008_v23  ;;  %5540 = vmatprep.subr.bf16.mxu0 %v6013_v25 }
 0x137   :  { %5444 = vmatprep.subr.bf16.mxu1 %v6012_v26 }
 0x138   :  { %5525 = vmatmul.mubr.bf16.vlgmr.msra.gmra.mrb[16].mxu0 %v6271_v3  ;;  %v6022_v3 = vld [vmem:[#allocation2 + $0x148] sm:$0xff]  }
 0x139   :  { %5429 = vmatmul.mubr.bf16.vlgmr.msra.gmra.mrb[16].mxu1 %v6335_v27  ;;  %5541 = vmatpush3.bf16.msra.mxu0 %v6013_v25 }
 0x13a   :  { %5445 = vmatpush3.bf16.msra.mxu1 %v6012_v26  ;;  %5542 = vmatprep.subr.bf16.mxu0 %v6015_v28 }
 0x13b   :  { %5446 = vmatprep.subr.bf16.mxu1 %v6014_v30  ;;  %5432 = vmatprep.mubr.bf16.mxu1 %v6337_v31 }
 0x13c   :  { %5528 = vmatprep.mubr.bf16.mxu0 %v6274_v6  ;;  %v6023_v6 = vld [vmem:[#allocation2 + $0x150] sm:$0xff]  }
 0x13d   :  { %5543 = vmatpush3.bf16.msra.mxu0 %v6015_v28 }
 0x13e   :  { %5447 = vmatpush3.bf16.msra.mxu1 %v6014_v30  ;;  %5544 = vmatprep.subr.bf16.mxu0 %v6019_v29 }
 0x13f   :  { %5448 = vmatprep.subr.bf16.mxu1 %v6018_v0 }
 0x140   :  { %5529 = vmatmul.mubr.bf16.gmra.mrb[20].mxu0 %v6279_v9  ;;  %v6031_v9 = vld [vmem:[#allocation5 + $0x230] sm:$0xff]  }
 0x141   :  { %5433 = vmatmul.mubr.bf16.gmra.mrb[20].mxu1 %v6017_v32  ;;  %5545 = vmatpush3.bf16.msra.mxu0 %v6019_v29 }
 0x142   :  { %5449 = vmatpush3.bf16.msra.mxu1 %v6018_v0  ;;  %5546 = vmatprep.subr.bf16.mxu0 %v6021_v33 }
 0x143   :  { %5450 = vmatprep.subr.bf16.mxu1 %v6020_v34  ;;  %5436 = vmatprep.mubr.bf16.mxu1 %v6022_v3 }
 0x144   :  { %5532 = vmatprep.mubr.bf16.mxu0 %v6282_v12  ;;  %v6029_v12 = vld [vmem:[#allocation2 + $0x160] sm:$0xff]  }
 0x145   :  { %5547 = vmatpush3.bf16.msra.mxu0 %v6021_v33 }
 0x146   :  { %5451 = vmatpush3.bf16.msra.mxu1 %v6020_v34  ;;  %5548 = vmatprep.subr.bf16.mxu0 %v6025_v35 }
 0x147   :  { %5452 = vmatprep.subr.bf16.mxu1 %v6024_v36 }
 0x148   :  { %5533 = vmatmul.mubr.bf16.gmra.mrb[24].mxu0 %v6287_v13  ;;  %v6035_v13 = vld [vmem:[#allocation2 + $0x178] sm:$0xff]  }
 0x149   :  { %5437 = vmatmul.mubr.bf16.gmra.mrb[24].mxu1 %v6023_v6  ;;  %5549 = vmatpush3.bf16.msra.mxu0 %v6025_v35 }
 0x14a   :  { %5453 = vmatpush3.bf16.msra.mxu1 %v6024_v36  ;;  %5550 = vmatprep.subr.bf16.mxu0 %v6027_v37 }
 0x14b   :  { %5454 = vmatprep.subr.bf16.mxu1 %v6026_v38  ;;  %5440 = vmatprep.mubr.bf16.mxu1 %v6028_v39 }
 0x14c   :  { %5536 = vmatprep.mubr.bf16.mxu0 %v6290_v18  ;;  %v6036_v18 = vld [vmem:[#allocation2 + $0x180] sm:$0xff]  }
 0x14d   :  { %5551 = vmatpush3.bf16.msra.mxu0 %v6027_v37  ;;  %v6377_v37 = vld [vmem:[#allocation7] ss:$0 sm:$0xff] }
 0x14e   :  { %5455 = vmatpush3.bf16.msra.mxu1 %v6026_v38  ;;  %5552 = vmatprep.subr.bf16.mxu0 %v6031_v9 }
 0x14f   :  { %5456 = vmatprep.subr.bf16.mxu1 %v6030_v40 }
 0x150   :  { %5537 = vmatmul.mubr.bf16.gmra.mrb[28].mxu0 %v6295_v21  ;;  %v6038_v21 = vld [vmem:[#allocation2 + $0x190] sm:$0xff]  }
 0x151   :  { %5441 = vmatmul.mubr.bf16.gmra.mrb[28].mxu1 %v6029_v12  ;;  %5553 = vmatpush3.bf16.msra.mxu0 %v6031_v9 }
 0x152   :  { %5457 = vmatpush3.bf16.msra.mxu1 %v6030_v40  ;;  %5554 = vmatprep.subr.bf16.mxu0 %v6033_v41 }
 0x153   :  { %5458 = vmatprep.subr.bf16.mxu1 %v6032_v42  ;;  %5460 = vmatprep.mubr.bf16.mxu1 %v6034_v43 }
 0x154   :  { %5556 = vmatprep.mubr.bf16.mxu0 %v6330_v24 }
 0x155   :  { %5555 = vmatpush3.bf16.msra.mxu0 %v6033_v41 }
 0x156   :  { %5459 = vmatpush3.bf16.msra.mxu1 %v6032_v42 }
 0x158   :  { %5557 = vmatmul.mubr.bf16.vlgmr.msra.gmra.mrb[16].mxu0 %v6335_v27 }
 0x159   :  { %5461 = vmatmul.mubr.bf16.vlgmr.msra.gmra.mrb[16].mxu1 %v6035_v13  ;;  %5560 = vmatprep.mubr.bf16.mxu0 %v6337_v31 }
 0x15a   :  { %5464 = vmatprep.mubr.bf16.mxu1 %v6036_v18 }
 0x160   :  { %5561 = vmatmul.mubr.bf16.gmra.mrb[20].mxu0 %v6017_v32 }
 0x161   :  { %5465 = vmatmul.mubr.bf16.gmra.mrb[20].mxu1 %v6037_v44  ;;  %5564 = vmatprep.mubr.bf16.mxu0 %v6022_v3 }
 0x162   :  { %5468 = vmatprep.mubr.bf16.mxu1 %v6038_v21 }
 0x168   :  { %5565 = vmatmul.mubr.bf16.gmra.mrb[24].mxu0 %v6023_v6 }
 0x169   :  { %5469 = vmatmul.mubr.bf16.gmra.mrb[24].mxu1 %v6039_v45  ;;  %5568 = vmatprep.mubr.bf16.mxu0 %v6028_v39 }
 0x16a   :  { %5472 = vmatprep.mubr.bf16.mxu1 %v6040_v46 }
 0x16c   :  { %v5270_v47 = vpop.f32.mrb[0].mxu1 }
 0x16d   :  { %v1901_v48 = vpop.f32.mrb[1].mxu1  ;;  %v2000_v51 = vrot.slane %v5270_v47, 1 }
 0x16e   :  { %v5271_v50 = vpop.f32.mrb[2].mxu1  ;;  %v1997_v54 = vrot.slane %v1901_v48, 1 }
 0x16f   :  { %v2002_v52 = vrot.slane %v5271_v50, 1  ;;  %v1904_v53 = vpop.f32.mrb[3].mxu1 }
 0x170   :  { %v1998_v55 = vrot.slane %v1904_v53, 1  ;;  %5569 = vmatmul.mubr.bf16.gmra.mrb[28].mxu0 %v6029_v12 }
 0x171   :  { %5473 = vmatmul.mubr.bf16.gmra.mrb[28].mxu1 %v6041_v49  ;;  %v2003_v56 = vsel %vm1996_vm0, %v2000_v51, %v2002_v52 }
 0x172   :  { %v1999_v57 = vsel %vm1996_vm0, %v1997_v54, %v1998_v55  ;;  %v2001_v58 = vsel %vm1996_vm0, %v1998_v55, %v2000_v51 }
 0x174   :  { %v5274_v59 = vpop.f32.mrb[4].mxu1 }
 0x175   :  { %v1917_v60 = vpop.f32.mrb[5].mxu1  ;;  %v2008_v63 = vrot.slane %v5274_v59, 1 }
 0x176   :  { %v2004_v61 = vrot.slane %v1917_v60, 1  ;;  %v5275_v62 = vpop.f32.mrb[6].mxu1 }
 0x177   :  { %v2010_v1 = vrot.slane %v5275_v62, 1  ;;  %v1920_v2 = vpop.f32.mrb[7].mxu1 }
 0x178   :  { %v2006_v4 = vrot.slane %v1920_v2, 1  ;;  %v2005_v5 = vsel %vm1996_vm0, %v2002_v52, %v2004_v61 }
 0x179   :  { %v2011_v7 = vsel %vm1996_vm0, %v2008_v63, %v2010_v1 }
 0x17a   :  { %v2007_v8 = vsel %vm1996_vm0, %v2004_v61, %v2006_v4  ;;  %v2009_v10 = vsel %vm1996_vm0, %v2006_v4, %v2008_v63 }
 0x17c   :  { %v5278_v11 = vpop.f32.mrb[8].mxu1 }
 0x17d   :  { %v1933_v14 = vpop.f32.mrb[9].mxu1  ;;  %v2016_v17 = vrot.slane %v5278_v11, 1 }
 0x17e   :  { %v2012_v15 = vrot.slane %v1933_v14, 1  ;;  %v5279_v16 = vpop.f32.mrb[10].mxu1 }
 0x17f   :  { %v2018_v19 = vrot.slane %v5279_v16, 1  ;;  %v1936_v20 = vpop.f32.mrb[11].mxu1 }
 0x180   :  { %v2014_v22 = vrot.slane %v1936_v20, 1  ;;  %v2013_v23 = vsel %vm1996_vm0, %v2010_v1, %v2012_v15 }
 0x181   :  { %v2019_v24 = vsel %vm1996_vm0, %v2016_v17, %v2018_v19 }
 0x182   :  { %v2015_v25 = vsel %vm1996_vm0, %v2012_v15, %v2014_v22  ;;  %v6362_v26 = vsel %vm1996_vm0, %v2014_v22, %v2016_v17 }
 0x184   :  { %v5282_v27 = vpop.f32.mrb[12].mxu1 }
 0x185   :  { %v1949_v28 = vpop.f32.mrb[13].mxu1  ;;  %v2024_v29 = vrot.slane %v5282_v27, 1 }
 0x186   :  { %v2020_v30 = vrot.slane %v1949_v28, 1  ;;  %v5283_v31 = vpop.f32.mrb[14].mxu1 }
 0x187   :  { %v2026_v0 = vrot.slane %v5283_v31, 1  ;;  %v1952_v32 = vpop.f32.mrb[15].mxu1 }
 0x188   :  { %v2022_v33 = vrot.slane %v1952_v32, 1  ;;  %v2021_v34 = vsel %vm1996_vm0, %v2018_v19, %v2020_v30 }
 0x189   :  { %v6366_v3 = vsel %vm1996_vm0, %v2024_v29, %v2026_v0  ;;  %v6369_v35 = vsel %vm1996_vm0, %v2026_v0, %v1997_v54 }
 0x18a   :  { %v6372_v36 = vsel %vm1996_vm0, %v2020_v30, %v2022_v33  ;;  %v6375_v6 = vsel %vm1996_vm0, %v2022_v33, %v2024_v29 }
 0x1cb   :  { %v5174_v38 = vpop.f32.mrb[0].mxu0 }
 0x1cc   :  { %v2048_v39 = vadd.f32 %v5174_v38, %v2003_v56  ;;  %v1399_v9 = vpop.f32.mrb[1].mxu0 }
 0x1cd   :  { %v2046_v40 = vadd.f32 %v1999_v57, %v1399_v9  ;;  %v5175_v12 = vpop.f32.mrb[2].mxu0 }
 0x1ce   :  { %v2070_v41 = vadd.f32 %v6377_v37, %v2048_v39  ;;  %v2049_v42 = vadd.f32 %v5175_v12, %v2005_v5  ;;  %v1402_v43 = vpop.f32.mrb[3].mxu0 }
 0x1cf   :  { %v2068_v13 = vadd.f32 %v6377_v37, %v2046_v40  ;;  %v2047_v18 = vadd.f32 %v2001_v58, %v1402_v43 }
 0x1d0   :  { %v2071_v44 = vadd.f32 %v6377_v37, %v2049_v42  ;;  %v2086_v45 = vmax.f32 %v2070_v41, 0.0 }
 0x1d1   :  { %v2069_v21 = vadd.f32 %v6377_v37, %v2047_v18  ;;  %v2084_v47 = vmax.f32 %v2068_v13, 0.0 }
 0x1d2   :  { %v2087_v46 = vmax.f32 %v2071_v44, 0.0 }
 0x1d3   :  { %v2085_v48 = vmax.f32 %v2069_v21, 0.0  ;;  %v5178_v49 = vpop.f32.mrb[4].mxu0 }
 0x1d4   :  { %v4622_v50 = vpack.c.bf16 %v2087_v46, %v2086_v45  ;;  %v2052_v51 = vadd.f32 %v5178_v49, %v2011_v7  ;;  %v1415_v52 = vpop.f32.mrb[5].mxu0 }
 0x1d5   :  { %v4617_v53 = vpack.c.bf16 %v2085_v48, %v2084_v47  ;;  %v2050_v54 = vadd.f32 %v2007_v8, %v1415_v52  ;;  %v5179_v55 = vpop.f32.mrb[6].mxu0 }
 0x1d6   :  { %4694 = vst [vmem:[#allocation8 + $0x8] sm:$0xff] %v4622_v50   ;;  %v2074_v56 = vadd.f32 %v6377_v37, %v2052_v51  ;;  %v2053_v57 = vadd.f32 %v5179_v55, %v2013_v23  ;;  %v1418_v58 = vpop.f32.mrb[7].mxu0 }
 0x1d7   :  { %4618 = vst [vmem:[#allocation8] sm:$0xff] %v4617_v53   ;;  %v2072_v59 = vadd.f32 %v6377_v37, %v2050_v54  ;;  %v2051_v60 = vadd.f32 %v2009_v10, %v1418_v58 }
 0x1d8   :  { %v2075_v61 = vadd.f32 %v6377_v37, %v2053_v57  ;;  %v2090_v63 = vmax.f32 %v2074_v56, 0.0 }
 0x1d9   :  { %v2073_v62 = vadd.f32 %v6377_v37, %v2051_v60  ;;  %v2088_v2 = vmax.f32 %v2072_v59, 0.0 }
 0x1da   :  { %v2091_v1 = vmax.f32 %v2075_v61, 0.0 }
 0x1db   :  { %v2089_v4 = vmax.f32 %v2073_v62, 0.0  ;;  %v5182_v5 = vpop.f32.mrb[8].mxu0 }
 0x1dc   :  { %v4632_v7 = vpack.c.bf16 %v2091_v1, %v2090_v63  ;;  %v2056_v8 = vadd.f32 %v5182_v5, %v2019_v24  ;;  %v1431_v11 = vpop.f32.mrb[9].mxu0 }
 0x1dd   :  { %v4627_v14 = vpack.c.bf16 %v2089_v4, %v2088_v2  ;;  %v2054_v15 = vadd.f32 %v2015_v25, %v1431_v11  ;;  %v5183_v16 = vpop.f32.mrb[10].mxu0 }
 0x1de   :  { %4696 = vst [vmem:[#allocation8 + $0x18] sm:$0xff] %v4632_v7   ;;  %v2078_v17 = vadd.f32 %v6377_v37, %v2056_v8  ;;  %v2057_v19 = vadd.f32 %v5183_v16, %v2021_v34  ;;  %v1434_v10 = vpop.f32.mrb[11].mxu0 }
 0x1df   :  { %4695 = vst [vmem:[#allocation8 + $0x10] sm:$0xff] %v4627_v14   ;;  %v2076_v20 = vadd.f32 %v6377_v37, %v2054_v15  ;;  %v2055_v22 = vadd.f32 %v6362_v26, %v1434_v10 }
 0x1e0   :  { %v2079_v23 = vadd.f32 %v6377_v37, %v2057_v19  ;;  %v2094_v28 = vmax.f32 %v2078_v17, 0.0 }
 0x1e1   :  { %v2077_v27 = vadd.f32 %v6377_v37, %v2055_v22  ;;  %v2092_v30 = vmax.f32 %v2076_v20, 0.0 }
 0x1e2   :  { %v2095_v24 = vmax.f32 %v2079_v23, 0.0 }
 0x1e3   :  { %v2093_v31 = vmax.f32 %v2077_v27, 0.0  ;;  %v5186_v25 = vpop.f32.mrb[12].mxu0 }
 0x1e4   :  { %v4642_v29 = vpack.c.bf16 %v2095_v24, %v2094_v28  ;;  %v2060_v0 = vadd.f32 %v5186_v25, %v6366_v3  ;;  %v1447_v32 = vpop.f32.mrb[13].mxu0 }
 0x1e5   :  { %v4637_v33 = vpack.c.bf16 %v2093_v31, %v2092_v30  ;;  %v2058_v34 = vadd.f32 %v6372_v36, %v1447_v32  ;;  %v5187_v38 = vpop.f32.mrb[14].mxu0 }
 0x1e6   :  { %4698 = vst [vmem:[#allocation8 + $0x28] sm:$0xff] %v4642_v29   ;;  %v2082_v26 = vadd.f32 %v6377_v37, %v2060_v0  ;;  %v2061_v39 = vadd.f32 %v5187_v38, %v6369_v35  ;;  %v1450_v9 = vpop.f32.mrb[15].mxu0 }
 0x1e7   :  { %4697 = vst [vmem:[#allocation8 + $0x20] sm:$0xff] %v4637_v33   ;;  %v2080_v40 = vadd.f32 %v6377_v37, %v2058_v34  ;;  %v2059_v12 = vadd.f32 %v6375_v6, %v1450_v9 }
 0x1e8   :  { %v2083_v41 = vadd.f32 %v6377_v37, %v2061_v39  ;;  %v2098_v42 = vmax.f32 %v2082_v26, 0.0 }
 0x1e9   :  { %v2081_v3 = vadd.f32 %v6377_v37, %v2059_v12  ;;  %v2096_v13 = vmax.f32 %v2080_v40, 0.0 }
 0x1ea   :  { %v2099_v43 = vmax.f32 %v2083_v41, 0.0 }
 0x1eb   :  { %v2097_v36 = vmax.f32 %v2081_v3, 0.0 }
 0x1ec   :  { %v4652_v18 = vpack.c.bf16 %v2099_v43, %v2098_v42 }
 0x1ed   :  { %v4647_v44 = vpack.c.bf16 %v2097_v36, %v2096_v13 }
 0x1ee   :  { %4700 = vst [vmem:[#allocation8 + $0x38] sm:$0xff] %v4652_v18  }
 0x1ef   :  { %4699 = vst [vmem:[#allocation8 + $0x30] sm:$0xff] %v4647_v44  }
 0x22b   :  { %v5558_v21 = vpop.f32.mrb[16].mxu0 }
 0x22c   :  { %v5462_v35 = vpop.f32.mrb[16].mxu1  ;;  %v6400_v45 = vpop.f32.mrb[17].mxu0  ;;  %v4116_v48 = vrot.slane %v5558_v21, 1 }
 0x22d   :  { %v3519_v46 = vpop.f32.mrb[17].mxu1  ;;  %v5559_v47 = vpop.f32.mrb[18].mxu0  ;;  %v4113_v51 = vrot.slane %v6400_v45, 1 }
 0x22e   :  { %v5463_v6 = vpop.f32.mrb[18].mxu1  ;;  %v4118_v49 = vrot.slane %v5559_v47, 1  ;;  %v4021_v50 = vpop.f32.mrb[19].mxu0 }
 0x22f   :  { %v3522_v52 = vpop.f32.mrb[19].mxu1  ;;  %v4114_v53 = vrot.slane %v4021_v50, 1 }
 0x230   :  { %v4119_v54 = vsel %vm1996_vm0, %v4116_v48, %v4118_v49 }
 0x231   :  { %v4164_v55 = vadd.f32 %v5462_v35, %v4119_v54  ;;  %v4115_v56 = vsel %vm1996_vm0, %v4113_v51, %v4114_v53  ;;  %v4117_v57 = vsel %vm1996_vm0, %v4114_v53, %v4116_v48 }
 0x232   :  { %v4162_v58 = vadd.f32 %v4115_v56, %v3519_v46  ;;  %v4163_v59 = vadd.f32 %v4117_v57, %v3522_v52 }
 0x233   :  { %v5562_v60 = vpop.f32.mrb[20].mxu0  ;;  %v4180_v20 = vadd.f32 %v6377_v37, %v4164_v55 }
 0x234   :  { %v4178_v61 = vadd.f32 %v6377_v37, %v4162_v58  ;;  %v4179_v62 = vadd.f32 %v6377_v37, %v4163_v59  ;;  %v5466_v63 = vpop.f32.mrb[20].mxu1  ;;  %v4034_v1 = vpop.f32.mrb[21].mxu0  ;;  %v4124_v11 = vrot.slane %v5562_v60, 1 }
 0x235   :  { %v3535_v2 = vpop.f32.mrb[21].mxu1  ;;  %v4120_v4 = vrot.slane %v4034_v1, 1  ;;  %v5563_v5 = vpop.f32.mrb[22].mxu0  ;;  %v4196_v32 = vmax.f32 %v4180_v20, 0.0 }
 0x236   :  { %v4194_v7 = vmax.f32 %v4178_v61, 0.0  ;;  %v4195_v8 = vmax.f32 %v4179_v62, 0.0  ;;  %v5467_v14 = vpop.f32.mrb[22].mxu1  ;;  %v4126_v15 = vrot.slane %v5563_v5, 1  ;;  %v4037_v16 = vpop.f32.mrb[23].mxu0 }
 0x237   :  { %v4121_v17 = vsel %vm1996_vm0, %v4118_v49, %v4120_v4  ;;  %v3538_v19 = vpop.f32.mrb[23].mxu1  ;;  %v4122_v10 = vrot.slane %v4037_v16, 1 }
 0x238   :  { %v4657_v22 = vpack.c.bf16 %v4195_v8, %v4194_v7  ;;  %v4165_v23 = vadd.f32 %v5463_v6, %v4121_v17  ;;  %v4127_v27 = vsel %vm1996_vm0, %v4124_v11, %v4126_v15 }
 0x239   :  { %v4168_v28 = vadd.f32 %v5466_v63, %v4127_v27  ;;  %v4123_v24 = vsel %vm1996_vm0, %v4120_v4, %v4122_v10  ;;  %v4125_v30 = vsel %vm1996_vm0, %v4122_v10, %v4124_v11 }
 0x23a   :  { %4658 = vst [vmem:[#allocation8 + $0x40] sm:$0xff] %v4657_v22   ;;  %v4181_v31 = vadd.f32 %v6377_v37, %v4165_v23  ;;  %v4166_v25 = vadd.f32 %v4123_v24, %v3535_v2  ;;  %v4167_v29 = vadd.f32 %v4125_v30, %v3538_v19 }
 0x23b   :  { %v5566_v0 = vpop.f32.mrb[24].mxu0  ;;  %v4184_v46 = vadd.f32 %v6377_v37, %v4168_v28 }
 0x23c   :  { %v4197_v33 = vmax.f32 %v4181_v31, 0.0  ;;  %v4182_v34 = vadd.f32 %v6377_v37, %v4166_v25  ;;  %v4183_v38 = vadd.f32 %v6377_v37, %v4167_v29  ;;  %v5470_v26 = vpop.f32.mrb[24].mxu1  ;;  %v4050_v39 = vpop.f32.mrb[25].mxu0  ;;  %v4132_v9 = vrot.slane %v5566_v0, 1 }
 0x23d   :  { %v3551_v40 = vpop.f32.mrb[25].mxu1  ;;  %v4128_v12 = vrot.slane %v4050_v39, 1  ;;  %v5567_v41 = vpop.f32.mrb[26].mxu0  ;;  %v4200_v57 = vmax.f32 %v4184_v46, 0.0 }
 0x23e   :  { %v4662_v3 = vpack.c.bf16 %v4197_v33, %v4196_v32  ;;  %v4198_v42 = vmax.f32 %v4182_v34, 0.0  ;;  %v4199_v43 = vmax.f32 %v4183_v38, 0.0  ;;  %v5471_v13 = vpop.f32.mrb[26].mxu1  ;;  %v4134_v36 = vrot.slane %v5567_v41, 1  ;;  %v4053_v18 = vpop.f32.mrb[27].mxu0 }
 0x23f   :  { %v4129_v44 = vsel %vm1996_vm0, %v4126_v15, %v4128_v12  ;;  %v3554_v21 = vpop.f32.mrb[27].mxu1  ;;  %v4130_v35 = vrot.slane %v4053_v18, 1 }
 0x240   :  { %4701 = vst [vmem:[#allocation8 + $0x48] sm:$0xff] %v4662_v3   ;;  %v4667_v47 = vpack.c.bf16 %v4199_v43, %v4198_v42  ;;  %v4169_v48 = vadd.f32 %v5467_v14, %v4129_v44  ;;  %v4135_v6 = vsel %vm1996_vm0, %v4132_v9, %v4134_v36 }
 0x241   :  { %v4172_v49 = vadd.f32 %v5470_v26, %v4135_v6  ;;  %v4131_v50 = vsel %vm1996_vm0, %v4128_v12, %v4130_v35  ;;  %v4133_v52 = vsel %vm1996_vm0, %v4130_v35, %v4132_v9 }
 0x242   :  { %4702 = vst [vmem:[#allocation8 + $0x50] sm:$0xff] %v4667_v47   ;;  %v4185_v53 = vadd.f32 %v6377_v37, %v4169_v48  ;;  %v4170_v54 = vadd.f32 %v4131_v50, %v3551_v40  ;;  %v4171_v55 = vadd.f32 %v4133_v52, %v3554_v21 }
 0x243   :  { %v5570_v56 = vpop.f32.mrb[28].mxu0  ;;  %v4188_v16 = vadd.f32 %v6377_v37, %v4172_v49 }
 0x244   :  { %v4201_v58 = vmax.f32 %v4185_v53, 0.0  ;;  %v4186_v59 = vadd.f32 %v6377_v37, %v4170_v54  ;;  %v4187_v60 = vadd.f32 %v6377_v37, %v4171_v55  ;;  %v5474_v61 = vpop.f32.mrb[28].mxu1  ;;  %v4066_v62 = vpop.f32.mrb[29].mxu0  ;;  %v4140_v63 = vrot.slane %v5570_v56, 1 }
 0x245   :  { %v3567_v1 = vpop.f32.mrb[29].mxu1  ;;  %v4136_v2 = vrot.slane %v4066_v62, 1  ;;  %v5571_v4 = vpop.f32.mrb[30].mxu0  ;;  %v4204_v34 = vmax.f32 %v4188_v16, 0.0 }
 0x246   :  { %v4672_v5 = vpack.c.bf16 %v4201_v58, %v4200_v57  ;;  %v4202_v7 = vmax.f32 %v4186_v59, 0.0  ;;  %v4203_v8 = vmax.f32 %v4187_v60, 0.0  ;;  %v5475_v11 = vpop.f32.mrb[30].mxu1  ;;  %v4142_v14 = vrot.slane %v5571_v4, 1  ;;  %v4069_v15 = vpop.f32.mrb[31].mxu0 }
 0x247   :  { %v4137_v17 = vsel %vm1996_vm0, %v4134_v36, %v4136_v2  ;;  %v3570_v19 = vpop.f32.mrb[31].mxu1  ;;  %v4138_v10 = vrot.slane %v4069_v15, 1 }
 0x248   :  { %4703 = vst [vmem:[#allocation8 + $0x58] sm:$0xff] %v4672_v5   ;;  %v4677_v20 = vpack.c.bf16 %v4203_v8, %v4202_v7  ;;  %v4173_v22 = vadd.f32 %v5471_v13, %v4137_v17  ;;  %v4143_v23 = vsel %vm1996_vm0, %v4140_v63, %v4142_v14  ;;  %v4161_v27 = vsel %vm1996_vm0, %v4142_v14, %v4113_v51 }
 0x249   :  { %v4176_v28 = vadd.f32 %v5474_v61, %v4143_v23  ;;  %v4177_v24 = vadd.f32 %v5475_v11, %v4161_v27  ;;  %v4139_v30 = vsel %vm1996_vm0, %v4136_v2, %v4138_v10  ;;  %v4141_v31 = vsel %vm1996_vm0, %v4138_v10, %v4140_v63 }
 0x24a   :  { %4704 = vst [vmem:[#allocation8 + $0x60] sm:$0xff] %v4677_v20   ;;  %v4189_v25 = vadd.f32 %v6377_v37, %v4173_v22  ;;  %v4174_v29 = vadd.f32 %v4139_v30, %v3567_v1  ;;  %v4175_v0 = vadd.f32 %v4141_v31, %v3570_v19 }
 0x24b   :  { %v4192_v32 = vadd.f32 %v6377_v37, %v4176_v28  ;;  %v4193_v33 = vadd.f32 %v6377_v37, %v4177_v24 }
 0x24c   :  { %v4205_v38 = vmax.f32 %v4189_v25, 0.0  ;;  %v4190_v45 = vadd.f32 %v6377_v37, %v4174_v29  ;;  %v4191_v51 = vadd.f32 %v6377_v37, %v4175_v0 }
 0x24d   :  { %v4208_v26 = vmax.f32 %v4192_v32, 0.0  ;;  %v4209_v39 = vmax.f32 %v4193_v33, 0.0 }
 0x24e   :  { %v4682_v9 = vpack.c.bf16 %v4205_v38, %v4204_v34  ;;  %v4206_v40 = vmax.f32 %v4190_v45, 0.0  ;;  %v4207_v12 = vmax.f32 %v4191_v51, 0.0 }
 0x24f   :  { %v4692_v41 = vpack.c.bf16 %v4209_v39, %v4208_v26 }
 0x250   :  { %4705 = vst [vmem:[#allocation8 + $0x68] sm:$0xff] %v4682_v9   ;;  %v4687_v3 = vpack.c.bf16 %v4207_v12, %v4206_v40 }
 0x251   :  { %4707 = vst [vmem:[#allocation8 + $0x78] sm:$0xff] %v4692_v41  }
 0x252   :  { %4706 = vst [vmem:[#allocation8 + $0x70] sm:$0xff] %v4687_v3  }
 0x253   :  { %6119 = shalt.err (!%p6116_p0)
}
 0x254   :  { %s6120_s28 = scalar_lea.hbm %s6457_s3, 2048 }
 0x255   :  { %p6121_p1 = scmp.ne.s32.totalorder %s6457_s3, %s6120_s28  ;;  %p6124_p2 = scmp.lt.u32.totalorder %s6120_s28, %s6457_s3 }
 0x257   :  { %p6126_p3 = pnand %p6124_p2, %p6121_p1 }
 0x259   :  { %6129 = shalt.err (!%p6126_p3)
}
 0x25a   :  { %4302 = dma.vmem_to_hbm [thread:$0]  %s4297_s22, 2048, %s6457_s3, [#allocation4], %s6138_s24, %s6138_s24, %s6139_s25  }
 0x25b   :  { %6134 = dma.done.wait [#allocation4], 2048  }
 0x25c   :  { %6135 = vsyncadd [#allocation4], 4294965248 }
 0x25d   :  { %4306 = vsyncpa [#allocation3], 1 }
 0x25e   :  { %4307 = vsyncpa [#allocation6], 1 }
 0x25f   :  { %4308 = vsyncpa [#allocation4], 1 }

// kernel: _lambda_.3
= control target key start
LH: loop header
LB: loop body
LE: loop exit
PB: predicated region body
PF: predicated region fallthrough
CT: control target
= control target key end

     0   :  { %11 = vsyncpa [#allocation3], 0  ;;  %s6866_s0 = inlined_call_operand.hbm [shape: bf16[2,1,160,128], index: 0, kind: input, shape index: {}]   ;;  %s6867_s1 = inlined_call_operand.hbm [shape: bf16[9,128,128], index: 1, kind: input, shape index: {}]   ;;  %s6868_s2 = inlined_call_operand.hbm [shape: f32[1,128], index: 2, kind: input, shape index: {}]   ;;  %s6869_s3 = inlined_call_operand.hbm [shape: bf16[2,128,128], index: 3, kind: input, shape index: {}]   ;;  %s6870_s4 = inlined_call_operand.hbm [shape: bf16[128,128], index: 4, kind: input, shape index: {}]   ;;  %s6871_s5 = inlined_call_operand.hbm [shape: f32[1,128], index: 5, kind: input, shape index: {}]   ;;  %s6872_s6 = inlined_call_operand.hbm [shape: f32[2,128,128], index: 6, kind: output, shape index: {}]  }
   0x1   :  { %12 = vsyncpa [#allocation6], 0 }
   0x2   :  { %13 = vsyncpa [#allocation9], 0 }
   0x3   :  { %14 = vsyncpa [#allocation12], 0 }
   0x4   :  { %15 = vsyncpa [#allocation4], 0  ;;  %s6245_s21 = smov [#allocation5]   ;;  %s6246_s23 = smov [#allocation8]  }
   0x5   :  { %s33_s22 = sshll.u32 %s6245_s21, 4  ;;  %s55_s24 = sshll.u32 %s6246_s23, 4  ;;  %s34_s22 = int_to_ptr.vmem [resolvable:$true] %s33_s22  ;;  %s6291_s24 = int_to_ptr.vmem [resolvable:$true] %s55_s24 }
   0x6   :  { %s6081_s27 = scalar_lea.hbm %s6867_s1, 9216 }
   0x7   :  { %p6082_p0 = scmp.ne.s32.totalorder %s6867_s1, %s6081_s27  ;;  %p6085_p1 = scmp.lt.u32.totalorder %s6081_s27, %s6867_s1 }
   0x9   :  { %p6087_p2 = pnand %p6085_p1, %p6082_p0 }
   0xb   :  { %6090 = shalt.err (!%p6087_p2)
}
   0xc   :  { %s6091_s8 = scalar_lea.vmem %s34_s22, 9216  ;;  %p6096_p4 = scmp.lt.s32.totalorder %s34_s22, %s34_s22 }
   0xd   :  { %p6092_p3 = scmp.ne.s32.totalorder %s34_s22, %s6091_s8  ;;  %p6097_p5 = scmp.lt.s32.totalorder %s6091_s8, %s6091_s8 }
   0xf   :  { %p6098_p6 = por %p6097_p5, %p6096_p4 }
  0x11   :  { %p6099_p7 = pnand %p6098_p6, %p6092_p3 }
  0x13   :  { %6102 = shalt.err (!%p6099_p7)
}
  0x14   :  { %s6247_s9 = smov 64   ;;  %s6248_s10 = smov 4  }
  0x15   :  { %39 = dma.hbm_to_vmem [thread:$0]  %s6867_s1, 9216, %s34_s22, [#allocation6], %s6247_s9, %s6247_s9, %s6248_s10  }
  0x16   :  { %s6103_s15 = scalar_lea.hbm %s6869_s3, 2048 }
  0x17   :  { %p6104_p8 = scmp.ne.s32.totalorder %s6869_s3, %s6103_s15  ;;  %p6107_p9 = scmp.lt.u32.totalorder %s6103_s15, %s6869_s3 }
  0x19   :  { %p6109_p10 = pnand %p6107_p9, %p6104_p8 }
  0x1b   :  { %6112 = shalt.err (!%p6109_p10)
}
  0x1c   :  { %s6113_s20 = scalar_lea.vmem %s6291_s24, 2048  ;;  %p6118_p12 = scmp.lt.s32.totalorder %s6291_s24, %s6291_s24 }
  0x1d   :  { %p6114_p11 = scmp.ne.s32.totalorder %s6291_s24, %s6113_s20  ;;  %p6119_p13 = scmp.lt.s32.totalorder %s6113_s20, %s6113_s20 }
  0x1f   :  { %p6120_p0 = por %p6119_p13, %p6118_p12 }
  0x21   :  { %p6121_p1 = pnand %p6120_p0, %p6114_p11 }
  0x23   :  { %6124 = shalt.err (!%p6121_p1)
}
  0x24   :  { %61 = dma.hbm_to_vmem [thread:$0]  %s6869_s3, 2048, %s6291_s24, [#allocation9], %s6247_s9, %s6247_s9, %s6248_s10  }
  0x25   :  { %s6249_s22 = smov [#allocation2]   ;;  %s6250_s25 = smov [#allocation7]  }
  0x26   :  { %s21_s23 = sshll.u32 %s6249_s22, 4  ;;  %s46_s26 = sshll.u32 %s6250_s25, 4  ;;  %s22_s23 = int_to_ptr.vmem [resolvable:$true] %s21_s23  ;;  %s47_s26 = int_to_ptr.vmem [resolvable:$true] %s46_s26 }
  0x27   :  { %s6125_s29 = scalar_lea.hbm %s6866_s0, 2560 }
  0x28   :  { %p6126_p2 = scmp.ne.s32.totalorder %s6866_s0, %s6125_s29  ;;  %p6129_p3 = scmp.lt.u32.totalorder %s6125_s29, %s6866_s0 }
  0x2a   :  { %p6131_p4 = pnand %p6129_p3, %p6126_p2 }
  0x2c   :  { %6134 = shalt.err (!%p6131_p4)
}
  0x2d   :  { %s6135_s3 = scalar_lea.vmem %s22_s23, 2560  ;;  %p6140_p6 = scmp.lt.s32.totalorder %s22_s23, %s22_s23 }
  0x2e   :  { %p6136_p5 = scmp.ne.s32.totalorder %s22_s23, %s6135_s3  ;;  %p6141_p7 = scmp.lt.s32.totalorder %s6135_s3, %s6135_s3 }
  0x30   :  { %p6142_p8 = por %p6141_p7, %p6140_p6 }
  0x32   :  { %p6143_p9 = pnand %p6142_p8, %p6136_p5 }
  0x34   :  { %6146 = shalt.err (!%p6143_p9)
}
  0x35   :  { %27 = dma.hbm_to_vmem [thread:$0]  %s6866_s0, 2560, %s22_s23, [#allocation3], %s6247_s9, %s6247_s9, %s6248_s10  }
  0x36   :  { %s6147_s15 = scalar_lea.hbm %s6868_s2, 16 }
  0x37   :  { %p6148_p10 = scmp.ne.s32.totalorder %s6868_s2, %s6147_s15  ;;  %p6151_p11 = scmp.lt.u32.totalorder %s6147_s15, %s6868_s2 }
  0x39   :  { %p6153_p12 = pnand %p6151_p11, %p6148_p10 }
  0x3b   :  { %6156 = shalt.err (!%p6153_p12)
}
  0x3c   :  { %s6157_s20 = scalar_lea.vmem %s47_s26, 16  ;;  %s6161_s1 = scalar_lea.vmem %s47_s26, 32 }
  0x3d   :  { %p6158_p13 = scmp.ne.s32.totalorder %s47_s26, %s6157_s20  ;;  %p6162_p0 = scmp.lt.s32.totalorder %s47_s26, %s47_s26 }
  0x3e   :  { %p6163_p1 = scmp.lt.s32.totalorder %s6161_s1, %s6157_s20 }
  0x40   :  { %p6164_p2 = por %p6163_p1, %p6162_p0 }
  0x42   :  { %p6165_p3 = pnand %p6164_p2, %p6158_p13 }
  0x44   :  { %6168 = shalt.err (!%p6165_p3)
}
  0x45   :  { %49 = dma.hbm_to_vmem [thread:$0]  %s6868_s2, 16, %s47_s26, [#allocation6]  }
  0x46   :  { %s6251_s22 = smov [#allocation10]   ;;  %s6252_s25 = smov [#allocation11]  }
  0x47   :  { %s67_s23 = sshll.u32 %s6251_s22, 4  ;;  %s80_s27 = sshll.u32 %s6252_s25, 4  ;;  %s68_s23 = int_to_ptr.vmem [resolvable:$true] %s67_s23  ;;  %s81_s27 = int_to_ptr.vmem [resolvable:$true] %s80_s27 }
  0x48   :  { %s6169_s30 = scalar_lea.hbm %s6870_s4, 1024 }
  0x49   :  { %p6170_p4 = scmp.ne.s32.totalorder %s6870_s4, %s6169_s30  ;;  %p6173_p5 = scmp.lt.u32.totalorder %s6169_s30, %s6870_s4 }
  0x4b   :  { %p6175_p6 = pnand %p6173_p5, %p6170_p4 }
  0x4d   :  { %6178 = shalt.err (!%p6175_p6)
}
  0x4e   :  { %s6179_s2 = scalar_lea.vmem %s68_s23, 1024  ;;  %p6184_p8 = scmp.lt.s32.totalorder %s68_s23, %s68_s23 }
  0x4f   :  { %p6180_p7 = scmp.ne.s32.totalorder %s68_s23, %s6179_s2  ;;  %p6185_p9 = scmp.lt.s32.totalorder %s6179_s2, %s6179_s2 }
  0x51   :  { %p6186_p10 = por %p6185_p9, %p6184_p8 }
  0x53   :  { %p6187_p11 = pnand %p6186_p10, %p6180_p7 }
  0x55   :  { %6190 = shalt.err (!%p6187_p11)
}
  0x56   :  { %73 = dma.hbm_to_vmem [thread:$0]  %s6870_s4, 1024, %s68_s23, [#allocation9], %s6247_s9, %s6247_s9, %s6248_s10  }
  0x57   :  { %s6191_s14 = scalar_lea.hbm %s6871_s5, 16 }
  0x58   :  { %p6192_p12 = scmp.ne.s32.totalorder %s6871_s5, %s6191_s14  ;;  %p6195_p13 = scmp.lt.u32.totalorder %s6191_s14, %s6871_s5 }
  0x5a   :  { %p6197_p0 = pnand %p6195_p13, %p6192_p12 }
  0x5c   :  { %6200 = shalt.err (!%p6197_p0)
}
  0x5d   :  { %s6201_s19 = scalar_lea.vmem %s81_s27, 16  ;;  %s6205_s20 = scalar_lea.vmem %s81_s27, 32 }
  0x5e   :  { %p6202_p1 = scmp.ne.s32.totalorder %s81_s27, %s6201_s19  ;;  %p6206_p2 = scmp.lt.s32.totalorder %s81_s27, %s81_s27 }
  0x5f   :  { %p6207_p3 = scmp.lt.s32.totalorder %s6205_s20, %s6201_s19 }
  0x61   :  { %p6208_p4 = por %p6207_p3, %p6206_p2 }
  0x63   :  { %p6209_p5 = pnand %p6208_p4, %p6202_p1 }
  0x65   :  { %6212 = shalt.err (!%p6209_p5)
}
  0x66   :  { %83 = dma.hbm_to_vmem [thread:$0]  %s6871_s5, 16, %s81_s27, [#allocation12]  }
  0x67   :  { %6235 = dma.done.wait [#allocation3], 2560  }
  0x68   :  { %6236 = vsyncadd [#allocation3], 4294964736 }
  0x69   :  { %6237 = dma.done.wait [#allocation6], 9232  }
  0x6a   :  { %6238 = vsyncadd [#allocation6], 4294958064 }
  0x6b   :  { %6239 = dma.done.wait [#allocation9], 3072  }
  0x6c   :  { %6240 = vsyncadd [#allocation9], 4294964224 }
  0x6d   :  { %6241 = dma.done.wait [#allocation12], 16  }
  0x6e   :  { %6242 = vsyncadd [#allocation12], 4294967280  ;;  %v5861_v0 = vld [vmem:[#allocation5 + $0xc0] sm:$0xff]   ;;  %v5863_v2 = vld [vmem:[#allocation5 + $0xc8] sm:$0xff]   ;;  %vm1259_vm0 = vcmask 1046528   ;;  %vm1843_vm1 = vcmask 1045504  }
  0x6f   :  { %v5862_v1 = vld [vmem:[#allocation5 + $0x100] sm:$0xff]   ;;  %4890 = vmatprep.subr.bf16.mxu0 %v5861_v0  ;;  %v5864_v3 = vld [vmem:[#allocation5 + $0x108] sm:$0xff]   ;;  %v5865_v4 = vld [vmem:[#allocation5 + $0xd0] sm:$0xff]   ;;  %s6253_s5 = smov [#allocation13]  }
  0x70   :  { %4986 = vmatprep.subr.bf16.mxu1 %v5862_v1  ;;  %4891 = vmatpush3.bf16.msra.mxu0 %v5861_v0  ;;  %v5866_v5 = vld [vmem:[#allocation5 + $0x110] sm:$0xff]   ;;  %v5867_v6 = vld [vmem:[#allocation5 + $0xd8] sm:$0xff]   ;;  %v5869_v8 = vld [vmem:[#allocation5 + $0xe0] sm:$0xff]   ;;  %s4342_s10 = sshll.u32 %s6253_s5, 4  ;;  %s4343_s10 = int_to_ptr.vmem [resolvable:$true] %s4342_s10 }
  0x71   :  { %4987 = vmatpush3.bf16.msra.mxu1 %v5862_v1  ;;  %4892 = vmatprep.subr.bf16.mxu0 %v5863_v2  ;;  %v5868_v7 = vld [vmem:[#allocation5 + $0x118] sm:$0xff]   ;;  %v5870_v9 = vld [vmem:[#allocation5 + $0x120] sm:$0xff]   ;;  %v5871_v10 = vld [vmem:[#allocation5 + $0xe8] sm:$0xff]   ;;  %s6213_s1 = scalar_lea.vmem %s4343_s10, 4096  ;;  %p6218_p7 = scmp.lt.s32.totalorder %s4343_s10, %s4343_s10 }
  0x72   :  { %4988 = vmatprep.subr.bf16.mxu1 %v5864_v3  ;;  %v6382_v11 = vld [vmem:[#allocation2 + $0x8] sm:$0xff]   ;;  %v5873_v13 = vld [vmem:[#allocation5 + $0xf0] sm:$0xff]   ;;  %v5875_v15 = vld [vmem:[#allocation5 + $0xf8] sm:$0xff]   ;;  %p6214_p6 = scmp.ne.s32.totalorder %s4343_s10, %s6213_s1  ;;  %p6219_p8 = scmp.lt.s32.totalorder %s6213_s1, %s6213_s1 }
  0x73   :  { %v5872_v12 = vld [vmem:[#allocation5 + $0x128] sm:$0xff]   ;;  %4906 = vmatprep.mubr.bf16.mxu0 %v6382_v11  ;;  %5002 = vmatprep.mubr.bf16.mxu1 %v6382_v11  ;;  %v5874_v14 = vld [vmem:[#allocation5 + $0x130] sm:$0xff]   ;;  %v5876_v16 = vld [vmem:[#allocation5 + $0x138] sm:$0xff]  }
  0x74   :  { %4893 = vmatpush3.bf16.msra.mxu0 %v5863_v2  ;;  %v5879_v17 = vld [vmem:[#allocation5] sm:$0xff]   ;;  %v6386_v19 = vld [vmem:[#allocation2 + $0x10] sm:$0xff]   ;;  %v5881_v20 = vld [vmem:[#allocation5 + $0x8] sm:$0xff]   ;;  %p6220_p9 = por %p6219_p8, %p6218_p7 }
  0x75   :  { %4989 = vmatpush3.bf16.msra.mxu1 %v5864_v3  ;;  %4894 = vmatprep.subr.bf16.mxu0 %v5865_v4  ;;  %v5880_v18 = vld [vmem:[#allocation5 + $0x40] sm:$0xff]   ;;  %v5882_v21 = vld [vmem:[#allocation5 + $0x48] sm:$0xff]   ;;  %v6388_v22 = vld [vmem:[#allocation2 + $0x18] sm:$0xff]  }
  0x76   :  { %4990 = vmatprep.subr.bf16.mxu1 %v5866_v5  ;;  %v5885_v23 = vld [vmem:[#allocation5 + $0x10] sm:$0xff]   ;;  %v6394_v25 = vld [vmem:[#allocation2 + $0x20] sm:$0xff]   ;;  %v5887_v26 = vld [vmem:[#allocation5 + $0x18] sm:$0xff]   ;;  %p6221_p10 = pnand %p6220_p9, %p6214_p6 }
  0x77   :  { %v5886_v24 = vld [vmem:[#allocation5 + $0x50] sm:$0xff]   ;;  %v5888_v27 = vld [vmem:[#allocation5 + $0x58] sm:$0xff]   ;;  %v6396_v28 = vld [vmem:[#allocation2 + $0x28] sm:$0xff]  }
  0x78   :  { %4895 = vmatpush3.bf16.msra.mxu0 %v5865_v4  ;;  %v5891_v29 = vld [vmem:[#allocation5 + $0x20] sm:$0xff]   ;;  %v6402_v31 = vld [vmem:[#allocation2 + $0x30] sm:$0xff]   ;;  %v5893_v32 = vld [vmem:[#allocation5 + $0x28] sm:$0xff]  }
  0x79   :  { %4991 = vmatpush3.bf16.msra.mxu1 %v5866_v5  ;;  %4896 = vmatprep.subr.bf16.mxu0 %v5867_v6  ;;  %v5892_v30 = vld [vmem:[#allocation5 + $0x60] sm:$0xff]   ;;  %v5894_v33 = vld [vmem:[#allocation5 + $0x68] sm:$0xff]   ;;  %v6404_v34 = vld [vmem:[#allocation2 + $0x38] sm:$0xff]  }
  0x7a   :  { %4992 = vmatprep.subr.bf16.mxu1 %v5868_v7  ;;  %v5897_v35 = vld [vmem:[#allocation5 + $0x30] sm:$0xff]   ;;  %v6410_v37 = vld [vmem:[#allocation2 + $0x40] sm:$0xff]   ;;  %v5899_v38 = vld [vmem:[#allocation5 + $0x38] sm:$0xff]  }
  0x7b   :  { %v5898_v36 = vld [vmem:[#allocation5 + $0x70] sm:$0xff]   ;;  %v5900_v39 = vld [vmem:[#allocation5 + $0x78] sm:$0xff]   ;;  %v6412_v40 = vld [vmem:[#allocation2] sm:$0xff]  }
  0x7c   :  { %4897 = vmatpush3.bf16.msra.mxu0 %v5867_v6  ;;  %v5902_v41 = vld [vmem:[#allocation5 + $0x180] sm:$0xff]   ;;  %v5904_v43 = vld [vmem:[#allocation5 + $0x188] sm:$0xff]   ;;  %v5906_v45 = vld [vmem:[#allocation5 + $0x190] sm:$0xff]  }
  0x7d   :  { %4993 = vmatpush3.bf16.msra.mxu1 %v5868_v7  ;;  %4898 = vmatprep.subr.bf16.mxu0 %v5869_v8  ;;  %v5903_v42 = vld [vmem:[#allocation5 + $0x1c0] sm:$0xff]   ;;  %v5905_v44 = vld [vmem:[#allocation5 + $0x1c8] sm:$0xff]   ;;  %v5907_v46 = vld [vmem:[#allocation5 + $0x1d0] sm:$0xff]  }
  0x7e   :  { %4994 = vmatprep.subr.bf16.mxu1 %v5870_v9  ;;  %v5908_v47 = vld [vmem:[#allocation5 + $0x198] sm:$0xff]   ;;  %v5910_v49 = vld [vmem:[#allocation5 + $0x1a0] sm:$0xff]   ;;  %v5912_v51 = vld [vmem:[#allocation5 + $0x1a8] sm:$0xff]  }
  0x7f   :  { %v5909_v48 = vld [vmem:[#allocation5 + $0x1d8] sm:$0xff]   ;;  %v5911_v50 = vld [vmem:[#allocation5 + $0x1e0] sm:$0xff]   ;;  %v5913_v52 = vld [vmem:[#allocation5 + $0x1e8] sm:$0xff]  }
  0x80   :  { %4899 = vmatpush3.bf16.msra.mxu0 %v5869_v8  ;;  %v5914_v53 = vld [vmem:[#allocation5 + $0x1b0] sm:$0xff]   ;;  %v5916_v55 = vld [vmem:[#allocation5 + $0x1b8] sm:$0xff]   ;;  %v5920_v58 = vld [vmem:[#allocation5 + $0x140] sm:$0xff]  }
  0x81   :  { %4995 = vmatpush3.bf16.msra.mxu1 %v5870_v9  ;;  %4900 = vmatprep.subr.bf16.mxu0 %v5871_v10  ;;  %v5915_v54 = vld [vmem:[#allocation5 + $0x1f0] sm:$0xff]   ;;  %v5917_v56 = vld [vmem:[#allocation5 + $0x1f8] sm:$0xff]   ;;  %v5921_v59 = vld [vmem:[#allocation5 + $0xc0] sm:$0xff]  }
  0x82   :  { %4996 = vmatprep.subr.bf16.mxu1 %v5872_v12  ;;  %v6430_v57 = vld [vmem:[#allocation2 + $0x10] sm:$0xff]   ;;  %v6436_v60 = vld [vmem:[#allocation2 + $0x18] sm:$0xff]   ;;  %v5922_v61 = vld [vmem:[#allocation5 + $0x148] sm:$0xff]  }
  0x83   :  { %v5923_v62 = vld [vmem:[#allocation5 + $0xc8] sm:$0xff]   ;;  %v6438_v63 = vld [vmem:[#allocation2 + $0x20] sm:$0xff]   ;;  %v5926_v0 = vld [vmem:[#allocation5 + $0x150] sm:$0xff]  }
  0x84   :  { %4901 = vmatpush3.bf16.msra.mxu0 %v5871_v10  ;;  %v5927_v1 = vld [vmem:[#allocation5 + $0xd0] sm:$0xff]   ;;  %v6444_v2 = vld [vmem:[#allocation2 + $0x28] sm:$0xff]   ;;  %v5928_v3 = vld [vmem:[#allocation5 + $0x158] sm:$0xff]  }
  0x85   :  { %4997 = vmatpush3.bf16.msra.mxu1 %v5872_v12  ;;  %4902 = vmatprep.subr.bf16.mxu0 %v5873_v13  ;;  %v5929_v4 = vld [vmem:[#allocation5 + $0xd8] sm:$0xff]   ;;  %v6446_v5 = vld [vmem:[#allocation2 + $0x30] sm:$0xff]   ;;  %v5932_v6 = vld [vmem:[#allocation5 + $0x160] sm:$0xff]  }
  0x86   :  { %4998 = vmatprep.subr.bf16.mxu1 %v5874_v14  ;;  %v5933_v7 = vld [vmem:[#allocation5 + $0xe0] sm:$0xff]   ;;  %v6452_v8 = vld [vmem:[#allocation2 + $0x38] sm:$0xff]   ;;  %v5934_v9 = vld [vmem:[#allocation5 + $0x168] sm:$0xff]  }
  0x87   :  { %v5935_v10 = vld [vmem:[#allocation5 + $0xe8] sm:$0xff]   ;;  %v6454_v12 = vld [vmem:[#allocation2 + $0x40] sm:$0xff]  }
  0x88   :  { %4903 = vmatpush3.bf16.msra.mxu0 %v5873_v13  ;;  %v5938_v13 = vld [vmem:[#allocation5 + $0x170] sm:$0xff]  }
  0x89   :  { %4999 = vmatpush3.bf16.msra.mxu1 %v5874_v14  ;;  %4904 = vmatprep.subr.bf16.mxu0 %v5875_v15  ;;  %v5939_v14 = vld [vmem:[#allocation5 + $0xf0] sm:$0xff]  }
  0x8a   :  { %5000 = vmatprep.subr.bf16.mxu1 %v5876_v16 }
  0x8c   :  { %4905 = vmatpush3.bf16.msra.mxu0 %v5875_v15  ;;  %v6460_v15 = vld [vmem:[#allocation2 + $0x48] sm:$0xff]  }
  0x8d   :  { %5001 = vmatpush3.bf16.msra.mxu1 %v5876_v16  ;;  %4922 = vmatprep.subr.bf16.mxu0 %v5879_v17  ;;  %v5940_v16 = vld [vmem:[#allocation5 + $0x178] sm:$0xff]  }
  0x8e   :  { %5018 = vmatprep.subr.bf16.mxu1 %v5880_v18 }
  0x8f   :  { %4907 = vmatmul.mubr.bf16.vlgmr.msra.gmra.mrb[0].mxu0 %v6386_v19 }
  0x90   :  { %5003 = vmatmul.mubr.bf16.vlgmr.msra.gmra.mrb[0].mxu1 %v6386_v19  ;;  %4923 = vmatpush3.bf16.msra.mxu0 %v5879_v17  ;;  %v5941_v17 = vld [vmem:[#allocation5 + $0xf8] sm:$0xff]  }
  0x91   :  { %5019 = vmatpush3.bf16.msra.mxu1 %v5880_v18  ;;  %4924 = vmatprep.subr.bf16.mxu0 %v5881_v20  ;;  %v6463_v18 = vld [vmem:[#allocation2 + $0x58] sm:$0xff]  }
  0x92   :  { %5020 = vmatprep.subr.bf16.mxu1 %v5882_v21  ;;  %4910 = vmatprep.mubr.bf16.mxu0 %v6388_v22 }
  0x93   :  { %5006 = vmatprep.mubr.bf16.mxu1 %v6388_v22 }
  0x94   :  { %4925 = vmatpush3.bf16.msra.mxu0 %v5881_v20  ;;  %v5943_v20 = vld [vmem:[#allocation5 + $0x80] sm:$0xff]  }
  0x95   :  { %5021 = vmatpush3.bf16.msra.mxu1 %v5882_v21  ;;  %4926 = vmatprep.subr.bf16.mxu0 %v5885_v23  ;;  %v5945_v21 = vld [vmem:[#allocation5] sm:$0xff]  }
  0x96   :  { %5022 = vmatprep.subr.bf16.mxu1 %v5886_v24 }
  0x97   :  { %4911 = vmatmul.mubr.bf16.gmra.mrb[4].mxu0 %v6394_v25 }
  0x98   :  { %5007 = vmatmul.mubr.bf16.gmra.mrb[4].mxu1 %v6394_v25  ;;  %4927 = vmatpush3.bf16.msra.mxu0 %v5885_v23  ;;  %v6468_v23 = vld [vmem:[#allocation2 + $0x60] sm:$0xff]  }
  0x99   :  { %5023 = vmatpush3.bf16.msra.mxu1 %v5886_v24  ;;  %4928 = vmatprep.subr.bf16.mxu0 %v5887_v26  ;;  %v5946_v24 = vld [vmem:[#allocation5 + $0x88] sm:$0xff]  }
  0x9a   :  { %5024 = vmatprep.subr.bf16.mxu1 %v5888_v27  ;;  %4914 = vmatprep.mubr.bf16.mxu0 %v6396_v28 }
  0x9b   :  { %5010 = vmatprep.mubr.bf16.mxu1 %v6396_v28 }
  0x9c   :  { %4929 = vmatpush3.bf16.msra.mxu0 %v5887_v26  ;;  %v5947_v26 = vld [vmem:[#allocation5 + $0x8] sm:$0xff]  }
  0x9d   :  { %5025 = vmatpush3.bf16.msra.mxu1 %v5888_v27  ;;  %4930 = vmatprep.subr.bf16.mxu0 %v5891_v29  ;;  %v6471_v27 = vld [vmem:[#allocation2 + $0x68] sm:$0xff]  }
  0x9e   :  { %5026 = vmatprep.subr.bf16.mxu1 %v5892_v30 }
  0x9f   :  { %4915 = vmatmul.mubr.bf16.gmra.mrb[8].mxu0 %v6402_v31 }
  0xa0   :  { %5011 = vmatmul.mubr.bf16.gmra.mrb[8].mxu1 %v6402_v31  ;;  %4931 = vmatpush3.bf16.msra.mxu0 %v5891_v29  ;;  %v5951_v29 = vld [vmem:[#allocation5 + $0x10] sm:$0xff]  }
  0xa1   :  { %5027 = vmatpush3.bf16.msra.mxu1 %v5892_v30  ;;  %4932 = vmatprep.subr.bf16.mxu0 %v5893_v32  ;;  %v6476_v30 = vld [vmem:[#allocation2 + $0x70] sm:$0xff]  }
  0xa2   :  { %5028 = vmatprep.subr.bf16.mxu1 %v5894_v33  ;;  %4918 = vmatprep.mubr.bf16.mxu0 %v6404_v34 }
  0xa3   :  { %5014 = vmatprep.mubr.bf16.mxu1 %v6404_v34 }
  0xa4   :  { %4933 = vmatpush3.bf16.msra.mxu0 %v5893_v32  ;;  %v5953_v32 = vld [vmem:[#allocation5 + $0x18] sm:$0xff]  }
  0xa5   :  { %5029 = vmatpush3.bf16.msra.mxu1 %v5894_v33  ;;  %4934 = vmatprep.subr.bf16.mxu0 %v5897_v35  ;;  %v6479_v33 = vld [vmem:[#allocation2 + $0x78] sm:$0xff]  }
  0xa6   :  { %5030 = vmatprep.subr.bf16.mxu1 %v5898_v36 }
  0xa7   :  { %4919 = vmatmul.mubr.bf16.gmra.mrb[12].mxu0 %v6410_v37 }
  0xa8   :  { %5015 = vmatmul.mubr.bf16.gmra.mrb[12].mxu1 %v6410_v37  ;;  %4935 = vmatpush3.bf16.msra.mxu0 %v5897_v35  ;;  %v5957_v35 = vld [vmem:[#allocation5 + $0x20] sm:$0xff]  }
  0xa9   :  { %5031 = vmatpush3.bf16.msra.mxu1 %v5898_v36  ;;  %4936 = vmatprep.subr.bf16.mxu0 %v5899_v38  ;;  %v6484_v36 = vld [vmem:[#allocation2 + $0x80] sm:$0xff]  }
  0xaa   :  { %5032 = vmatprep.subr.bf16.mxu1 %v5900_v39  ;;  %4938 = vmatprep.mubr.bf16.mxu0 %v6412_v40 }
  0xab   :  { %5034 = vmatprep.mubr.bf16.mxu1 %v6412_v40 }
  0xac   :  { %4937 = vmatpush3.bf16.msra.mxu0 %v5899_v38  ;;  %v5959_v38 = vld [vmem:[#allocation5 + $0x28] sm:$0xff]  }
  0xad   :  { %5033 = vmatpush3.bf16.msra.mxu1 %v5900_v39  ;;  %4954 = vmatprep.subr.bf16.mxu0 %v5902_v41  ;;  %v6487_v39 = vld [vmem:[#allocation2 + $0x88] sm:$0xff]  }
  0xae   :  { %5050 = vmatprep.subr.bf16.mxu1 %v5903_v42 }
  0xaf   :  { %4939 = vmatmul.mubr.bf16.vlgmr.msra.gmra.mrb[0].mxu0 %v6382_v11 }
  0xb0   :  { %5035 = vmatmul.mubr.bf16.vlgmr.msra.gmra.mrb[0].mxu1 %v6382_v11  ;;  %4955 = vmatpush3.bf16.msra.mxu0 %v5902_v41  ;;  %v5963_v41 = vld [vmem:[#allocation5 + $0x30] sm:$0xff]  }
  0xb1   :  { %5051 = vmatpush3.bf16.msra.mxu1 %v5903_v42  ;;  %4956 = vmatprep.subr.bf16.mxu0 %v5904_v43  ;;  %v6492_v42 = vld [vmem:[#allocation2 + $0x90] sm:$0xff]  }
  0xb2   :  { %5052 = vmatprep.subr.bf16.mxu1 %v5905_v44  ;;  %4942 = vmatprep.mubr.bf16.mxu0 %v6386_v19 }
  0xb3   :  { %5038 = vmatprep.mubr.bf16.mxu1 %v6386_v19 }
  0xb4   :  { %4957 = vmatpush3.bf16.msra.mxu0 %v5904_v43  ;;  %v5965_v43 = vld [vmem:[#allocation5 + $0x38] sm:$0xff]  }
  0xb5   :  { %5053 = vmatpush3.bf16.msra.mxu1 %v5905_v44  ;;  %4958 = vmatprep.subr.bf16.mxu0 %v5906_v45  ;;  %v6495_v44 = vld [vmem:[#allocation2 + $0x50] sm:$0xff]  }
  0xb6   :  { %5054 = vmatprep.subr.bf16.mxu1 %v5907_v46 }
  0xb7   :  { %4943 = vmatmul.mubr.bf16.gmra.mrb[4].mxu0 %v6388_v22 }
  0xb8   :  { %5039 = vmatmul.mubr.bf16.gmra.mrb[4].mxu1 %v6388_v22  ;;  %4959 = vmatpush3.bf16.msra.mxu0 %v5906_v45  ;;  %v5968_v45 = vld [vmem:[#allocation5 + $0x180] sm:$0xff]  }
  0xb9   :  { %5055 = vmatpush3.bf16.msra.mxu1 %v5907_v46  ;;  %4960 = vmatprep.subr.bf16.mxu0 %v5908_v47  ;;  %v5969_v46 = vld [vmem:[#allocation5 + $0x208] sm:$0xff]  }
  0xba   :  { %5056 = vmatprep.subr.bf16.mxu1 %v5909_v48  ;;  %4946 = vmatprep.mubr.bf16.mxu0 %v6394_v25 }
  0xbb   :  { %5042 = vmatprep.mubr.bf16.mxu1 %v6394_v25 }
  0xbc   :  { %4961 = vmatpush3.bf16.msra.mxu0 %v5908_v47  ;;  %v6071_v47 = vld [vmem:[#allocation2 + $0x8] sm:$0xff]  }
  0xbd   :  { %5057 = vmatpush3.bf16.msra.mxu1 %v5909_v48  ;;  %4962 = vmatprep.subr.bf16.mxu0 %v5910_v49  ;;  %v5971_v48 = vld [vmem:[#allocation5 + $0x210] sm:$0xff]  }
  0xbe   :  { %5058 = vmatprep.subr.bf16.mxu1 %v5911_v50 }
  0xbf   :  { %4947 = vmatmul.mubr.bf16.gmra.mrb[8].mxu0 %v6396_v28 }
  0xc0   :  { %5043 = vmatmul.mubr.bf16.gmra.mrb[8].mxu1 %v6396_v28  ;;  %4963 = vmatpush3.bf16.msra.mxu0 %v5910_v49  ;;  %v6072_v49 = vld [vmem:[#allocation2 + $0x10] sm:$0xff]  }
  0xc1   :  { %5059 = vmatpush3.bf16.msra.mxu1 %v5911_v50  ;;  %4964 = vmatprep.subr.bf16.mxu0 %v5912_v51  ;;  %v5973_v50 = vld [vmem:[#allocation5 + $0x218] sm:$0xff]  }
  0xc2   :  { %5060 = vmatprep.subr.bf16.mxu1 %v5913_v52  ;;  %4950 = vmatprep.mubr.bf16.mxu0 %v6402_v31 }
  0xc3   :  { %5046 = vmatprep.mubr.bf16.mxu1 %v6402_v31 }
  0xc4   :  { %4965 = vmatpush3.bf16.msra.mxu0 %v5912_v51  ;;  %v5974_v51 = vld [vmem:[#allocation5 + $0x198] sm:$0xff]  }
  0xc5   :  { %5061 = vmatpush3.bf16.msra.mxu1 %v5913_v52  ;;  %4966 = vmatprep.subr.bf16.mxu0 %v5914_v53  ;;  %v6073_v52 = vld [vmem:[#allocation2 + $0x18] sm:$0xff]  }
  0xc6   :  { %5062 = vmatprep.subr.bf16.mxu1 %v5915_v54 }
  0xc7   :  { %4951 = vmatmul.mubr.bf16.gmra.mrb[12].mxu0 %v6404_v34 }
  0xc8   :  { %5047 = vmatmul.mubr.bf16.gmra.mrb[12].mxu1 %v6404_v34  ;;  %4967 = vmatpush3.bf16.msra.mxu0 %v5914_v53  ;;  %v5975_v53 = vld [vmem:[#allocation5 + $0x220] sm:$0xff]  }
  0xc9   :  { %5063 = vmatpush3.bf16.msra.mxu1 %v5915_v54  ;;  %4968 = vmatprep.subr.bf16.mxu0 %v5916_v55  ;;  %v6074_v54 = vld [vmem:[#allocation2 + $0x20] sm:$0xff]  }
  0xca   :  { %5064 = vmatprep.subr.bf16.mxu1 %v5917_v56  ;;  %4970 = vmatprep.mubr.bf16.mxu0 %v6430_v57 }
  0xcb   :  { %5066 = vmatprep.mubr.bf16.mxu1 %v6430_v57 }
  0xcc   :  { %4969 = vmatpush3.bf16.msra.mxu0 %v5916_v55  ;;  %v5976_v55 = vld [vmem:[#allocation5 + $0x1a0] sm:$0xff]  }
  0xcd   :  { %5065 = vmatpush3.bf16.msra.mxu1 %v5917_v56  ;;  %5082 = vmatprep.subr.bf16.mxu0 %v5920_v58  ;;  %v5977_v56 = vld [vmem:[#allocation5 + $0x228] sm:$0xff]  }
  0xce   :  { %5210 = vmatprep.subr.bf16.mxu1 %v5921_v59 }
  0xcf   :  { %4971 = vmatmul.mubr.bf16.vlgmr.msra.gmra.mrb[0].mxu0 %v6436_v60 }
  0xd0   :  { %5067 = vmatmul.mubr.bf16.vlgmr.msra.gmra.mrb[0].mxu1 %v6436_v60  ;;  %5083 = vmatpush3.bf16.msra.mxu0 %v5920_v58  ;;  %v5978_v58 = vld [vmem:[#allocation5 + $0x1a8] sm:$0xff]  }
  0xd1   :  { %5211 = vmatpush3.bf16.msra.mxu1 %v5921_v59  ;;  %5084 = vmatprep.subr.bf16.mxu0 %v5922_v61  ;;  %v6075_v59 = vld [vmem:[#allocation2 + $0x28] sm:$0xff]  }
  0xd2   :  { %5212 = vmatprep.subr.bf16.mxu1 %v5923_v62  ;;  %4974 = vmatprep.mubr.bf16.mxu0 %v6438_v63 }
  0xd3   :  { %5070 = vmatprep.mubr.bf16.mxu1 %v6438_v63 }
  0xd4   :  { %5085 = vmatpush3.bf16.msra.mxu0 %v5922_v61  ;;  %v5979_v61 = vld [vmem:[#allocation5 + $0x230] sm:$0xff]  }
  0xd5   :  { %5213 = vmatpush3.bf16.msra.mxu1 %v5923_v62  ;;  %5086 = vmatprep.subr.bf16.mxu0 %v5926_v0  ;;  %v6076_v62 = vld [vmem:[#allocation2 + $0x30] sm:$0xff]  }
  0xd6   :  { %5214 = vmatprep.subr.bf16.mxu1 %v5927_v1 }
  0xd7   :  { %4975 = vmatmul.mubr.bf16.gmra.mrb[4].mxu0 %v6444_v2 }
  0xd8   :  { %5071 = vmatmul.mubr.bf16.gmra.mrb[4].mxu1 %v6444_v2  ;;  %5087 = vmatpush3.bf16.msra.mxu0 %v5926_v0  ;;  %v5980_v0 = vld [vmem:[#allocation5 + $0x1b0] sm:$0xff]  }
  0xd9   :  { %5215 = vmatpush3.bf16.msra.mxu1 %v5927_v1  ;;  %5088 = vmatprep.subr.bf16.mxu0 %v5928_v3  ;;  %v5981_v1 = vld [vmem:[#allocation5 + $0x238] sm:$0xff]  }
  0xda   :  { %5216 = vmatprep.subr.bf16.mxu1 %v5929_v4  ;;  %4978 = vmatprep.mubr.bf16.mxu0 %v6446_v5 }
  0xdb   :  { %5074 = vmatprep.mubr.bf16.mxu1 %v6446_v5 }
  0xdc   :  { %5089 = vmatpush3.bf16.msra.mxu0 %v5928_v3  ;;  %v5982_v3 = vld [vmem:[#allocation5 + $0x1b8] sm:$0xff]  }
  0xdd   :  { %5217 = vmatpush3.bf16.msra.mxu1 %v5929_v4  ;;  %5090 = vmatprep.subr.bf16.mxu0 %v5932_v6  ;;  %v6077_v4 = vld [vmem:[#allocation2 + $0x38] sm:$0xff]  }
  0xde   :  { %5218 = vmatprep.subr.bf16.mxu1 %v5933_v7 }
  0xdf   :  { %4979 = vmatmul.mubr.bf16.gmra.mrb[8].mxu0 %v6452_v8 }
  0xe0   :  { %5075 = vmatmul.mubr.bf16.gmra.mrb[8].mxu1 %v6452_v8  ;;  %5091 = vmatpush3.bf16.msra.mxu0 %v5932_v6  ;;  %v6506_v6 = vld [vmem:[#allocation2 + $0x60] sm:$0xff]  }
  0xe1   :  { %5219 = vmatpush3.bf16.msra.mxu1 %v5933_v7  ;;  %5092 = vmatprep.subr.bf16.mxu0 %v5934_v9  ;;  %v5984_v7 = vld [vmem:[#allocation10] sm:$0xff]  }
  0xe2   :  { %5220 = vmatprep.subr.bf16.mxu1 %v5935_v10  ;;  %4982 = vmatprep.mubr.bf16.mxu0 %v6454_v12 }
  0xe3   :  { %5078 = vmatprep.mubr.bf16.mxu1 %v6454_v12 }
  0xe4   :  { %5093 = vmatpush3.bf16.msra.mxu0 %v5934_v9  ;;  %v5986_v9 = vld [vmem:[#allocation5 + $0x100] sm:$0xff]  }
  0xe5   :  { %5221 = vmatpush3.bf16.msra.mxu1 %v5935_v10  ;;  %5094 = vmatprep.subr.bf16.mxu0 %v5938_v13  ;;  %v6511_v10 = vld [vmem:[#allocation2 + $0x68] sm:$0xff]  }
  0xe6   :  { %5222 = vmatprep.subr.bf16.mxu1 %v5939_v14 }
  0xe7   :  { %4983 = vmatmul.mubr.bf16.gmra.mrb[12].mxu0 %v6460_v15 }
  0xe8   :  { %5079 = vmatmul.mubr.bf16.gmra.mrb[12].mxu1 %v6460_v15  ;;  %5095 = vmatpush3.bf16.msra.mxu0 %v5938_v13  ;;  %v5987_v13 = vld [vmem:[#allocation10 + $0x8] sm:$0xff]  }
  0xe9   :  { %5223 = vmatpush3.bf16.msra.mxu1 %v5939_v14  ;;  %5096 = vmatprep.subr.bf16.mxu0 %v5940_v16  ;;  %v5988_v14 = vld [vmem:[#allocation5 + $0x108] sm:$0xff]  }
  0xea   :  { %5224 = vmatprep.subr.bf16.mxu1 %v5941_v17  ;;  %5098 = vmatprep.mubr.bf16.mxu0 %v6382_v11  ;;  %v5949_v11 = vld [vmem:[#allocation5 + $0x90] sm:$0xff]  }
  0xeb   :  { %5226 = vmatprep.mubr.bf16.mxu1 %v6463_v18 }
  0xec   :  { %5097 = vmatpush3.bf16.msra.mxu0 %v5940_v16  ;;  %v6514_v16 = vld [vmem:[#allocation2 + $0x70] sm:$0xff]  }
  0xed   :  { %5225 = vmatpush3.bf16.msra.mxu1 %v5941_v17  ;;  %5114 = vmatprep.subr.bf16.mxu0 %v5943_v20  ;;  %v5992_v17 = vld [vmem:[#allocation5 + $0x110] sm:$0xff]  }
  0xee   :  { %5242 = vmatprep.subr.bf16.mxu1 %v5945_v21 }
  0xef   :  { %5099 = vmatmul.mubr.bf16.vlgmr.msra.gmra.mrb[16].mxu0 %v6386_v19  ;;  %v5952_v19 = vld [vmem:[#allocation5 + $0x98] sm:$0xff]  }
  0xf0   :  { %5227 = vmatmul.mubr.bf16.vlgmr.msra.gmra.mrb[16].mxu1 %v6468_v23  ;;  %5115 = vmatpush3.bf16.msra.mxu0 %v5943_v20  ;;  %v6519_v20 = vld [vmem:[#allocation2 + $0x78] sm:$0xff]  }
  0xf1   :  { %5243 = vmatpush3.bf16.msra.mxu1 %v5945_v21  ;;  %5116 = vmatprep.subr.bf16.mxu0 %v5946_v24  ;;  %v5994_v21 = vld [vmem:[#allocation5 + $0x118] sm:$0xff]  }
  0xf2   :  { %5244 = vmatprep.subr.bf16.mxu1 %v5947_v26  ;;  %5102 = vmatprep.mubr.bf16.mxu0 %v6388_v22  ;;  %v5955_v22 = vld [vmem:[#allocation5 + $0xa0] sm:$0xff]  }
  0xf3   :  { %5230 = vmatprep.mubr.bf16.mxu1 %v6471_v27 }
  0xf4   :  { %5117 = vmatpush3.bf16.msra.mxu0 %v5946_v24  ;;  %v6522_v24 = vld [vmem:[#allocation2 + $0x80] sm:$0xff]  }
  0xf5   :  { %5245 = vmatpush3.bf16.msra.mxu1 %v5947_v26  ;;  %5118 = vmatprep.subr.bf16.mxu0 %v5949_v11  ;;  %v6526_v26 = vld [vmem:[#allocation2 + $0x88] sm:$0xff]  }
  0xf6   :  { %5246 = vmatprep.subr.bf16.mxu1 %v5951_v29 }
  0xf7   :  { %5103 = vmatmul.mubr.bf16.gmra.mrb[20].mxu0 %v6394_v25  ;;  %v5958_v25 = vld [vmem:[#allocation5 + $0xa8] sm:$0xff]  }
  0xf8   :  { %5231 = vmatmul.mubr.bf16.gmra.mrb[20].mxu1 %v6476_v30  ;;  %5119 = vmatpush3.bf16.msra.mxu0 %v5949_v11  ;;  %v5998_v11 = vld [vmem:[#allocation5 + $0x120] sm:$0xff]  }
  0xf9   :  { %5247 = vmatpush3.bf16.msra.mxu1 %v5951_v29  ;;  %5120 = vmatprep.subr.bf16.mxu0 %v5952_v19  ;;  %v6000_v29 = vld [vmem:[#allocation5 + $0x128] sm:$0xff]  }
  0xfa   :  { %5248 = vmatprep.subr.bf16.mxu1 %v5953_v32  ;;  %5106 = vmatprep.mubr.bf16.mxu0 %v6396_v28  ;;  %v5961_v28 = vld [vmem:[#allocation5 + $0xb0] sm:$0xff]  }
  0xfb   :  { %5234 = vmatprep.mubr.bf16.mxu1 %v6479_v33 }
  0xfc   :  { %5121 = vmatpush3.bf16.msra.mxu0 %v5952_v19  ;;  %v6530_v19 = vld [vmem:[#allocation2 + $0x90] sm:$0xff]  }
  0xfd   :  { %5249 = vmatpush3.bf16.msra.mxu1 %v5953_v32  ;;  %5122 = vmatprep.subr.bf16.mxu0 %v5955_v22  ;;  %v6004_v32 = vld [vmem:[#allocation5 + $0x130] sm:$0xff]  }
  0xfe   :  { %5250 = vmatprep.subr.bf16.mxu1 %v5957_v35 }
  0xff   :  { %5107 = vmatmul.mubr.bf16.gmra.mrb[24].mxu0 %v6402_v31  ;;  %v5964_v31 = vld [vmem:[#allocation5 + $0xb8] sm:$0xff]  }
 0x100   :  { %5235 = vmatmul.mubr.bf16.gmra.mrb[24].mxu1 %v6484_v36  ;;  %5123 = vmatpush3.bf16.msra.mxu0 %v5955_v22  ;;  %v6535_v22 = vld [vmem:[#allocation2 + $0x98] sm:$0xff]  }
 0x101   :  { %5251 = vmatpush3.bf16.msra.mxu1 %v5957_v35  ;;  %5124 = vmatprep.subr.bf16.mxu0 %v5958_v25  ;;  %v6006_v35 = vld [vmem:[#allocation5 + $0x138] sm:$0xff]  }
 0x102   :  { %5252 = vmatprep.subr.bf16.mxu1 %v5959_v38  ;;  %5110 = vmatprep.mubr.bf16.mxu0 %v6404_v34  ;;  %v5967_v34 = vld [vmem:[#allocation5 + $0x200] sm:$0xff]  }
 0x103   :  { %5238 = vmatprep.mubr.bf16.mxu1 %v6487_v39 }
 0x104   :  { %5125 = vmatpush3.bf16.msra.mxu0 %v5958_v25  ;;  %v6007_v25 = vld [vmem:[#allocation8] sm:$0xff]  }
 0x105   :  { %5253 = vmatpush3.bf16.msra.mxu1 %v5959_v38  ;;  %5126 = vmatprep.subr.bf16.mxu0 %v5961_v28  ;;  %v6009_v38 = vld [vmem:[#allocation5 + $0x40] sm:$0xff]  }
 0x106   :  { %5254 = vmatprep.subr.bf16.mxu1 %v5963_v41 }
 0x107   :  { %5111 = vmatmul.mubr.bf16.gmra.mrb[28].mxu0 %v6410_v37  ;;  %v5970_v37 = vld [vmem:[#allocation5 + $0x188] sm:$0xff]  }
 0x108   :  { %5239 = vmatmul.mubr.bf16.gmra.mrb[28].mxu1 %v6492_v42  ;;  %5127 = vmatpush3.bf16.msra.mxu0 %v5961_v28  ;;  %v6008_v28 = vld [vmem:[#allocation8 + $0x8] sm:$0xff]  }
 0x109   :  { %5255 = vmatpush3.bf16.msra.mxu1 %v5963_v41  ;;  %5128 = vmatprep.subr.bf16.mxu0 %v5964_v31  ;;  %v6012_v41 = vld [vmem:[#allocation5 + $0x148] sm:$0xff]  }
 0x10a   :  { %5256 = vmatprep.subr.bf16.mxu1 %v5965_v43  ;;  %5130 = vmatprep.mubr.bf16.mxu0 %v6412_v40  ;;  %v5972_v40 = vld [vmem:[#allocation5 + $0x190] sm:$0xff]  }
 0x10b   :  { %5258 = vmatprep.mubr.bf16.mxu1 %v6495_v44 }
 0x10c   :  { %5129 = vmatpush3.bf16.msra.mxu0 %v5964_v31  ;;  %v6011_v31 = vld [vmem:[#allocation5 + $0x48] sm:$0xff]  }
 0x10d   :  { %5257 = vmatpush3.bf16.msra.mxu1 %v5965_v43  ;;  %5146 = vmatprep.subr.bf16.mxu0 %v5967_v34  ;;  %v6013_v43 = vld [vmem:[#allocation8 + $0x10] sm:$0xff]  }
 0x10e   :  { %5274 = vmatprep.subr.bf16.mxu1 %v5968_v45 }
 0x10f   :  { %5131 = vmatmul.mubr.bf16.vlgmr.msra.gmra.mrb[16].mxu0 %v6071_v47  ;;  %v6019_v47 = vld [vmem:[#allocation8 + $0x20] sm:$0xff]  }
 0x110   :  { %5259 = vmatmul.mubr.bf16.vlgmr.msra.gmra.mrb[16].mxu1 %v6463_v18  ;;  %5147 = vmatpush3.bf16.msra.mxu0 %v5967_v34  ;;  %v6015_v34 = vld [vmem:[#allocation5 + $0x50] sm:$0xff]  }
 0x111   :  { %5275 = vmatpush3.bf16.msra.mxu1 %v5968_v45  ;;  %5148 = vmatprep.subr.bf16.mxu0 %v5969_v46  ;;  %v6014_v45 = vld [vmem:[#allocation8 + $0x18] sm:$0xff]  }
 0x112   :  { %5276 = vmatprep.subr.bf16.mxu1 %v5970_v37  ;;  %5134 = vmatprep.mubr.bf16.mxu0 %v6072_v49  ;;  %v6021_v49 = vld [vmem:[#allocation5 + $0x60] sm:$0xff]  }
 0x113   :  { %5262 = vmatprep.mubr.bf16.mxu1 %v6468_v23 }
 0x114   :  { %5149 = vmatpush3.bf16.msra.mxu0 %v5969_v46  ;;  %v6018_v46 = vld [vmem:[#allocation5 + $0x158] sm:$0xff]  }
 0x115   :  { %5277 = vmatpush3.bf16.msra.mxu1 %v5970_v37  ;;  %5150 = vmatprep.subr.bf16.mxu0 %v5971_v48  ;;  %v6017_v37 = vld [vmem:[#allocation5 + $0x58] sm:$0xff]  }
 0x116   :  { %5278 = vmatprep.subr.bf16.mxu1 %v5972_v40 }
 0x117   :  { %5135 = vmatmul.mubr.bf16.gmra.mrb[20].mxu0 %v6073_v52  ;;  %v6025_v52 = vld [vmem:[#allocation8 + $0x30] sm:$0xff]  }
 0x118   :  { %5263 = vmatmul.mubr.bf16.gmra.mrb[20].mxu1 %v6471_v27  ;;  %5151 = vmatpush3.bf16.msra.mxu0 %v5971_v48  ;;  %v6022_v48 = vld [vmem:[#allocation5 + $0x160] sm:$0xff]  }
 0x119   :  { %5279 = vmatpush3.bf16.msra.mxu1 %v5972_v40  ;;  %5152 = vmatprep.subr.bf16.mxu0 %v5973_v50  ;;  %v6020_v40 = vld [vmem:[#allocation8 + $0x28] sm:$0xff]  }
 0x11a   :  { %5280 = vmatprep.subr.bf16.mxu1 %v5974_v51  ;;  %5138 = vmatprep.mubr.bf16.mxu0 %v6074_v54  ;;  %v6027_v54 = vld [vmem:[#allocation5 + $0x70] sm:$0xff]  }
 0x11b   :  { %5266 = vmatprep.mubr.bf16.mxu1 %v6476_v30 }
 0x11c   :  { %5153 = vmatpush3.bf16.msra.mxu0 %v5973_v50  ;;  %v6024_v50 = vld [vmem:[#allocation5 + $0x168] sm:$0xff]  }
 0x11d   :  { %5281 = vmatpush3.bf16.msra.mxu1 %v5974_v51  ;;  %5154 = vmatprep.subr.bf16.mxu0 %v5975_v53  ;;  %v6023_v51 = vld [vmem:[#allocation5 + $0x68] sm:$0xff]  }
 0x11e   :  { %5282 = vmatprep.subr.bf16.mxu1 %v5976_v55 }
 0x11f   :  { %5139 = vmatmul.mubr.bf16.gmra.mrb[24].mxu0 %v6075_v59  ;;  %v6032_v59 = vld [vmem:[#allocation5 + $0x80] sm:$0xff]  }
 0x120   :  { %5267 = vmatmul.mubr.bf16.gmra.mrb[24].mxu1 %v6479_v33  ;;  %5155 = vmatpush3.bf16.msra.mxu0 %v5975_v53  ;;  %v6028_v53 = vld [vmem:[#allocation5 + $0x170] sm:$0xff]  }
 0x121   :  { %5283 = vmatpush3.bf16.msra.mxu1 %v5976_v55  ;;  %5156 = vmatprep.subr.bf16.mxu0 %v5977_v56  ;;  %v6026_v55 = vld [vmem:[#allocation8 + $0x38] sm:$0xff]  }
 0x122   :  { %5284 = vmatprep.subr.bf16.mxu1 %v5978_v58  ;;  %5142 = vmatprep.mubr.bf16.mxu0 %v6076_v62  ;;  %v6034_v62 = vld [vmem:[#allocation5 + $0x88] sm:$0xff]  }
 0x123   :  { %5270 = vmatprep.mubr.bf16.mxu1 %v6484_v36 }
 0x124   :  { %5157 = vmatpush3.bf16.msra.mxu0 %v5977_v56  ;;  %v6030_v56 = vld [vmem:[#allocation5 + $0x178] sm:$0xff]  }
 0x125   :  { %5285 = vmatpush3.bf16.msra.mxu1 %v5978_v58  ;;  %5158 = vmatprep.subr.bf16.mxu0 %v5979_v61  ;;  %v6029_v58 = vld [vmem:[#allocation5 + $0x78] sm:$0xff]  }
 0x126   :  { %5286 = vmatprep.subr.bf16.mxu1 %v5980_v0 }
 0x127   :  { %5143 = vmatmul.mubr.bf16.gmra.mrb[28].mxu0 %v6077_v4  ;;  %v6038_v4 = vld [vmem:[#allocation5 + $0x98] sm:$0xff]  }
 0x128   :  { %5271 = vmatmul.mubr.bf16.gmra.mrb[28].mxu1 %v6487_v39  ;;  %5159 = vmatpush3.bf16.msra.mxu0 %v5979_v61  ;;  %v6031_v61 = vld [vmem:[#allocation5 + $0x1c0] sm:$0xff]  }
 0x129   :  { %5287 = vmatpush3.bf16.msra.mxu1 %v5980_v0  ;;  %5160 = vmatprep.subr.bf16.mxu0 %v5981_v1  ;;  %v6033_v0 = vld [vmem:[#allocation5 + $0x1c8] sm:$0xff]  }
 0x12a   :  { %5288 = vmatprep.subr.bf16.mxu1 %v5982_v3  ;;  %5162 = vmatprep.mubr.bf16.mxu0 %v6430_v57  ;;  %v5990_v57 = vld [vmem:[#allocation10 + $0x10] sm:$0xff]  }
 0x12b   :  { %5290 = vmatprep.mubr.bf16.mxu1 %v6506_v6 }
 0x12c   :  { %5161 = vmatpush3.bf16.msra.mxu0 %v5981_v1  ;;  %v6036_v1 = vld [vmem:[#allocation5 + $0x90] sm:$0xff]  }
 0x12d   :  { %5289 = vmatpush3.bf16.msra.mxu1 %v5982_v3  ;;  %5178 = vmatprep.subr.bf16.mxu0 %v5984_v7  ;;  %v6035_v3 = vld [vmem:[#allocation5 + $0x1d0] sm:$0xff]  }
 0x12e   :  { %5306 = vmatprep.subr.bf16.mxu1 %v5986_v9 }
 0x12f   :  { %5163 = vmatmul.mubr.bf16.vlgmr.msra.gmra.mrb[16].mxu0 %v6436_v60  ;;  %v5993_v60 = vld [vmem:[#allocation10 + $0x18] sm:$0xff]  }
 0x130   :  { %5291 = vmatmul.mubr.bf16.vlgmr.msra.gmra.mrb[16].mxu1 %v6511_v10  ;;  %5179 = vmatpush3.bf16.msra.mxu0 %v5984_v7  ;;  %v6037_v7 = vld [vmem:[#allocation5 + $0x1d8] sm:$0xff]  }
 0x131   :  { %5307 = vmatpush3.bf16.msra.mxu1 %v5986_v9  ;;  %5180 = vmatprep.subr.bf16.mxu0 %v5987_v13  ;;  %v6042_v9 = vld [vmem:[#allocation5 + $0xa8] sm:$0xff]  }
 0x132   :  { %5308 = vmatprep.subr.bf16.mxu1 %v5988_v14  ;;  %5166 = vmatprep.mubr.bf16.mxu0 %v6438_v63  ;;  %v5996_v63 = vld [vmem:[#allocation10 + $0x20] sm:$0xff]  }
 0x133   :  { %5294 = vmatprep.mubr.bf16.mxu1 %v6514_v16 }
 0x134   :  { %5181 = vmatpush3.bf16.msra.mxu0 %v5987_v13  ;;  %v6041_v13 = vld [vmem:[#allocation5 + $0x1e8] sm:$0xff]  }
 0x135   :  { %5309 = vmatpush3.bf16.msra.mxu1 %v5988_v14  ;;  %5182 = vmatprep.subr.bf16.mxu0 %v5990_v57  ;;  %v6043_v14 = vld [vmem:[#allocation5 + $0x1f0] sm:$0xff]  }
 0x136   :  { %5310 = vmatprep.subr.bf16.mxu1 %v5992_v17 }
 0x137   :  { %5167 = vmatmul.mubr.bf16.gmra.mrb[20].mxu0 %v6444_v2  ;;  %v5999_v2 = vld [vmem:[#allocation10 + $0x28] sm:$0xff]  }
 0x138   :  { %5295 = vmatmul.mubr.bf16.gmra.mrb[20].mxu1 %v6519_v20  ;;  %5183 = vmatpush3.bf16.msra.mxu0 %v5990_v57  ;;  %v6046_v57 = vld [vmem:[#allocation5 + $0xb8] sm:$0xff]  }
 0x139   :  { %5311 = vmatpush3.bf16.msra.mxu1 %v5992_v17  ;;  %5184 = vmatprep.subr.bf16.mxu0 %v5993_v60  ;;  %v6045_v17 = vld [vmem:[#allocation5 + $0x1f8] sm:$0xff]  }
 0x13a   :  { %5312 = vmatprep.subr.bf16.mxu1 %v5994_v21  ;;  %5170 = vmatprep.mubr.bf16.mxu0 %v6446_v5  ;;  %v6002_v5 = vld [vmem:[#allocation10 + $0x30] sm:$0xff]  }
 0x13b   :  { %5298 = vmatprep.mubr.bf16.mxu1 %v6522_v24 }
 0x13c   :  { %5185 = vmatpush3.bf16.msra.mxu0 %v5993_v60  ;;  %v6047_v60 = vld [vmem:[#allocation5 + $0x200] sm:$0xff]  }
 0x13d   :  { %5313 = vmatpush3.bf16.msra.mxu1 %v5994_v21  ;;  %5186 = vmatprep.subr.bf16.mxu0 %v5996_v63  ;;  %v6048_v21 = vld [vmem:[#allocation10] sm:$0xff]  }
 0x13e   :  { %5314 = vmatprep.subr.bf16.mxu1 %v5998_v11 }
 0x13f   :  { %5171 = vmatmul.mubr.bf16.gmra.mrb[24].mxu0 %v6452_v8  ;;  %v6005_v8 = vld [vmem:[#allocation10 + $0x38] sm:$0xff]  }
 0x140   :  { %5299 = vmatmul.mubr.bf16.gmra.mrb[24].mxu1 %v6526_v26  ;;  %5187 = vmatpush3.bf16.msra.mxu0 %v5996_v63  ;;  %v6049_v63 = vld [vmem:[#allocation5 + $0x208] sm:$0xff]  }
 0x141   :  { %5315 = vmatpush3.bf16.msra.mxu1 %v5998_v11  ;;  %5188 = vmatprep.subr.bf16.mxu0 %v5999_v2  ;;  %v6050_v11 = vld [vmem:[#allocation10 + $0x8] sm:$0xff]  }
 0x142   :  { %5316 = vmatprep.subr.bf16.mxu1 %v6000_v29  ;;  %5174 = vmatprep.mubr.bf16.mxu0 %v6454_v12  ;;  %v6010_v12 = vld [vmem:[#allocation5 + $0x140] sm:$0xff]  }
 0x143   :  { %5302 = vmatprep.mubr.bf16.mxu1 %v6530_v19 }
 0x144   :  { %5189 = vmatpush3.bf16.msra.mxu0 %v5999_v2  ;;  %v6078_v2 = vld [vmem:[#allocation2 + $0x58] sm:$0xff]  }
 0x145   :  { %5317 = vmatpush3.bf16.msra.mxu1 %v6000_v29  ;;  %5190 = vmatprep.subr.bf16.mxu0 %v6002_v5  ;;  %v6052_v29 = vld [vmem:[#allocation10 + $0x10] sm:$0xff]  }
 0x146   :  { %5318 = vmatprep.subr.bf16.mxu1 %v6004_v32 }
 0x147   :  { %5175 = vmatmul.mubr.bf16.gmra.mrb[28].mxu0 %v6460_v15  ;;  %v6016_v15 = vld [vmem:[#allocation5 + $0x150] sm:$0xff]  }
 0x148   :  { %5303 = vmatmul.mubr.bf16.gmra.mrb[28].mxu1 %v6535_v22  ;;  %5191 = vmatpush3.bf16.msra.mxu0 %v6002_v5  ;;  %v6079_v5 = vld [vmem:[#allocation2 + $0x60] sm:$0xff]  }
 0x149   :  { %5319 = vmatpush3.bf16.msra.mxu1 %v6004_v32  ;;  %5192 = vmatprep.subr.bf16.mxu0 %v6005_v8  ;;  %v6054_v32 = vld [vmem:[#allocation10 + $0x18] sm:$0xff]  }
 0x14a   :  { %5320 = vmatprep.subr.bf16.mxu1 %v6006_v35  ;;  %5194 = vmatprep.mubr.bf16.mxu0 %v6007_v25  ;;  %v6056_v25 = vld [vmem:[#allocation10 + $0x20] sm:$0xff]  }
 0x14b   :  { %5322 = vmatprep.mubr.bf16.mxu1 %v6463_v18 }
 0x14c   :  { %5193 = vmatpush3.bf16.msra.mxu0 %v6005_v8  ;;  %v6080_v8 = vld [vmem:[#allocation2 + $0x68] sm:$0xff]  }
 0x14d   :  { %5321 = vmatpush3.bf16.msra.mxu1 %v6006_v35  ;;  %5402 = vmatprep.subr.bf16.mxu0 %v6010_v12  ;;  %v6055_v35 = vld [vmem:[#allocation5 + $0x220] sm:$0xff]  }
 0x14e   :  { %5338 = vmatprep.subr.bf16.mxu1 %v6009_v38 }
 0x14f   :  { %5195 = vmatmul.mubr.bf16.vlgmr.msra.gmra.mrb[0].mxu0 %v6008_v28  ;;  %v6059_v28 = vld [vmem:[#allocation5 + $0x230] sm:$0xff]  }
 0x150   :  { %5323 = vmatmul.mubr.bf16.vlgmr.msra.gmra.mrb[32].mxu1 %v6468_v23  ;;  %5403 = vmatpush3.bf16.msra.mxu0 %v6010_v12  ;;  %v6057_v12 = vld [vmem:[#allocation5 + $0x228] sm:$0xff]  }
 0x151   :  { %5339 = vmatpush3.bf16.msra.mxu1 %v6009_v38  ;;  %5404 = vmatprep.subr.bf16.mxu0 %v6012_v41  ;;  %v6058_v38 = vld [vmem:[#allocation10 + $0x28] sm:$0xff]  }
 0x152   :  { %5340 = vmatprep.subr.bf16.mxu1 %v6011_v31  ;;  %5198 = vmatprep.mubr.bf16.mxu0 %v6013_v43 }
 0x153   :  { %5326 = vmatprep.mubr.bf16.mxu1 %v6471_v27 }
 0x154   :  { %5405 = vmatpush3.bf16.msra.mxu0 %v6012_v41  ;;  %v6060_v41 = vld [vmem:[#allocation10 + $0x30] sm:$0xff]  }
 0x155   :  { %5341 = vmatpush3.bf16.msra.mxu1 %v6011_v31  ;;  %5406 = vmatprep.subr.bf16.mxu0 %v6016_v15 }
 0x156   :  { %5342 = vmatprep.subr.bf16.mxu1 %v6015_v34 }
 0x157   :  { %5199 = vmatmul.mubr.bf16.gmra.mrb[4].mxu0 %v6014_v45 }
 0x158   :  { %5327 = vmatmul.mubr.bf16.gmra.mrb[36].mxu1 %v6476_v30  ;;  %5407 = vmatpush3.bf16.msra.mxu0 %v6016_v15 }
 0x159   :  { %5343 = vmatpush3.bf16.msra.mxu1 %v6015_v34  ;;  %5408 = vmatprep.subr.bf16.mxu0 %v6018_v46 }
 0x15a   :  { %5344 = vmatprep.subr.bf16.mxu1 %v6017_v37  ;;  %5202 = vmatprep.mubr.bf16.mxu0 %v6019_v47 }
 0x15b   :  { %5330 = vmatprep.mubr.bf16.mxu1 %v6479_v33 }
 0x15c   :  { %5409 = vmatpush3.bf16.msra.mxu0 %v6018_v46  ;;  %v6062_v46 = vld [vmem:[#allocation10 + $0x38] sm:$0xff]  }
 0x15d   :  { %5345 = vmatpush3.bf16.msra.mxu1 %v6017_v37  ;;  %5410 = vmatprep.subr.bf16.mxu0 %v6022_v48 }
 0x15e   :  { %5346 = vmatprep.subr.bf16.mxu1 %v6021_v49 }
 0x15f   :  { %5203 = vmatmul.mubr.bf16.gmra.mrb[8].mxu0 %v6020_v40 }
 0x160   :  { %5331 = vmatmul.mubr.bf16.gmra.mrb[40].mxu1 %v6484_v36  ;;  %5411 = vmatpush3.bf16.msra.mxu0 %v6022_v48  ;;  %v6063_v48 = vld [vmem:[#allocation8 + $0x40] sm:$0xff]  }
 0x161   :  { %5347 = vmatpush3.bf16.msra.mxu1 %v6021_v49  ;;  %5412 = vmatprep.subr.bf16.mxu0 %v6024_v50 }
 0x162   :  { %5348 = vmatprep.subr.bf16.mxu1 %v6023_v51  ;;  %5206 = vmatprep.mubr.bf16.mxu0 %v6025_v52 }
 0x163   :  { %5334 = vmatprep.mubr.bf16.mxu1 %v6487_v39 }
 0x164   :  { %5413 = vmatpush3.bf16.msra.mxu0 %v6024_v50 }
 0x165   :  { %5349 = vmatpush3.bf16.msra.mxu1 %v6023_v51  ;;  %5414 = vmatprep.subr.bf16.mxu0 %v6028_v53  ;;  %v6064_v51 = vld [vmem:[#allocation8 + $0x48] sm:$0xff]  }
 0x166   :  { %5350 = vmatprep.subr.bf16.mxu1 %v6027_v54 }
 0x167   :  { %5207 = vmatmul.mubr.bf16.gmra.mrb[12].mxu0 %v6026_v55 }
 0x168   :  { %5335 = vmatmul.mubr.bf16.gmra.mrb[44].mxu1 %v6492_v42  ;;  %5415 = vmatpush3.bf16.msra.mxu0 %v6028_v53 }
 0x169   :  { %5351 = vmatpush3.bf16.msra.mxu1 %v6027_v54  ;;  %5416 = vmatprep.subr.bf16.mxu0 %v6030_v56  ;;  %v6065_v54 = vld [vmem:[#allocation8 + $0x50] sm:$0xff]  }
 0x16a   :  { %5352 = vmatprep.subr.bf16.mxu1 %v6029_v58  ;;  %5354 = vmatprep.mubr.bf16.mxu1 %v6495_v44 }
 0x16b   :  { %5418 = vmatprep.mubr.bf16.mxu0 %v6463_v18 }
 0x16c   :  { %5417 = vmatpush3.bf16.msra.mxu0 %v6030_v56 }
 0x16d   :  { %5353 = vmatpush3.bf16.msra.mxu1 %v6029_v58  ;;  %5434 = vmatprep.subr.bf16.mxu0 %v6032_v59 }
 0x16e   :  { %5370 = vmatprep.subr.bf16.mxu1 %v6031_v61 }
 0x16f   :  { %5419 = vmatmul.mubr.bf16.vlgmr.msra.gmra.mrb[32].mxu0 %v6468_v23 }
 0x170   :  { %5355 = vmatmul.mubr.bf16.vlgmr.msra.gmra.mrb[32].mxu1 %v6463_v18  ;;  %5435 = vmatpush3.bf16.msra.mxu0 %v6032_v59  ;;  %v6040_v18 = vld [vmem:[#allocation5 + $0xa0] sm:$0xff]  }
 0x171   :  { %5371 = vmatpush3.bf16.msra.mxu1 %v6031_v61  ;;  %5436 = vmatprep.subr.bf16.mxu0 %v6034_v62 }
 0x172   :  { %5372 = vmatprep.subr.bf16.mxu1 %v6033_v0  ;;  %5358 = vmatprep.mubr.bf16.mxu1 %v6468_v23  ;;  %v6039_v23 = vld [vmem:[#allocation5 + $0x1e0] sm:$0xff]  }
 0x173   :  { %5422 = vmatprep.mubr.bf16.mxu0 %v6471_v27 }
 0x174   :  { %5437 = vmatpush3.bf16.msra.mxu0 %v6034_v62 }
 0x175   :  { %5373 = vmatpush3.bf16.msra.mxu1 %v6033_v0  ;;  %5438 = vmatprep.subr.bf16.mxu0 %v6036_v1 }
 0x176   :  { %5374 = vmatprep.subr.bf16.mxu1 %v6035_v3 }
 0x177   :  { %5423 = vmatmul.mubr.bf16.gmra.mrb[36].mxu0 %v6476_v30 }
 0x178   :  { %5359 = vmatmul.mubr.bf16.gmra.mrb[36].mxu1 %v6471_v27  ;;  %5439 = vmatpush3.bf16.msra.mxu0 %v6036_v1  ;;  %v6044_v27 = vld [vmem:[#allocation5 + $0xb0] sm:$0xff]  }
 0x179   :  { %5375 = vmatpush3.bf16.msra.mxu1 %v6035_v3  ;;  %5440 = vmatprep.subr.bf16.mxu0 %v6038_v4 }
 0x17a   :  { %5376 = vmatprep.subr.bf16.mxu1 %v6037_v7  ;;  %5362 = vmatprep.mubr.bf16.mxu1 %v6476_v30 }
 0x17b   :  { %5426 = vmatprep.mubr.bf16.mxu0 %v6479_v33 }
 0x17c   :  { %5441 = vmatpush3.bf16.msra.mxu0 %v6038_v4  ;;  %v6066_v4 = vld [vmem:[#allocation8 + $0x58] sm:$0xff]  }
 0x17d   :  { %5377 = vmatpush3.bf16.msra.mxu1 %v6037_v7  ;;  %5442 = vmatprep.subr.bf16.mxu0 %v6040_v18 }
 0x17e   :  { %5378 = vmatprep.subr.bf16.mxu1 %v6039_v23 }
 0x17f   :  { %5427 = vmatmul.mubr.bf16.gmra.mrb[40].mxu0 %v6484_v36 }
 0x180   :  { %5363 = vmatmul.mubr.bf16.gmra.mrb[40].mxu1 %v6479_v33  ;;  %5443 = vmatpush3.bf16.msra.mxu0 %v6040_v18 }
 0x181   :  { %5379 = vmatpush3.bf16.msra.mxu1 %v6039_v23  ;;  %5444 = vmatprep.subr.bf16.mxu0 %v6042_v9  ;;  %v6067_v23 = vld [vmem:[#allocation8 + $0x60] sm:$0xff]  }
 0x182   :  { %5380 = vmatprep.subr.bf16.mxu1 %v6041_v13  ;;  %5366 = vmatprep.mubr.bf16.mxu1 %v6484_v36 }
 0x183   :  { %5430 = vmatprep.mubr.bf16.mxu0 %v6487_v39 }
 0x184   :  { %5445 = vmatpush3.bf16.msra.mxu0 %v6042_v9 }
 0x185   :  { %5381 = vmatpush3.bf16.msra.mxu1 %v6041_v13  ;;  %5446 = vmatprep.subr.bf16.mxu0 %v6044_v27 }
 0x186   :  { %5382 = vmatprep.subr.bf16.mxu1 %v6043_v14 }
 0x187   :  { %5431 = vmatmul.mubr.bf16.gmra.mrb[44].mxu0 %v6492_v42  ;;  %v6051_v42 = vld [vmem:[#allocation5 + $0x210] sm:$0xff]  }
 0x188   :  { %5367 = vmatmul.mubr.bf16.gmra.mrb[44].mxu1 %v6487_v39  ;;  %5447 = vmatpush3.bf16.msra.mxu0 %v6044_v27 }
 0x189   :  { %5383 = vmatpush3.bf16.msra.mxu1 %v6043_v14  ;;  %5448 = vmatprep.subr.bf16.mxu0 %v6046_v57 }
 0x18a   :  { %5384 = vmatprep.subr.bf16.mxu1 %v6045_v17  ;;  %5386 = vmatprep.mubr.bf16.mxu1 %v6506_v6 }
 0x18b   :  { %5450 = vmatprep.mubr.bf16.mxu0 %v6495_v44  ;;  %v6053_v44 = vld [vmem:[#allocation5 + $0x218] sm:$0xff]  }
 0x18c   :  { %5449 = vmatpush3.bf16.msra.mxu0 %v6046_v57 }
 0x18d   :  { %5385 = vmatpush3.bf16.msra.mxu1 %v6045_v17  ;;  %5466 = vmatprep.subr.bf16.mxu0 %v6047_v60 }
 0x18e   :  { %5498 = vmatprep.subr.bf16.mxu1 %v6048_v21 }
 0x18f   :  { %5451 = vmatmul.mubr.bf16.vlgmr.msra.gmra.mrb[32].mxu0 %v6078_v2 }
 0x190   :  { %5387 = vmatmul.mubr.bf16.vlgmr.msra.gmra.mrb[32].mxu1 %v6511_v10  ;;  %5467 = vmatpush3.bf16.msra.mxu0 %v6047_v60 }
 0x191   :  { %5499 = vmatpush3.bf16.msra.mxu1 %v6048_v21  ;;  %5468 = vmatprep.subr.bf16.mxu0 %v6049_v63 }
 0x192   :  { %5500 = vmatprep.subr.bf16.mxu1 %v6050_v11  ;;  %5390 = vmatprep.mubr.bf16.mxu1 %v6514_v16 }
 0x193   :  { %5454 = vmatprep.mubr.bf16.mxu0 %v6079_v5 }
 0x194   :  { %5469 = vmatpush3.bf16.msra.mxu0 %v6049_v63  ;;  %v6068_v63 = vld [vmem:[#allocation8 + $0x68] sm:$0xff]  }
 0x195   :  { %5501 = vmatpush3.bf16.msra.mxu1 %v6050_v11  ;;  %5470 = vmatprep.subr.bf16.mxu0 %v6051_v42 }
 0x196   :  { %5502 = vmatprep.subr.bf16.mxu1 %v6052_v29 }
 0x197   :  { %5455 = vmatmul.mubr.bf16.gmra.mrb[36].mxu0 %v6080_v8 }
 0x198   :  { %5391 = vmatmul.mubr.bf16.gmra.mrb[36].mxu1 %v6519_v20  ;;  %5471 = vmatpush3.bf16.msra.mxu0 %v6051_v42  ;;  %v6069_v42 = vld [vmem:[#allocation8 + $0x70] sm:$0xff]  }
 0x199   :  { %5503 = vmatpush3.bf16.msra.mxu1 %v6052_v29  ;;  %5472 = vmatprep.subr.bf16.mxu0 %v6053_v44 }
 0x19a   :  { %5504 = vmatprep.subr.bf16.mxu1 %v6054_v32  ;;  %5394 = vmatprep.mubr.bf16.mxu1 %v6522_v24 }
 0x19b   :  { %5458 = vmatprep.mubr.bf16.mxu0 %v6476_v30 }
 0x19c   :  { %5473 = vmatpush3.bf16.msra.mxu0 %v6053_v44 }
 0x19d   :  { %5505 = vmatpush3.bf16.msra.mxu1 %v6054_v32  ;;  %5474 = vmatprep.subr.bf16.mxu0 %v6055_v35 }
 0x19e   :  { %5506 = vmatprep.subr.bf16.mxu1 %v6056_v25 }
 0x19f   :  { %5459 = vmatmul.mubr.bf16.gmra.mrb[40].mxu0 %v6479_v33  ;;  %v6061_v33 = vld [vmem:[#allocation5 + $0x238] sm:$0xff]  }
 0x1a0   :  { %5395 = vmatmul.mubr.bf16.gmra.mrb[40].mxu1 %v6526_v26  ;;  %5475 = vmatpush3.bf16.msra.mxu0 %v6055_v35 }
 0x1a1   :  { %5507 = vmatpush3.bf16.msra.mxu1 %v6056_v25  ;;  %5476 = vmatprep.subr.bf16.mxu0 %v6057_v12 }
 0x1a2   :  { %5508 = vmatprep.subr.bf16.mxu1 %v6058_v38  ;;  %5398 = vmatprep.mubr.bf16.mxu1 %v6530_v19 }
 0x1a3   :  { %v5068_v31 = vpop.f32.mrb[0].mxu1  ;;  %5462 = vmatprep.mubr.bf16.mxu0 %v6484_v36 }
 0x1a4   :  { %v6574_v30 = vpop.f32.mrb[1].mxu1  ;;  %5477 = vmatpush3.bf16.msra.mxu0 %v6057_v12  ;;  %v1263_v15 = vrot.slane %v5068_v31, 1  ;;  %v6070_v12 = vld [vmem:[#allocation8 + $0x78] sm:$0xff]  }
 0x1a5   :  { %v5069_v43 = vpop.f32.mrb[2].mxu1  ;;  %5509 = vmatpush3.bf16.msra.mxu1 %v6058_v38  ;;  %5478 = vmatprep.subr.bf16.mxu0 %v6059_v28  ;;  %v1260_v37 = vrot.slane %v6574_v30, 1 }
 0x1a6   :  { %v1265_v34 = vrot.slane %v5069_v43, 1  ;;  %v1167_v45 = vpop.f32.mrb[3].mxu1  ;;  %5510 = vmatprep.subr.bf16.mxu1 %v6060_v41 }
 0x1a7   :  { %v1261_v47 = vrot.slane %v1167_v45, 1  ;;  %5463 = vmatmul.mubr.bf16.gmra.mrb[44].mxu0 %v6487_v39 }
 0x1a8   :  { %v6579_v36 = vsel %vm1259_vm0, %v1263_v15, %v1265_v34  ;;  %5399 = vmatmul.mubr.bf16.gmra.mrb[44].mxu1 %v6535_v22  ;;  %5479 = vmatpush3.bf16.msra.mxu0 %v6059_v28  ;;  %v6641_v28 = vld [vmem:[#allocation7] ss:$0 sm:$0xff] }
 0x1a9   :  { %v6585_v49 = vsel %vm1259_vm0, %v1260_v37, %v1261_v47  ;;  %v6588_v40 = vsel %vm1259_vm0, %v1261_v47, %v1263_v15  ;;  %5511 = vmatpush3.bf16.msra.mxu1 %v6060_v41  ;;  %5480 = vmatprep.subr.bf16.mxu0 %v6061_v33  ;;  %v5530_v15 = vadd.f32 %v6641_v28, %v6579_v36 }
 0x1aa   :  { %5512 = vmatprep.subr.bf16.mxu1 %v6062_v46  ;;  %5482 = vmatprep.mubr.bf16.mxu0 %v6506_v6  ;;  %v5539_v45 = vadd.f32 %v6641_v28, %v6588_v40 }
 0x1ab   :  { %v5072_v39 = vpop.f32.mrb[4].mxu1  ;;  %5514 = vmatprep.mubr.bf16.mxu1 %v6063_v48 }
 0x1ac   :  { %v1180_v50 = vpop.f32.mrb[5].mxu1  ;;  %5481 = vmatpush3.bf16.msra.mxu0 %v6061_v33  ;;  %v1271_v55 = vrot.slane %v5072_v39, 1 }
 0x1ad   :  { %v1267_v52 = vrot.slane %v1180_v50, 1  ;;  %v5073_v53 = vpop.f32.mrb[6].mxu1  ;;  %5513 = vmatpush3.bf16.msra.mxu1 %v6062_v46 }
 0x1ae   :  { %v1273_v56 = vrot.slane %v5073_v53, 1  ;;  %v1183_v58 = vpop.f32.mrb[7].mxu1 }
 0x1af   :  { %v6592_v59 = vsel %vm1259_vm0, %v1265_v34, %v1267_v52  ;;  %v1269_v61 = vrot.slane %v1183_v58, 1  ;;  %5483 = vmatmul.mubr.bf16.vlgmr.msra.gmra.mrb[32].mxu0 %v6511_v10 }
 0x1b0   :  { %v6596_v6 = vsel %vm1259_vm0, %v1271_v55, %v1273_v56  ;;  %5515 = vmatmul.mubr.bf16.vlgmr.msra.gmra.mrb[16].mxu1 %v6064_v51  ;;  %5486 = vmatprep.mubr.bf16.mxu0 %v6514_v16  ;;  %v5536_v40 = vadd.f32 %v6641_v28, %v6592_v59 }
 0x1b1   :  { %v6600_v62 = vsel %vm1259_vm0, %v1267_v52, %v1269_v61  ;;  %v6603_v0 = vsel %vm1259_vm0, %v1269_v61, %v1271_v55  ;;  %5518 = vmatprep.mubr.bf16.mxu1 %v6065_v54  ;;  %v5542_v58 = vadd.f32 %v6641_v28, %v6596_v6 }
 0x1b3   :  { %v5076_v1 = vpop.f32.mrb[8].mxu1 }
 0x1b4   :  { %v1196_v3 = vpop.f32.mrb[9].mxu1  ;;  %v1279_v10 = vrot.slane %v5076_v1, 1 }
 0x1b5   :  { %v1275_v7 = vrot.slane %v1196_v3, 1  ;;  %v5077_v18 = vpop.f32.mrb[10].mxu1  ;;  %v5545_v3 = vadd.f32 %v6641_v28, %v6600_v62 }
 0x1b6   :  { %v1281_v9 = vrot.slane %v5077_v18, 1  ;;  %v1199_v13 = vpop.f32.mrb[11].mxu1 }
 0x1b7   :  { %v6606_v27 = vsel %vm1259_vm0, %v1273_v56, %v1275_v7  ;;  %v1277_v16 = vrot.slane %v1199_v13, 1  ;;  %5487 = vmatmul.mubr.bf16.gmra.mrb[36].mxu0 %v6519_v20 }
 0x1b8   :  { %v6610_v14 = vsel %vm1259_vm0, %v1279_v10, %v1281_v9  ;;  %5519 = vmatmul.mubr.bf16.gmra.mrb[20].mxu1 %v6066_v4  ;;  %5490 = vmatprep.mubr.bf16.mxu0 %v6522_v24  ;;  %v5551_v4 = vadd.f32 %v6641_v28, %v6603_v0  ;;  %v5548_v0 = vadd.f32 %v6641_v28, %v6606_v27 }
 0x1b9   :  { %v6614_v57 = vsel %vm1259_vm0, %v1275_v7, %v1277_v16  ;;  %v6617_v17 = vsel %vm1259_vm0, %v1277_v16, %v1279_v10  ;;  %5522 = vmatprep.mubr.bf16.mxu1 %v6067_v23 }
 0x1bb   :  { %v5080_v60 = vpop.f32.mrb[12].mxu1 }
 0x1bc   :  { %v1212_v21 = vpop.f32.mrb[13].mxu1  ;;  %v1287_v20 = vrot.slane %v5080_v60, 1 }
 0x1bd   :  { %v1283_v11 = vrot.slane %v1212_v21, 1  ;;  %v5081_v2 = vpop.f32.mrb[14].mxu1 }
 0x1be   :  { %v1289_v29 = vrot.slane %v5081_v2, 1  ;;  %v1215_v5 = vpop.f32.mrb[15].mxu1  ;;  %v5554_v2 = vadd.f32 %v6641_v28, %v6610_v14 }
 0x1bf   :  { %v6620_v44 = vsel %vm1259_vm0, %v1281_v9, %v1283_v11  ;;  %v1285_v24 = vrot.slane %v1215_v5, 1  ;;  %5491 = vmatmul.mubr.bf16.gmra.mrb[40].mxu0 %v6526_v26  ;;  %v5563_v5 = vadd.f32 %v6641_v28, %v6617_v17 }
 0x1c0   :  { %v6624_v32 = vsel %vm1259_vm0, %v1287_v20, %v1289_v29  ;;  %v6629_v8 = vsel %vm1259_vm0, %v1289_v29, %v1260_v37  ;;  %5523 = vmatmul.mubr.bf16.gmra.mrb[24].mxu1 %v6068_v63  ;;  %5494 = vmatprep.mubr.bf16.mxu0 %v6530_v19  ;;  %v5557_v29 = vadd.f32 %v6641_v28, %v6614_v57 }
 0x1c1   :  { %v6633_v35 = vsel %vm1259_vm0, %v1283_v11, %v1285_v24  ;;  %v6636_v25 = vsel %vm1259_vm0, %v1285_v24, %v1287_v20  ;;  %5526 = vmatprep.mubr.bf16.mxu1 %v6069_v42  ;;  %v5560_v17 = vadd.f32 %v6641_v28, %v6620_v44 }
 0x1c2   :  { %v5575_v44 = vadd.f32 %v6641_v28, %v6636_v25 }
 0x1c7   :  { %5495 = vmatmul.mubr.bf16.gmra.mrb[44].mxu0 %v6535_v22  ;;  %v5533_v22 = vadd.f32 %v6641_v28, %v6585_v49 }
 0x1c8   :  { %5527 = vmatmul.mubr.bf16.gmra.mrb[28].mxu1 %v6070_v12 }
 0x202   :  { %v5164_v26 = vpop.f32.mrb[16].mxu0 }
 0x203   :  { %v6639_v38 = vpop.f32.mrb[17].mxu0  ;;  %v1847_v31 = vrot.slane %v5164_v26, 2 }
 0x204   :  { %v5165_v41 = vpop.f32.mrb[18].mxu0  ;;  %v1844_v43 = vrot.slane %v6639_v38, 2 }
 0x205   :  { %v1849_v19 = vrot.slane %v5165_v41, 2  ;;  %v1751_v30 = vpop.f32.mrb[19].mxu0 }
 0x206   :  { %v1845_v33 = vrot.slane %v1751_v30, 2 }
 0x207   :  { %v1850_v34 = vsel %vm1843_vm1, %v1847_v31, %v1849_v19 }
 0x208   :  { %v6651_v46 = vadd.f32 %v5530_v15, %v1850_v34  ;;  %v1846_v37 = vsel %vm1843_vm1, %v1844_v43, %v1845_v33  ;;  %v1848_v47 = vsel %vm1843_vm1, %v1845_v33, %v1847_v31  ;;  %v5566_v34 = vadd.f32 %v6641_v28, %v6624_v32 }
 0x209   :  { %v6657_v48 = vadd.f32 %v5533_v22, %v1846_v37  ;;  %v6659_v39 = vadd.f32 %v5539_v45, %v1848_v47  ;;  %v5569_v37 = vadd.f32 %v6641_v28, %v6633_v35  ;;  %v5572_v47 = vadd.f32 %v6641_v28, %v6629_v8 }
 0x20a   :  { %v5168_v36 = vpop.f32.mrb[20].mxu0 }
 0x20b   :  { %v1764_v50 = vpop.f32.mrb[21].mxu0  ;;  %v1855_v49 = vrot.slane %v5168_v36, 2 }
 0x20c   :  { %v1851_v51 = vrot.slane %v1764_v50, 2  ;;  %v5169_v52 = vpop.f32.mrb[22].mxu0 }
 0x20d   :  { %v1857_v53 = vrot.slane %v5169_v52, 2  ;;  %v1767_v54 = vpop.f32.mrb[23].mxu0 }
 0x20e   :  { %v1853_v55 = vrot.slane %v1767_v54, 2  ;;  %v1852_v56 = vsel %vm1843_vm1, %v1849_v19, %v1851_v51 }
 0x20f   :  { %v5537_v61 = vadd.f32 %v5536_v40, %v1852_v56  ;;  %v1858_v1 = vsel %vm1843_vm1, %v1855_v49, %v1857_v53  ;;  %v6722_v40 = vld [vmem:[#allocation11] ss:$0 sm:$0xff] }
 0x210   :  { %v6671_v7 = vadd.f32 %v5542_v58, %v1858_v1  ;;  %v1854_v18 = vsel %vm1843_vm1, %v1851_v51, %v1853_v55  ;;  %v1856_v59 = vsel %vm1843_vm1, %v1853_v55, %v1855_v49 }
 0x211   :  { %v6675_v23 = vadd.f32 %v5545_v3, %v1854_v18  ;;  %v6677_v10 = vadd.f32 %v5551_v4, %v1856_v59 }
 0x212   :  { %v5172_v6 = vpop.f32.mrb[24].mxu0 }
 0x213   :  { %v1780_v9 = vpop.f32.mrb[25].mxu0  ;;  %v1863_v60 = vrot.slane %v5172_v6, 2 }
 0x214   :  { %v1859_v13 = vrot.slane %v1780_v9, 2  ;;  %v5173_v16 = vpop.f32.mrb[26].mxu0 }
 0x215   :  { %v1865_v21 = vrot.slane %v5173_v16, 2  ;;  %v1783_v62 = vpop.f32.mrb[27].mxu0 }
 0x216   :  { %v1861_v63 = vrot.slane %v1783_v62, 2  ;;  %v1860_v11 = vsel %vm1843_vm1, %v1857_v53, %v1859_v13 }
 0x217   :  { %v5549_v42 = vadd.f32 %v5548_v0, %v1860_v11  ;;  %v1866_v20 = vsel %vm1843_vm1, %v1863_v60, %v1865_v21 }
 0x218   :  { %v6689_v24 = vadd.f32 %v5554_v2, %v1866_v20  ;;  %v1862_v12 = vsel %vm1843_vm1, %v1859_v13, %v1861_v63  ;;  %v1864_v27 = vsel %vm1843_vm1, %v1861_v63, %v1863_v60 }
 0x219   :  { %v6693_v26 = vadd.f32 %v5557_v29, %v1862_v12  ;;  %v6695_v41 = vadd.f32 %v5563_v5, %v1864_v27 }
 0x21a   :  { %v5176_v14 = vpop.f32.mrb[28].mxu0 }
 0x21b   :  { %v1796_v31 = vpop.f32.mrb[29].mxu0  ;;  %v1871_v33 = vrot.slane %v5176_v14, 2 }
 0x21c   :  { %v1867_v19 = vrot.slane %v1796_v31, 2  ;;  %v5177_v30 = vpop.f32.mrb[30].mxu0 }
 0x21d   :  { %v1873_v15 = vrot.slane %v5177_v30, 2  ;;  %v1799_v57 = vpop.f32.mrb[31].mxu0 }
 0x21e   :  { %v1869_v22 = vrot.slane %v1799_v57, 2  ;;  %v1868_v45 = vsel %vm1843_vm1, %v1865_v21, %v1867_v19 }
 0x21f   :  { %v5561_v36 = vadd.f32 %v5560_v17, %v1868_v45  ;;  %v1874_v50 = vsel %vm1843_vm1, %v1871_v33, %v1873_v15  ;;  %v1892_v51 = vsel %vm1843_vm1, %v1873_v15, %v1844_v43 }
 0x220   :  { %v6712_v32 = vadd.f32 %v5566_v34, %v1874_v50  ;;  %v1870_v52 = vsel %vm1843_vm1, %v1867_v19, %v1869_v22  ;;  %v6715_v49 = vadd.f32 %v5572_v47, %v1892_v51  ;;  %v1872_v35 = vsel %vm1843_vm1, %v1869_v22, %v1871_v33 }
 0x221   :  { %v6718_v53 = vadd.f32 %v5569_v37, %v1870_v52  ;;  %v6720_v8 = vadd.f32 %v5575_v44, %v1872_v35 }
 0x222   :  { %v5196_v54 = vpop.f32.mrb[0].mxu0 }
 0x223   :  { %v5532_v38 = vadd.f32 %v6651_v46, %v5196_v54  ;;  %v2093_v43 = vpop.f32.mrb[1].mxu0 }
 0x224   :  { %v5535_v25 = vadd.f32 %v6657_v48, %v2093_v43  ;;  %v5197_v55 = vpop.f32.mrb[2].mxu0 }
 0x225   :  { %v2181_v56 = vadd.f32 %v5532_v38, %v6722_v40  ;;  %v5538_v58 = vadd.f32 %v5537_v61, %v5197_v55  ;;  %v2096_v1 = vpop.f32.mrb[3].mxu0 }
 0x226   :  { %v2179_v3 = vadd.f32 %v5535_v25, %v6722_v40  ;;  %v5541_v4 = vadd.f32 %v6659_v39, %v2096_v1 }
 0x227   :  { %v2197_v18 = vmax.f32 %v2181_v56, 0.0  ;;  %v2182_v59 = vadd.f32 %v5538_v58, %v6722_v40 }
 0x228   :  { %v2195_v6 = vmax.f32 %v2179_v3, 0.0  ;;  %v2180_v9 = vadd.f32 %v5541_v4, %v6722_v40 }
 0x229   :  { %2213 = vst [vmem:[#allocation13 + $0x10] sm:$0xff] %v2197_v18  ;;  %v2198_v46 = vmax.f32 %v2182_v59, 0.0 }
 0x22a   :  { %2211 = vst [vmem:[#allocation13] sm:$0xff] %v2195_v6  ;;  %v2196_v13 = vmax.f32 %v2180_v9, 0.0  ;;  %v5200_v48 = vpop.f32.mrb[4].mxu0 }
 0x22b   :  { %2214 = vst [vmem:[#allocation13 + $0x18] sm:$0xff] %v2198_v46  ;;  %v5544_v16 = vadd.f32 %v6671_v7, %v5200_v48  ;;  %v2109_v61 = vpop.f32.mrb[5].mxu0 }
 0x22c   :  { %2212 = vst [vmem:[#allocation13 + $0x8] sm:$0xff] %v2196_v13  ;;  %v5547_v60 = vadd.f32 %v6675_v23, %v2109_v61  ;;  %v5201_v21 = vpop.f32.mrb[6].mxu0 }
 0x22d   :  { %v2185_v39 = vadd.f32 %v5544_v16, %v6722_v40  ;;  %v5550_v62 = vadd.f32 %v5549_v42, %v5201_v21  ;;  %v2112_v0 = vpop.f32.mrb[7].mxu0 }
 0x22e   :  { %v2183_v63 = vadd.f32 %v5547_v60, %v6722_v40  ;;  %v5553_v11 = vadd.f32 %v6677_v10, %v2112_v0 }
 0x22f   :  { %v2201_v2 = vmax.f32 %v2185_v39, 0.0  ;;  %v2186_v20 = vadd.f32 %v5550_v62, %v6722_v40 }
 0x230   :  { %v2199_v29 = vmax.f32 %v2183_v63, 0.0  ;;  %v2184_v5 = vadd.f32 %v5553_v11, %v6722_v40 }
 0x231   :  { %2217 = vst [vmem:[#allocation13 + $0x30] sm:$0xff] %v2201_v2  ;;  %v2202_v7 = vmax.f32 %v2186_v20, 0.0 }
 0x232   :  { %2215 = vst [vmem:[#allocation13 + $0x20] sm:$0xff] %v2199_v29  ;;  %v2200_v12 = vmax.f32 %v2184_v5, 0.0  ;;  %v5204_v23 = vpop.f32.mrb[8].mxu0 }
 0x233   :  { %2218 = vst [vmem:[#allocation13 + $0x38] sm:$0xff] %v2202_v7  ;;  %v5556_v27 = vadd.f32 %v6689_v24, %v5204_v23  ;;  %v2125_v42 = vpop.f32.mrb[9].mxu0 }
 0x234   :  { %2216 = vst [vmem:[#allocation13 + $0x28] sm:$0xff] %v2200_v12  ;;  %v5559_v14 = vadd.f32 %v6693_v26, %v2125_v42  ;;  %v5205_v31 = vpop.f32.mrb[10].mxu0 }
 0x235   :  { %v2189_v10 = vadd.f32 %v5556_v27, %v6722_v40  ;;  %v5562_v19 = vadd.f32 %v5561_v36, %v5205_v31  ;;  %v2128_v30 = vpop.f32.mrb[11].mxu0 }
 0x236   :  { %v2187_v33 = vadd.f32 %v5559_v14, %v6722_v40  ;;  %v5565_v15 = vadd.f32 %v6695_v41, %v2128_v30 }
 0x237   :  { %v2205_v57 = vmax.f32 %v2189_v10, 0.0  ;;  %v2190_v17 = vadd.f32 %v5562_v19, %v6722_v40 }
 0x238   :  { %v2203_v34 = vmax.f32 %v2187_v33, 0.0  ;;  %v2188_v22 = vadd.f32 %v5565_v15, %v6722_v40 }
 0x239   :  { %2221 = vst [vmem:[#allocation13 + $0x50] sm:$0xff] %v2205_v57  ;;  %v2206_v24 = vmax.f32 %v2190_v17, 0.0 }
 0x23a   :  { %2219 = vst [vmem:[#allocation13 + $0x40] sm:$0xff] %v2203_v34  ;;  %v2204_v45 = vmax.f32 %v2188_v22, 0.0  ;;  %v5208_v26 = vpop.f32.mrb[12].mxu0 }
 0x23b   :  { %2222 = vst [vmem:[#allocation13 + $0x58] sm:$0xff] %v2206_v24  ;;  %v5568_v37 = vadd.f32 %v6712_v32, %v5208_v26  ;;  %v2141_v47 = vpop.f32.mrb[13].mxu0 }
 0x23c   :  { %2220 = vst [vmem:[#allocation13 + $0x48] sm:$0xff] %v2204_v45  ;;  %v5571_v36 = vadd.f32 %v6718_v53, %v2141_v47  ;;  %v5209_v50 = vpop.f32.mrb[14].mxu0 }
 0x23d   :  { %v2193_v41 = vadd.f32 %v5568_v37, %v6722_v40  ;;  %v5574_v51 = vadd.f32 %v6715_v49, %v5209_v50  ;;  %v2144_v44 = vpop.f32.mrb[15].mxu0 }
 0x23e   :  { %v2191_v52 = vadd.f32 %v5571_v36, %v6722_v40  ;;  %v5577_v35 = vadd.f32 %v6720_v8, %v2144_v44 }
 0x23f   :  { %v2209_v54 = vmax.f32 %v2193_v41, 0.0  ;;  %v2194_v38 = vadd.f32 %v5574_v51, %v6722_v40 }
 0x240   :  { %v2207_v43 = vmax.f32 %v2191_v52, 0.0  ;;  %v2192_v32 = vadd.f32 %v5577_v35, %v6722_v40 }
 0x241   :  { %2225 = vst [vmem:[#allocation13 + $0x70] sm:$0xff] %v2209_v54  ;;  %v2210_v25 = vmax.f32 %v2194_v38, 0.0 }
 0x242   :  { %2223 = vst [vmem:[#allocation13 + $0x60] sm:$0xff] %v2207_v43  ;;  %v2208_v53 = vmax.f32 %v2192_v32, 0.0 }
 0x243   :  { %2226 = vst [vmem:[#allocation13 + $0x78] sm:$0xff] %v2210_v25 }
 0x244   :  { %2224 = vst [vmem:[#allocation13 + $0x68] sm:$0xff] %v2208_v53 }
 0x263   :  { %v5388_v55 = vpop.f32.mrb[32].mxu1 }
 0x264   :  { %v3283_v56 = vpop.f32.mrb[33].mxu1  ;;  %v3381_v58 = vrot.slane %v5388_v55, 1 }
 0x265   :  { %v5389_v49 = vpop.f32.mrb[34].mxu1  ;;  %v3378_v4 = vrot.slane %v3283_v56, 1 }
 0x266   :  { %v3383_v1 = vrot.slane %v5389_v49, 1  ;;  %v3286_v3 = vpop.f32.mrb[35].mxu1 }
 0x267   :  { %v3379_v8 = vrot.slane %v3286_v3, 1 }
 0x268   :  { %v3384_v18 = vsel %vm1259_vm0, %v3381_v58, %v3383_v1 }
 0x269   :  { %v3380_v59 = vsel %vm1259_vm0, %v3378_v4, %v3379_v8  ;;  %v3382_v6 = vsel %vm1259_vm0, %v3379_v8, %v3381_v58  ;;  %v5578_v38 = vadd.f32 %v6641_v28, %v3384_v18 }
 0x26a   :  { %v5581_v53 = vadd.f32 %v6641_v28, %v3380_v59  ;;  %v5587_v56 = vadd.f32 %v6641_v28, %v3382_v6 }
 0x26b   :  { %v5392_v9 = vpop.f32.mrb[36].mxu1 }
 0x26c   :  { %v3299_v46 = vpop.f32.mrb[37].mxu1  ;;  %v3389_v16 = vrot.slane %v5392_v9, 1 }
 0x26d   :  { %v3385_v13 = vrot.slane %v3299_v46, 1  ;;  %v5393_v48 = vpop.f32.mrb[38].mxu1 }
 0x26e   :  { %v3391_v61 = vrot.slane %v5393_v48, 1  ;;  %v3302_v60 = vpop.f32.mrb[39].mxu1 }
 0x26f   :  { %v3386_v21 = vsel %vm1259_vm0, %v3383_v1, %v3385_v13  ;;  %v3387_v39 = vrot.slane %v3302_v60, 1 }
 0x270   :  { %v3392_v62 = vsel %vm1259_vm0, %v3389_v16, %v3391_v61  ;;  %v5584_v9 = vadd.f32 %v6641_v28, %v3386_v21 }
 0x271   :  { %v3388_v0 = vsel %vm1259_vm0, %v3385_v13, %v3387_v39  ;;  %v6760_v63 = vsel %vm1259_vm0, %v3387_v39, %v3389_v16  ;;  %v5590_v16 = vadd.f32 %v6641_v28, %v3392_v62 }
 0x272   :  { %v5593_v6 = vadd.f32 %v6641_v28, %v3388_v0  ;;  %v5599_v0 = vadd.f32 %v6641_v28, %v6760_v63 }
 0x273   :  { %v5396_v11 = vpop.f32.mrb[40].mxu1 }
 0x274   :  { %v3315_v2 = vpop.f32.mrb[41].mxu1  ;;  %v3397_v5 = vrot.slane %v5396_v11, 1 }
 0x275   :  { %v3393_v20 = vrot.slane %v3315_v2, 1  ;;  %v5397_v29 = vpop.f32.mrb[42].mxu1 }
 0x276   :  { %v3399_v7 = vrot.slane %v5397_v29, 1  ;;  %v3318_v12 = vpop.f32.mrb[43].mxu1 }
 0x277   :  { %v6763_v23 = vsel %vm1259_vm0, %v3391_v61, %v3393_v20  ;;  %v3395_v27 = vrot.slane %v3318_v12, 1 }
 0x278   :  { %v6766_v42 = vsel %vm1259_vm0, %v3397_v5, %v3399_v7 }
 0x279   :  { %v6769_v14 = vsel %vm1259_vm0, %v3393_v20, %v3395_v27  ;;  %v6772_v31 = vsel %vm1259_vm0, %v3395_v27, %v3397_v5 }
 0x27b   :  { %v5400_v10 = vpop.f32.mrb[44].mxu1 }
 0x27c   :  { %v3331_v19 = vpop.f32.mrb[45].mxu1  ;;  %v3405_v15 = vrot.slane %v5400_v10, 1 }
 0x27d   :  { %v3401_v30 = vrot.slane %v3331_v19, 1  ;;  %v5401_v33 = vpop.f32.mrb[46].mxu1 }
 0x27e   :  { %v3407_v57 = vrot.slane %v5401_v33, 1  ;;  %v3334_v17 = vpop.f32.mrb[47].mxu1 }
 0x27f   :  { %v6775_v34 = vsel %vm1259_vm0, %v3399_v7, %v3401_v30  ;;  %v3403_v22 = vrot.slane %v3334_v17, 1 }
 0x280   :  { %v6778_v24 = vsel %vm1259_vm0, %v3405_v15, %v3407_v57  ;;  %v6781_v45 = vsel %vm1259_vm0, %v3407_v57, %v3378_v4 }
 0x281   :  { %v6784_v26 = vsel %vm1259_vm0, %v3401_v30, %v3403_v22  ;;  %v6787_v37 = vsel %vm1259_vm0, %v3403_v22, %v3405_v15 }
 0x282   :  { %v5484_v47 = vpop.f32.mrb[32].mxu0 }
 0x283   :  { %v5516_v36 = vpop.f32.mrb[16].mxu1  ;;  %v6789_v50 = vpop.f32.mrb[33].mxu0  ;;  %v3961_v44 = vrot.slane %v5484_v47, 2 }
 0x284   :  { %v4202_v41 = vpop.f32.mrb[17].mxu1  ;;  %v5485_v51 = vpop.f32.mrb[34].mxu0  ;;  %v3958_v43 = vrot.slane %v6789_v50, 2 }
 0x285   :  { %v3963_v52 = vrot.slane %v5485_v51, 2  ;;  %v5517_v35 = vpop.f32.mrb[18].mxu1  ;;  %v3866_v54 = vpop.f32.mrb[35].mxu0  ;;  %v5596_v51 = vadd.f32 %v6641_v28, %v6763_v23 }
 0x286   :  { %v3959_v32 = vrot.slane %v3866_v54, 2  ;;  %v4205_v25 = vpop.f32.mrb[19].mxu1 }
 0x287   :  { %v3964_v55 = vsel %vm1843_vm1, %v3961_v44, %v3963_v52 }
 0x288   :  { %v5579_v49 = vadd.f32 %v5578_v38, %v3964_v55  ;;  %v3960_v58 = vsel %vm1843_vm1, %v3958_v43, %v3959_v32  ;;  %v3962_v1 = vsel %vm1843_vm1, %v3959_v32, %v3961_v44  ;;  %v5605_v55 = vadd.f32 %v6641_v28, %v6769_v14 }
 0x289   :  { %v5582_v3 = vadd.f32 %v5581_v53, %v3960_v58  ;;  %v5588_v4 = vadd.f32 %v5587_v56, %v3962_v1  ;;  %v5611_v14 = vadd.f32 %v6641_v28, %v6772_v31  ;;  %v5608_v31 = vadd.f32 %v6641_v28, %v6775_v34 }
 0x28a   :  { %v5580_v8 = vadd.f32 %v5579_v49, %v5516_v36  ;;  %v5488_v18 = vpop.f32.mrb[36].mxu0 }
 0x28b   :  { %v5583_v46 = vadd.f32 %v5582_v3, %v4202_v41  ;;  %v5589_v13 = vadd.f32 %v5588_v4, %v4205_v25  ;;  %v5520_v59 = vpop.f32.mrb[20].mxu1  ;;  %v3879_v48 = vpop.f32.mrb[37].mxu0  ;;  %v3969_v29 = vrot.slane %v5488_v18, 2 }
 0x28c   :  { %v4290_v61 = vadd.f32 %v5580_v8, %v6722_v40  ;;  %v3965_v60 = vrot.slane %v3879_v48, 2  ;;  %v4218_v39 = vpop.f32.mrb[21].mxu1  ;;  %v5489_v11 = vpop.f32.mrb[38].mxu0 }
 0x28d   :  { %v4288_v2 = vadd.f32 %v5583_v46, %v6722_v40  ;;  %v4289_v20 = vadd.f32 %v5589_v13, %v6722_v40  ;;  %v3971_v5 = vrot.slane %v5489_v11, 2  ;;  %v5521_v21 = vpop.f32.mrb[22].mxu1  ;;  %v3882_v7 = vpop.f32.mrb[39].mxu0 }
 0x28e   :  { %v4306_v12 = vmax.f32 %v4290_v61, 0.0  ;;  %v3966_v27 = vsel %vm1843_vm1, %v3963_v52, %v3965_v60  ;;  %v3967_v10 = vrot.slane %v3882_v7, 2  ;;  %v4221_v62 = vpop.f32.mrb[23].mxu1  ;;  %v5602_v52 = vadd.f32 %v6641_v28, %v6766_v42 }
 0x28f   :  { %v4304_v19 = vmax.f32 %v4288_v2, 0.0  ;;  %v4305_v30 = vmax.f32 %v4289_v20, 0.0  ;;  %v5585_v33 = vadd.f32 %v5584_v9, %v3966_v27  ;;  %v3972_v15 = vsel %vm1843_vm1, %v3969_v29, %v3971_v5 }
 0x290   :  { %4323 = vst [vmem:[#allocation13 + $0x90] sm:$0xff] %v4306_v12  ;;  %v5591_v57 = vadd.f32 %v5590_v16, %v3972_v15  ;;  %v3968_v17 = vsel %vm1843_vm1, %v3965_v60, %v3967_v10  ;;  %v3970_v22 = vsel %vm1843_vm1, %v3967_v10, %v3969_v29 }
 0x291   :  { %4321 = vst [vmem:[#allocation13 + $0x80] sm:$0xff] %v4304_v19  ;;  %4322 = vst [vmem:[#allocation13 + $0x88] sm:$0xff] %v4305_v30  ;;  %v5586_v47 = vadd.f32 %v5585_v33, %v5517_v35  ;;  %v5594_v36 = vadd.f32 %v5593_v6, %v3968_v17  ;;  %v5600_v41 = vadd.f32 %v5599_v0, %v3970_v22 }
 0x292   :  { %v5592_v63 = vadd.f32 %v5591_v57, %v5520_v59  ;;  %v5492_v44 = vpop.f32.mrb[40].mxu0  ;;  %v5620_v30 = vadd.f32 %v6641_v28, %v6781_v45 }
 0x293   :  { %v4291_v54 = vadd.f32 %v5586_v47, %v6722_v40  ;;  %v5595_v38 = vadd.f32 %v5594_v36, %v4218_v39  ;;  %v5601_v32 = vadd.f32 %v5600_v41, %v4221_v62  ;;  %v5524_v25 = vpop.f32.mrb[24].mxu1  ;;  %v3895_v53 = vpop.f32.mrb[41].mxu0  ;;  %v3977_v56 = vrot.slane %v5492_v44, 2 }
 0x294   :  { %v4294_v35 = vadd.f32 %v5592_v63, %v6722_v40  ;;  %v3973_v49 = vrot.slane %v3895_v53, 2  ;;  %v4234_v58 = vpop.f32.mrb[25].mxu1  ;;  %v5493_v23 = vpop.f32.mrb[42].mxu0 }
 0x295   :  { %v4307_v1 = vmax.f32 %v4291_v54, 0.0  ;;  %v4292_v3 = vadd.f32 %v5595_v38, %v6722_v40  ;;  %v4293_v42 = vadd.f32 %v5601_v32, %v6722_v40  ;;  %v3979_v4 = vrot.slane %v5493_v23, 2  ;;  %v5525_v8 = vpop.f32.mrb[26].mxu1  ;;  %v3898_v18 = vpop.f32.mrb[43].mxu0 }
 0x296   :  { %v4310_v9 = vmax.f32 %v4294_v35, 0.0  ;;  %v3974_v46 = vsel %vm1843_vm1, %v3971_v5, %v3973_v49  ;;  %v3975_v13 = vrot.slane %v3898_v18, 2  ;;  %v4237_v59 = vpop.f32.mrb[27].mxu1  ;;  %v5614_v5 = vadd.f32 %v6641_v28, %v6778_v24 }
 0x297   :  { %4324 = vst [vmem:[#allocation13 + $0x98] sm:$0xff] %v4307_v1  ;;  %v4308_v48 = vmax.f32 %v4292_v3, 0.0  ;;  %v4309_v16 = vmax.f32 %v4293_v42, 0.0  ;;  %v5597_v6 = vadd.f32 %v5596_v51, %v3974_v46  ;;  %v3980_v61 = vsel %vm1843_vm1, %v3977_v56, %v3979_v4 }
 0x298   :  { %4327 = vst [vmem:[#allocation13 + $0xb0] sm:$0xff] %v4310_v9  ;;  %v5603_v60 = vadd.f32 %v5602_v52, %v3980_v61  ;;  %v3976_v39 = vsel %vm1843_vm1, %v3973_v49, %v3975_v13  ;;  %v3978_v11 = vsel %vm1843_vm1, %v3975_v13, %v3977_v56 }
 0x299   :  { %4325 = vst [vmem:[#allocation13 + $0xa0] sm:$0xff] %v4308_v48  ;;  %4326 = vst [vmem:[#allocation13 + $0xa8] sm:$0xff] %v4309_v16  ;;  %v5598_v2 = vadd.f32 %v5597_v6, %v5521_v21  ;;  %v5606_v20 = vadd.f32 %v5605_v55, %v3976_v39  ;;  %v5612_v29 = vadd.f32 %v5611_v14, %v3978_v11 }
 0x29a   :  { %v5604_v7 = vadd.f32 %v5603_v60, %v5524_v25  ;;  %v5496_v12 = vpop.f32.mrb[44].mxu0  ;;  %v5617_v21 = vadd.f32 %v6641_v28, %v6784_v26  ;;  %v5623_v26 = vadd.f32 %v6641_v28, %v6787_v37 }
 0x29b   :  { %v4295_v27 = vadd.f32 %v5598_v2, %v6722_v40  ;;  %v5607_v10 = vadd.f32 %v5606_v20, %v4234_v58  ;;  %v5613_v62 = vadd.f32 %v5612_v29, %v4237_v59  ;;  %v5528_v0 = vpop.f32.mrb[28].mxu1  ;;  %v3911_v19 = vpop.f32.mrb[45].mxu0  ;;  %v3985_v34 = vrot.slane %v5496_v12, 2 }
 0x29c   :  { %v4298_v33 = vadd.f32 %v5604_v7, %v6722_v40  ;;  %v3981_v15 = vrot.slane %v3911_v19, 2  ;;  %v4250_v57 = vpop.f32.mrb[29].mxu1  ;;  %v5497_v24 = vpop.f32.mrb[46].mxu0 }
 0x29d   :  { %v4311_v17 = vmax.f32 %v4295_v27, 0.0  ;;  %v4296_v22 = vadd.f32 %v5607_v10, %v6722_v40  ;;  %v4297_v47 = vadd.f32 %v5613_v62, %v6722_v40  ;;  %v3987_v36 = vrot.slane %v5497_v24, 2  ;;  %v5529_v41 = vpop.f32.mrb[30].mxu1  ;;  %v3914_v51 = vpop.f32.mrb[47].mxu0 }
 0x29e   :  { %v4314_v63 = vmax.f32 %v4298_v33, 0.0  ;;  %v3982_v45 = vsel %vm1843_vm1, %v3979_v4, %v3981_v15  ;;  %v3983_v44 = vrot.slane %v3914_v51, 2  ;;  %v4253_v52 = vpop.f32.mrb[31].mxu1 }
 0x29f   :  { %4328 = vst [vmem:[#allocation13 + $0xb8] sm:$0xff] %v4311_v17  ;;  %v4312_v54 = vmax.f32 %v4296_v22, 0.0  ;;  %v4313_v38 = vmax.f32 %v4297_v47, 0.0  ;;  %v5609_v32 = vadd.f32 %v5608_v31, %v3982_v45  ;;  %v3988_v25 = vsel %vm1843_vm1, %v3985_v34, %v3987_v36 }
 0x2a0   :  { %4331 = vst [vmem:[#allocation13 + $0xd0] sm:$0xff] %v4314_v63  ;;  %v5615_v53 = vadd.f32 %v5614_v5, %v3988_v25  ;;  %v4006_v55 = vsel %vm1843_vm1, %v3987_v36, %v3958_v43  ;;  %v3984_v35 = vsel %vm1843_vm1, %v3981_v15, %v3983_v44  ;;  %v3986_v56 = vsel %vm1843_vm1, %v3983_v44, %v3985_v34 }
 0x2a1   :  { %4329 = vst [vmem:[#allocation13 + $0xc0] sm:$0xff] %v4312_v54  ;;  %4330 = vst [vmem:[#allocation13 + $0xc8] sm:$0xff] %v4313_v38  ;;  %v5610_v49 = vadd.f32 %v5609_v32, %v5525_v8  ;;  %v5621_v28 = vadd.f32 %v5620_v30, %v4006_v55  ;;  %v5618_v37 = vadd.f32 %v5617_v21, %v3984_v35 }
 0x2a2   :  { %v5624_v58 = vadd.f32 %v5623_v26, %v3986_v56  ;;  %v5616_v23 = vadd.f32 %v5615_v53, %v5528_v0 }
 0x2a3   :  { %v4299_v1 = vadd.f32 %v5610_v49, %v6722_v40  ;;  %v5622_v3 = vadd.f32 %v5621_v28, %v5529_v41  ;;  %v5619_v42 = vadd.f32 %v5618_v37, %v4250_v57 }
 0x2a4   :  { %v5625_v4 = vadd.f32 %v5624_v58, %v4253_v52  ;;  %v4302_v50 = vadd.f32 %v5616_v23, %v6722_v40 }
 0x2a5   :  { %v4315_v43 = vmax.f32 %v4299_v1, 0.0  ;;  %v4303_v18 = vadd.f32 %v5622_v3, %v6722_v40  ;;  %v4300_v9 = vadd.f32 %v5619_v42, %v6722_v40 }
 0x2a6   :  { %v4301_v8 = vadd.f32 %v5625_v4, %v6722_v40  ;;  %v4318_v46 = vmax.f32 %v4302_v50, 0.0 }
 0x2a7   :  { %4332 = vst [vmem:[#allocation13 + $0xd8] sm:$0xff] %v4315_v43  ;;  %v4319_v13 = vmax.f32 %v4303_v18, 0.0  ;;  %v4316_v59 = vmax.f32 %v4300_v9, 0.0 }
 0x2a8   :  { %v4317_v14 = vmax.f32 %v4301_v8, 0.0  ;;  %4335 = vst [vmem:[#allocation13 + $0xf0] sm:$0xff] %v4318_v46 }
 0x2a9   :  { %4336 = vst [vmem:[#allocation13 + $0xf8] sm:$0xff] %v4319_v13  ;;  %4333 = vst [vmem:[#allocation13 + $0xe0] sm:$0xff] %v4316_v59 }
 0x2aa   :  { %4334 = vst [vmem:[#allocation13 + $0xe8] sm:$0xff] %v4317_v14 }
 0x2ab   :  { %6224 = shalt.err (!%p6221_p10)
}
 0x2ac   :  { %s6225_s22 = scalar_lea.hbm %s6872_s6, 4096 }
 0x2ad   :  { %p6226_p11 = scmp.ne.s32.totalorder %s6872_s6, %s6225_s22  ;;  %p6229_p12 = scmp.lt.u32.totalorder %s6225_s22, %s6872_s6 }
 0x2af   :  { %p6231_p13 = pnand %p6229_p12, %p6226_p11 }
 0x2b1   :  { %6234 = shalt.err (!%p6231_p13)
}
 0x2b2   :  { %s6254_s29 = smov 128   ;;  %s6255_s30 = smov 8  }
 0x2b3   :  { %4348 = dma.vmem_to_hbm [thread:$0]  %s4343_s10, 4096, %s6872_s6, [#allocation4], %s6254_s29, %s6254_s29, %s6255_s30  }
 0x2b4   :  { %6243 = dma.done.wait [#allocation4], 4096  }
 0x2b5   :  { %6244 = vsyncadd [#allocation4], 4294963200 }
 0x2b6   :  { %4352 = vsyncpa [#allocation3], 1 }
 0x2b7   :  { %4353 = vsyncpa [#allocation6], 1 }
 0x2b8   :  { %4354 = vsyncpa [#allocation9], 1 }
 0x2b9   :  { %4355 = vsyncpa [#allocation12], 1 }
 0x2ba   :  { %4356 = vsyncpa [#allocation4], 1 }

</bundles_post_ra>
